<compile_context>
chip_gen: v7x
topology: tpu7x:2x2x1
jax: 0.10.0
libtpu: 0.0.40
codegen_flags: <defaults>
</compile_context>

<pallas_src>
import functools

import jax
import jax.numpy as jnp
import numpy as np
from jax import lax
from jax.experimental import pallas as pl
from jax.experimental.pallas import tpu as pltpu


_LPAD = 8   # interior column offset inside the padded scratch (sublane aligned)
_RPAD = 8   # right border slab width (keeps border zero-stores 8-wide/aligned)
_HALO = 3   # input rows of halo above/below a strip (3 chained 3x3 convs)


def _vmem_limit_bytes():
    """Generation-aware VMEM limit: ~48 MiB on v7x, up to ~96 MiB on v5e/v6e."""
    try:
        cap = pltpu.get_tpu_info().vmem_capacity_bytes
    except Exception:                      # defensive: assume smallest budget
        cap = 64 * 1024 * 1024
    return int(min(int(cap * 0.75), 96 * 1024 * 1024))


def _pick_strip_h(H):
    """Largest even divisor of H that keeps a strip reasonably small."""
    for h in range(min(H, 16), 1, -1):
        if H % h == 0 and h % 2 == 0:
            return h
    return H


# ------------------------------ fused kernel -------------------------------


def resblock_body_nhwc(x, params, out_channels, strip_h=None):
    """x: (N, H, W, Cin) NHWC.  Returns (pooled NHWC, feat NHWC)."""
    N, H, W, Cin = x.shape
    C = out_channels
    Ch = C // 2
    assert H % 2 == 0 and W % 2 == 0, "MaxPool2d(2,2) expects even H, W"
    tH = _pick_strip_h(H) if strip_h is None else strip_h
    assert H % tH == 0 and tH % 2 == 0, "strip_h must be an even divisor of H"
    S = H // tH
    Ho, Wo = H // 2, W // 2
    PW = W + _LPAD + _RPAD          # padded-scratch width
    hR = tH + 4                     # conv1 rows per strip: image [r0-2, r0+tH+2)
    hR1 = tH + 2                    # conv2 rows per strip: image [r0-1, r0+tH+1)

    bf16 = jnp.bfloat16
    w1, s1, b1 = params["conv1"]
    w2, s2, b2 = params["conv2"]
    w3, s3, b3 = params["conv3"]
    w4, s4, b4 = params["conv4"]
    w1f = w1.reshape(9 * Cin, C).astype(bf16)     # im2col weight layouts (bf16)
    w2f = w2.reshape(9 * Ch, Ch).astype(bf16)
    w3f = w3.reshape(9 * Ch, Ch).astype(bf16)
    w4f = w4.astype(bf16)                         # (C, C): rows [0:Ch]=conv3, [Ch:]=route1

    # Host pre-pad H by the halo so every strip can read (tH+6) valid rows.
    x_pad = jnp.pad(x, ((0, 0), (_HALO, _HALO), (0, 0), (0, 0)))

    def kernel(x_ref, w1_ref, s1_ref, b1_ref, w2_ref, s2_ref, b2_ref,
               w3_ref, s3_ref, b3_ref, w4_ref, s4_ref, b4_ref,
               feat_ref, pool_ref, pad_in, pad_half):
        s = pl.program_id(1)
        r0 = pl.multiple_of(s * tH, tH)           # first output row of this strip

        # SAME zero padding along W: only the border columns are ever read; zero
        # the 8-wide aligned border slabs each step (cheap, core-safe).
        pad_in[:, 0:_LPAD, :] = jnp.zeros((tH + 6, _LPAD, Cin), pad_in.dtype)
        pad_in[:, _LPAD + W:, :] = jnp.zeros((tH + 6, _RPAD, Cin), pad_in.dtype)
        pad_half[:, 0:_LPAD, :] = jnp.zeros((hR, _LPAD, Ch), pad_half.dtype)
        pad_half[:, _LPAD + W:, :] = jnp.zeros((hR, _RPAD, Ch), pad_half.dtype)

        def conv3x3(pad_ref, w_ref, s_ref, b_ref, h_out, cin):
            # im2col: one (h_out*W, 9*cin) bf16 patch matrix -> a single MXU dot.
            cols = [pad_ref[kh:kh + h_out, kw + _LPAD - 1:kw + _LPAD - 1 + W, :]
                    .reshape(h_out * W, cin)
                    for kh in range(3) for kw in range(3)]
            patches = jnp.concatenate(cols, axis=-1)
            y = jnp.dot(patches, w_ref[...], preferred_element_type=jnp.float32)
            y = y * s_ref[...] + b_ref[...]       # folded BatchNorm (f32)
            return jnp.maximum(y, 0.1 * y)        # LeakyReLU(0.1)

        def pool2x2(y3d):                         # (tH, W, c) f32 -> (tH/2, Wo, c)
            c = y3d.shape[-1]
            y = y3d.reshape(tH // 2, 2, W, c)
            y = jnp.maximum(y[:, 0], y[:, 1])                    # row pairs
            y = y.reshape(tH // 2, Wo, 2, c)
            return jnp.maximum(y[:, :, 0, :], y[:, :, 1, :])     # col pairs

        def row_mask(y3d, first_img_row):
            # Zero halo rows that lie outside the real image before they feed
            # the next SAME-padded conv (restores true zero padding per strip).
            rows = lax.broadcasted_iota(jnp.int32, (y3d.shape[0], 1, 1), 0)
            rows = rows + first_img_row
            return jnp.where((rows >= 0) & (rows < H), y3d, 0.0)

        # ---- conv1: 3x3, Cin -> C, over image rows [r0-2, r0+tH+2) ----------
        pad_in[:, _LPAD:_LPAD + W, :] = (
            x_ref[0, pl.ds(r0, tH + 6), :, :].astype(pad_in.dtype))
        route = conv3x3(pad_in, w1_ref, s1_ref, b1_ref, hR, Cin)     # (hR*W, C)
        route3d = route.reshape(hR, W, C)

        # ---- conv2: 3x3 on the upper channel half of route (torch.split[1]) -
        half = row_mask(route3d[:, :, Ch:], r0 - 2)
        pad_half[:, _LPAD:_LPAD + W, :] = half.astype(pad_half.dtype)
        route1 = conv3x3(pad_half, w2_ref, s2_ref, b2_ref, hR1, Ch)  # (hR1*W, Ch)
        route1_3d = route1.reshape(hR1, W, Ch)

        # ---- conv3: 3x3 on conv2 output (reuse the same padded scratch) -----
        r1m = row_mask(route1_3d, r0 - 1)
        pad_half[0:hR1, _LPAD:_LPAD + W, :] = r1m.astype(pad_half.dtype)
        x3 = conv3x3(pad_half, w3_ref, s3_ref, b3_ref, tH, Ch)       # (tH*W, Ch)

        # ---- conv4: 1x1 on concat([x3, route1]): one K=C MXU dot ------------
        r1_mid = route1_3d[1:1 + tH].reshape(tH * W, Ch)
        cat = jnp.concatenate([x3, r1_mid], axis=-1).astype(w4_ref.dtype)
        feat = jnp.dot(cat, w4_ref[...], preferred_element_type=jnp.float32)
        feat = feat * s4_ref[...] + b4_ref[...]
        feat = jnp.maximum(feat, 0.1 * feat)                         # (tH*W, C)
        feat3d = feat.reshape(tH, W, C)
        feat_ref[0] = feat3d.astype(feat_ref.dtype)

        # ---- maxpool of concat([route, feat]): two direct sub-range stores --
        pool_ref[0, :, :, 0:C] = pool2x2(route3d[2:2 + tH]).astype(pool_ref.dtype)
        pool_ref[0, :, :, C:2 * C] = pool2x2(feat3d).astype(pool_ref.dtype)

    def _rep(shape):                              # grid-constant operand
        zeros = (0,) * len(shape)
        return pl.BlockSpec(shape, lambda n, st: zeros)

    grid_spec = pltpu.PrefetchScalarGridSpec(
        num_scalar_prefetch=0,
        grid=(N, S),
        in_specs=[
            # Whole (small) pre-padded image stays resident per batch element;
            # the kernel slices the (tH+6)-row halo window out of it.
            pl.BlockSpec((1, H + 2 * _HALO, W, Cin), lambda n, st: (n, 0, 0, 0)),
            _rep((9 * Cin, C)), _rep((1, C)), _rep((1, C)),
            _rep((9 * Ch, Ch)), _rep((1, Ch)), _rep((1, Ch)),
            _rep((9 * Ch, Ch)), _rep((1, Ch)), _rep((1, Ch)),
            _rep((C, C)), _rep((1, C)), _rep((1, C)),
        ],
        out_specs=[
            pl.BlockSpec((1, tH, W, C), lambda n, st: (n, st, 0, 0)),
            pl.BlockSpec((1, tH // 2, Wo, 2 * C), lambda n, st: (n, st, 0, 0)),
        ],
        scratch_shapes=[
            pltpu.VMEM((tH + 6, PW, Cin), jnp.bfloat16),   # padded input strip
            pltpu.VMEM((hR, PW, Ch), jnp.bfloat16),        # padded half strip
        ],
    )

    feat, pooled = pl.pallas_call(
        kernel,
        out_shape=(jax.ShapeDtypeStruct((N, H, W, C), x.dtype),
                   jax.ShapeDtypeStruct((N, Ho, Wo, 2 * C), x.dtype)),
        grid_spec=grid_spec,
        compiler_params=pltpu.CompilerParams(
            dimension_semantics=("parallel", "parallel"),
            vmem_limit_bytes=_vmem_limit_bytes()),
    )(x_pad, w1f, s1, b1, w2f, s2, b2, w3f, s3, b3, w4f, s4, b4)

    # TODO(synk): optionally emit feat/pooled in bf16 when the downstream layer
    # accepts it (largest HBM write; matters most on v5e).
    return pooled, feat


def resblock_body(x_nchw, params, out_channels, strip_h=None):
    # TODO(synk): in a full network keep activations NHWC end-to-end and call
    # resblock_body_nhwc directly; these transposes only match the torch API.
    x = jnp.transpose(x_nchw, (0, 2, 3, 1))
    pooled, feat = resblock_body_nhwc(x, params, out_channels, strip_h)
    return (jnp.transpose(pooled, (0, 3, 1, 2)),
            jnp.transpose(feat, (0, 3, 1, 2)))


# --------------------------- parameters (BN folded) ------------------------


def init_basic_conv(key, cin, cout, ksize):
    kw, kg, kb, km, kv = jax.random.split(key, 5)
    fan_in = cin * ksize * ksize
    w = jax.random.normal(kw, (ksize, ksize, cin, cout),
                          jnp.float32) / np.sqrt(fan_in)
    gamma = 1.0 + 0.1 * jax.random.normal(kg, (cout,), jnp.float32)
    beta = 0.1 * jax.random.normal(kb, (cout,), jnp.float32)
    mean = 0.1 * jax.random.normal(km, (cout,), jnp.float32)
    var = jnp.abs(1.0 + 0.1 * jax.random.normal(kv, (cout,), jnp.float32))
    eps = 1e-5
    scale = gamma / jnp.sqrt(var + eps)          # BN folded (eval mode)
    shift = beta - mean * scale
    if ksize == 1:
        w = w.reshape(cin, cout)                 # 1x1 conv stored as matrix
    return w, scale.reshape(1, cout), shift.reshape(1, cout)


def init_resblock_body(key, in_channels, out_channels):
    k1, k2, k3, k4 = jax.random.split(key, 4)
    c = out_channels
    return {
        "conv1": init_basic_conv(k1, in_channels, c, 3),
        "conv2": init_basic_conv(k2, c // 2, c // 2, 3),
        "conv3": init_basic_conv(k3, c // 2, c // 2, 3),
        "conv4": init_basic_conv(k4, c, c, 1),
    }


# --------------------------------- reference -------------------------------
# Mirrors the kernel's bf16-matmul-operand / f32-accumulate numerics so the
# comparison tolerance can stay tight.


def _ref_conv_bn_act(x, w, scale, shift, pad):
    if w.ndim == 2:
        w = w.reshape(1, 1, *w.shape)
    y = lax.conv_general_dilated(
        x.astype(jnp.bfloat16), w.astype(jnp.bfloat16),
        window_strides=(1, 1), padding=[(pad, pad), (pad, pad)],
        dimension_numbers=("NHWC", "HWIO", "NHWC"),
        preferred_element_type=jnp.float32)
    y = y * scale.reshape(1, 1, 1, -1) + shift.reshape(1, 1, 1, -1)
    return jnp.where(y > 0, y, 0.1 * y)


def ref_resblock_body(x_nchw, params, out_channels):
    x = jnp.transpose(x_nchw, (0, 2, 3, 1))
    c = out_channels
    x = _ref_conv_bn_act(x, *params["conv1"], pad=1)
    route = x
    x = x[..., c // 2:]
    x = _ref_conv_bn_act(x, *params["conv2"], pad=1)
    route1 = x
    x = _ref_conv_bn_act(x, *params["conv3"], pad=1)
    x = jnp.concatenate([x, route1], axis=-1)
    feat = _ref_conv_bn_act(x, *params["conv4"], pad=0)
    x = jnp.concatenate([route, feat], axis=-1)
    N, H, W, C = x.shape
    pooled = x.reshape(N, H // 2, 2, W // 2, 2, C).max(axis=(2, 4))
    return (jnp.transpose(pooled, (0, 3, 1, 2)),
            jnp.transpose(feat, (0, 3, 1, 2)))


# ----------------------------------- main -----------------------------------


if __name__ == "__main__":
    in_channels, out_channels = 4, 8
    N, H, W = 2, 16, 16

    key = jax.random.PRNGKey(0)
    kx, kp = jax.random.split(key)
    x = jax.random.normal(kx, (N, in_channels, H, W), jnp.float32)  # NCHW
    params = init_resblock_body(kp, in_channels, out_channels)

    # strip_h=4 -> 4 strips per image: exercises top / interior / bottom strips.
    fwd = jax.jit(functools.partial(resblock_body, out_channels=out_channels,
                                    strip_h=4))
    pooled, feat = fwd(x, params)
    jax.block_until_ready((pooled, feat))

    ref_pooled, ref_feat = ref_resblock_body(x, params, out_channels)

    assert pooled.shape == (N, 2 * out_channels, H // 2, W // 2), pooled.shape
    assert feat.shape == (N, out_channels, H, W), feat.shape
    np.testing.assert_allclose(np.asarray(pooled), np.asarray(ref_pooled),
                               rtol=5e-3, atol=5e-3)
    np.testing.assert_allclose(np.asarray(feat), np.asarray(ref_feat),
                               rtol=5e-3, atol=5e-3)

    print("KERNEL_OK")
</pallas_src>

<mosaic_0001>
module attributes {stable_mosaic.version = 11 : i64} {
  func.func @kernel(%arg0: i32, %arg1: i32, %arg2: memref<1x22x16x4xf32, #tpu.memory_space<vmem>>, %arg3: memref<36x8xbf16, #tpu.memory_space<vmem>>, %arg4: memref<1x8xf32, #tpu.memory_space<vmem>>, %arg5: memref<1x8xf32, #tpu.memory_space<vmem>>, %arg6: memref<36x4xbf16, #tpu.memory_space<vmem>>, %arg7: memref<1x4xf32, #tpu.memory_space<vmem>>, %arg8: memref<1x4xf32, #tpu.memory_space<vmem>>, %arg9: memref<36x4xbf16, #tpu.memory_space<vmem>>, %arg10: memref<1x4xf32, #tpu.memory_space<vmem>>, %arg11: memref<1x4xf32, #tpu.memory_space<vmem>>, %arg12: memref<8x8xbf16, #tpu.memory_space<vmem>>, %arg13: memref<1x8xf32, #tpu.memory_space<vmem>>, %arg14: memref<1x8xf32, #tpu.memory_space<vmem>>, %arg15: memref<1x4x16x8xf32, #tpu.memory_space<vmem>>, %arg16: memref<1x2x8x16xf32, #tpu.memory_space<vmem>>, %arg17: memref<10x32x4xbf16, #tpu.memory_space<vmem>>, %arg18: memref<8x32x4xbf16, #tpu.memory_space<vmem>>) attributes {dimension_semantics = [#tpu.dimension_semantics<parallel>, #tpu.dimension_semantics<parallel>], iteration_bounds = array<i64: 2, 4>, scalar_prefetch = 0 : i64, scratch_operands = 2 : i64, tpu.core_type = #tpu.core_type<tc>, window_params = [{transform_indices = @transform_0, window_bounds = array<i64: 1, 22, 16, 4>}, {pipeline_mode = #tpu.pipeline_mode<synchronous>, transform_indices = @transform_1, window_bounds = array<i64: 36, 8>}, {pipeline_mode = #tpu.pipeline_mode<synchronous>, transform_indices = @transform_2, window_bounds = array<i64: 1, 8>}, {pipeline_mode = #tpu.pipeline_mode<synchronous>, transform_indices = @transform_3, window_bounds = array<i64: 1, 8>}, {pipeline_mode = #tpu.pipeline_mode<synchronous>, transform_indices = @transform_4, window_bounds = array<i64: 36, 4>}, {pipeline_mode = #tpu.pipeline_mode<synchronous>, transform_indices = @transform_5, window_bounds = array<i64: 1, 4>}, {pipeline_mode = #tpu.pipeline_mode<synchronous>, transform_indices = @transform_6, window_bounds = array<i64: 1, 4>}, {pipeline_mode = #tpu.pipeline_mode<synchronous>, transform_indices = @transform_7, window_bounds = array<i64: 36, 4>}, {pipeline_mode = #tpu.pipeline_mode<synchronous>, transform_indices = @transform_8, window_bounds = array<i64: 1, 4>}, {pipeline_mode = #tpu.pipeline_mode<synchronous>, transform_indices = @transform_9, window_bounds = array<i64: 1, 4>}, {pipeline_mode = #tpu.pipeline_mode<synchronous>, transform_indices = @transform_10, window_bounds = array<i64: 8, 8>}, {pipeline_mode = #tpu.pipeline_mode<synchronous>, transform_indices = @transform_11, window_bounds = array<i64: 1, 8>}, {pipeline_mode = #tpu.pipeline_mode<synchronous>, transform_indices = @transform_12, window_bounds = array<i64: 1, 8>}, {transform_indices = @transform_13, window_bounds = array<i64: 1, 4, 16, 8>}, {transform_indices = @transform_14, window_bounds = array<i64: 1, 2, 8, 16>}]} {
    %c4_i32 = arith.constant 4 : i32
    %0 = arith.muli %arg1, %c4_i32 : i32
    %1 = tpu.assume_multiple %0, 4 : i32
    %cst = arith.constant 0.000000e+00 : bf16
    %2 = vector.broadcast %cst : bf16 to vector<10x8x4xbf16>
    %c0 = arith.constant 0 : index
    %c0_0 = arith.constant 0 : index
    %c0_1 = arith.constant 0 : index
    %3 = vector.load %arg17[%c0, %c0_0, %c0_1] : memref<10x32x4xbf16, #tpu.memory_space<vmem>>, vector<10x8x4xbf16>
    tpu.vector_store %arg17[%c0, %c0_0, %c0_1], %2 {strides = array<i32>} : memref<10x32x4xbf16, #tpu.memory_space<vmem>>, vector<10x8x4xbf16>,
    %cst_2 = arith.constant 0.000000e+00 : bf16
    %4 = vector.broadcast %cst_2 : bf16 to vector<10x8x4xbf16>
    %c0_3 = arith.constant 0 : index
    %c24 = arith.constant 24 : index
    %c0_4 = arith.constant 0 : index
    %5 = vector.load %arg17[%c0_3, %c24, %c0_4] : memref<10x32x4xbf16, #tpu.memory_space<vmem>>, vector<10x8x4xbf16>
    tpu.vector_store %arg17[%c0_3, %c24, %c0_4], %4 {strides = array<i32>} : memref<10x32x4xbf16, #tpu.memory_space<vmem>>, vector<10x8x4xbf16>,
    %cst_5 = arith.constant 0.000000e+00 : bf16
    %6 = vector.broadcast %cst_5 : bf16 to vector<8x8x4xbf16>
    %c0_6 = arith.constant 0 : index
    %c0_7 = arith.constant 0 : index
    %c0_8 = arith.constant 0 : index
    %7 = vector.load %arg18[%c0_6, %c0_7, %c0_8] : memref<8x32x4xbf16, #tpu.memory_space<vmem>>, vector<8x8x4xbf16>
    tpu.vector_store %arg18[%c0_6, %c0_7, %c0_8], %6 {strides = array<i32>} : memref<8x32x4xbf16, #tpu.memory_space<vmem>>, vector<8x8x4xbf16>,
    %cst_9 = arith.constant 0.000000e+00 : bf16
    %8 = vector.broadcast %cst_9 : bf16 to vector<8x8x4xbf16>
    %c0_10 = arith.constant 0 : index
    %c24_11 = arith.constant 24 : index
    %c0_12 = arith.constant 0 : index
    %9 = vector.load %arg18[%c0_10, %c24_11, %c0_12] : memref<8x32x4xbf16, #tpu.memory_space<vmem>>, vector<8x8x4xbf16>
    tpu.vector_store %arg18[%c0_10, %c24_11, %c0_12], %8 {strides = array<i32>} : memref<8x32x4xbf16, #tpu.memory_space<vmem>>, vector<8x8x4xbf16>,
    %c0_13 = arith.constant 0 : index
    %10 = arith.index_cast %1 : i32 to index
    %c0_14 = arith.constant 0 : index
    %c0_15 = arith.constant 0 : index
    %11 = vector.load %arg2[%c0_13, %10, %c0_14, %c0_15] : memref<1x22x16x4xf32, #tpu.memory_space<vmem>>, vector<1x10x16x4xf32>
    %12 = vector.shape_cast %11 : vector<1x10x16x4xf32> to vector<10x16x4xf32>
    %13 = arith.truncf %12 : vector<10x16x4xf32> to vector<10x16x4xbf16>
    %c0_16 = arith.constant 0 : index
    %c8 = arith.constant 8 : index
    %c0_17 = arith.constant 0 : index
    %14 = vector.load %arg17[%c0_16, %c8, %c0_17] : memref<10x32x4xbf16, #tpu.memory_space<vmem>>, vector<10x16x4xbf16>
    tpu.vector_store %arg17[%c0_16, %c8, %c0_17], %13 {strides = array<i32>} : memref<10x32x4xbf16, #tpu.memory_space<vmem>>, vector<10x16x4xbf16>,
    %c0_18 = arith.constant 0 : index
    %c7 = arith.constant 7 : index
    %c0_19 = arith.constant 0 : index
    %15 = vector.load %arg17[%c0_18, %c7, %c0_19] : memref<10x32x4xbf16, #tpu.memory_space<vmem>>, vector<8x16x4xbf16>
    %16 = vector.shape_cast %15 : vector<8x16x4xbf16> to vector<128x4xbf16>
    %c0_20 = arith.constant 0 : index
    %c8_21 = arith.constant 8 : index
    %c0_22 = arith.constant 0 : index
    %17 = vector.load %arg17[%c0_20, %c8_21, %c0_22] : memref<10x32x4xbf16, #tpu.memory_space<vmem>>, vector<8x16x4xbf16>
    %18 = vector.shape_cast %17 : vector<8x16x4xbf16> to vector<128x4xbf16>
    %c0_23 = arith.constant 0 : index
    %c9 = arith.constant 9 : index
    %c0_24 = arith.constant 0 : index
    %19 = vector.load %arg17[%c0_23, %c9, %c0_24] : memref<10x32x4xbf16, #tpu.memory_space<vmem>>, vector<8x16x4xbf16>
    %20 = vector.shape_cast %19 : vector<8x16x4xbf16> to vector<128x4xbf16>
    %c1 = arith.constant 1 : index
    %c7_25 = arith.constant 7 : index
    %c0_26 = arith.constant 0 : index
    %21 = vector.load %arg17[%c1, %c7_25, %c0_26] : memref<10x32x4xbf16, #tpu.memory_space<vmem>>, vector<8x16x4xbf16>
    %22 = vector.shape_cast %21 : vector<8x16x4xbf16> to vector<128x4xbf16>
    %c1_27 = arith.constant 1 : index
    %c8_28 = arith.constant 8 : index
    %c0_29 = arith.constant 0 : index
    %23 = vector.load %arg17[%c1_27, %c8_28, %c0_29] : memref<10x32x4xbf16, #tpu.memory_space<vmem>>, vector<8x16x4xbf16>
    %24 = vector.shape_cast %23 : vector<8x16x4xbf16> to vector<128x4xbf16>
    %c1_30 = arith.constant 1 : index
    %c9_31 = arith.constant 9 : index
    %c0_32 = arith.constant 0 : index
    %25 = vector.load %arg17[%c1_30, %c9_31, %c0_32] : memref<10x32x4xbf16, #tpu.memory_space<vmem>>, vector<8x16x4xbf16>
    %26 = vector.shape_cast %25 : vector<8x16x4xbf16> to vector<128x4xbf16>
    %c2 = arith.constant 2 : index
    %c7_33 = arith.constant 7 : index
    %c0_34 = arith.constant 0 : index
    %27 = vector.load %arg17[%c2, %c7_33, %c0_34] : memref<10x32x4xbf16, #tpu.memory_space<vmem>>, vector<8x16x4xbf16>
    %28 = vector.shape_cast %27 : vector<8x16x4xbf16> to vector<128x4xbf16>
    %c2_35 = arith.constant 2 : index
    %c8_36 = arith.constant 8 : index
    %c0_37 = arith.constant 0 : index
    %29 = vector.load %arg17[%c2_35, %c8_36, %c0_37] : memref<10x32x4xbf16, #tpu.memory_space<vmem>>, vector<8x16x4xbf16>
    %30 = vector.shape_cast %29 : vector<8x16x4xbf16> to vector<128x4xbf16>
    %c2_38 = arith.constant 2 : index
    %c9_39 = arith.constant 9 : index
    %c0_40 = arith.constant 0 : index
    %31 = vector.load %arg17[%c2_38, %c9_39, %c0_40] : memref<10x32x4xbf16, #tpu.memory_space<vmem>>, vector<8x16x4xbf16>
    %32 = vector.shape_cast %31 : vector<8x16x4xbf16> to vector<128x4xbf16>
    %33 = tpu.concatenate %16, %18, %20, %22, %24, %26, %28, %30, %32 in 1 : vector<128x4xbf16>, vector<128x4xbf16>, vector<128x4xbf16>, vector<128x4xbf16>, vector<128x4xbf16>, vector<128x4xbf16>, vector<128x4xbf16>, vector<128x4xbf16>, vector<128x4xbf16> -> vector<128x36xbf16>
    %c0_41 = arith.constant 0 : index
    %c0_42 = arith.constant 0 : index
    %34 = vector.load %arg3[%c0_41, %c0_42] : memref<36x8xbf16, #tpu.memory_space<vmem>>, vector<36x8xbf16>
    %cst_43 = arith.constant dense<0.000000e+00> : vector<128x8xf32>
    %35 = tpu.matmul %33, %34, %cst_43 {dimension_numbers = #tpu.dot_dimension_numbers<[1], [0], [0], [1], [0, 0, 1, 1], [], []>} : vector<128x36xbf16>, vector<36x8xbf16>, vector<128x8xf32> -> vector<128x8xf32>
    %c0_44 = arith.constant 0 : index
    %c0_45 = arith.constant 0 : index
    %36 = vector.load %arg4[%c0_44, %c0_45] : memref<1x8xf32, #tpu.memory_space<vmem>>, vector<1x8xf32>
    %37 = vector.broadcast %36 : vector<1x8xf32> to vector<128x8xf32>
    %38 = arith.mulf %35, %37 : vector<128x8xf32>
    %c0_46 = arith.constant 0 : index
    %c0_47 = arith.constant 0 : index
    %39 = vector.load %arg5[%c0_46, %c0_47] : memref<1x8xf32, #tpu.memory_space<vmem>>, vector<1x8xf32>
    %40 = vector.broadcast %39 : vector<1x8xf32> to vector<128x8xf32>
    %41 = arith.addf %38, %40 : vector<128x8xf32>
    %cst_48 = arith.constant 1.000000e-01 : f32
    %42 = vector.broadcast %cst_48 : f32 to vector<128x8xf32>
    %43 = arith.mulf %42, %41 : vector<128x8xf32>
    %44 = arith.maximumf %41, %43 : vector<128x8xf32>
    %45 = vector.shape_cast %44 : vector<128x8xf32> to vector<8x16x8xf32>
    %46 = vector.extract_strided_slice %45 {offsets = [0, 0, 4], sizes = [8, 16, 4], strides = [1, 1, 1]} : vector<8x16x8xf32> to vector<8x16x4xf32>
    %c2_i32 = arith.constant 2 : i32
    %47 = arith.subi %1, %c2_i32 : i32
    %48 = tpu.iota {dimensions = array<i32: 0>} : vector<8x1x1xi32>
    %49 = vector.broadcast %47 : i32 to vector<8x1x1xi32>
    %50 = arith.addi %48, %49 : vector<8x1x1xi32>
    %c0_i32 = arith.constant 0 : i32
    %51 = vector.broadcast %c0_i32 : i32 to vector<8x1x1xi32>
    %52 = arith.cmpi sge, %50, %51 : vector<8x1x1xi32>
    %c16_i32 = arith.constant 16 : i32
    %53 = vector.broadcast %c16_i32 : i32 to vector<8x1x1xi32>
    %54 = arith.cmpi slt, %50, %53 : vector<8x1x1xi32>
    %55 = arith.andi %52, %54 : vector<8x1x1xi1>
    %cst_49 = arith.constant 0.000000e+00 : f32
    %56 = vector.shape_cast %55 : vector<8x1x1xi1> to vector<8x1x1xi1>
    %57 = vector.broadcast %56 : vector<8x1x1xi1> to vector<8x16x4xi1>
    %58 = vector.broadcast %cst_49 : f32 to vector<8x16x4xf32>
    %59 = arith.select %57, %46, %58 : vector<8x16x4xi1>, vector<8x16x4xf32>
    %60 = arith.truncf %59 : vector<8x16x4xf32> to vector<8x16x4xbf16>
    %c0_50 = arith.constant 0 : index
    %c8_51 = arith.constant 8 : index
    %c0_52 = arith.constant 0 : index
    %61 = vector.load %arg18[%c0_50, %c8_51, %c0_52] : memref<8x32x4xbf16, #tpu.memory_space<vmem>>, vector<8x16x4xbf16>
    tpu.vector_store %arg18[%c0_50, %c8_51, %c0_52], %60 {strides = array<i32>} : memref<8x32x4xbf16, #tpu.memory_space<vmem>>, vector<8x16x4xbf16>,
    %c0_53 = arith.constant 0 : index
    %c7_54 = arith.constant 7 : index
    %c0_55 = arith.constant 0 : index
    %62 = vector.load %arg18[%c0_53, %c7_54, %c0_55] : memref<8x32x4xbf16, #tpu.memory_space<vmem>>, vector<6x16x4xbf16>
    %63 = vector.shape_cast %62 : vector<6x16x4xbf16> to vector<96x4xbf16>
    %c0_56 = arith.constant 0 : index
    %c8_57 = arith.constant 8 : index
    %c0_58 = arith.constant 0 : index
    %64 = vector.load %arg18[%c0_56, %c8_57, %c0_58] : memref<8x32x4xbf16, #tpu.memory_space<vmem>>, vector<6x16x4xbf16>
    %65 = vector.shape_cast %64 : vector<6x16x4xbf16> to vector<96x4xbf16>
    %c0_59 = arith.constant 0 : index
    %c9_60 = arith.constant 9 : index
    %c0_61 = arith.constant 0 : index
    %66 = vector.load %arg18[%c0_59, %c9_60, %c0_61] : memref<8x32x4xbf16, #tpu.memory_space<vmem>>, vector<6x16x4xbf16>
    %67 = vector.shape_cast %66 : vector<6x16x4xbf16> to vector<96x4xbf16>
    %c1_62 = arith.constant 1 : index
    %c7_63 = arith.constant 7 : index
    %c0_64 = arith.constant 0 : index
    %68 = vector.load %arg18[%c1_62, %c7_63, %c0_64] : memref<8x32x4xbf16, #tpu.memory_space<vmem>>, vector<6x16x4xbf16>
    %69 = vector.shape_cast %68 : vector<6x16x4xbf16> to vector<96x4xbf16>
    %c1_65 = arith.constant 1 : index
    %c8_66 = arith.constant 8 : index
    %c0_67 = arith.constant 0 : index
    %70 = vector.load %arg18[%c1_65, %c8_66, %c0_67] : memref<8x32x4xbf16, #tpu.memory_space<vmem>>, vector<6x16x4xbf16>
    %71 = vector.shape_cast %70 : vector<6x16x4xbf16> to vector<96x4xbf16>
    %c1_68 = arith.constant 1 : index
    %c9_69 = arith.constant 9 : index
    %c0_70 = arith.constant 0 : index
    %72 = vector.load %arg18[%c1_68, %c9_69, %c0_70] : memref<8x32x4xbf16, #tpu.memory_space<vmem>>, vector<6x16x4xbf16>
    %73 = vector.shape_cast %72 : vector<6x16x4xbf16> to vector<96x4xbf16>
    %c2_71 = arith.constant 2 : index
    %c7_72 = arith.constant 7 : index
    %c0_73 = arith.constant 0 : index
    %74 = vector.load %arg18[%c2_71, %c7_72, %c0_73] : memref<8x32x4xbf16, #tpu.memory_space<vmem>>, vector<6x16x4xbf16>
    %75 = vector.shape_cast %74 : vector<6x16x4xbf16> to vector<96x4xbf16>
    %c2_74 = arith.constant 2 : index
    %c8_75 = arith.constant 8 : index
    %c0_76 = arith.constant 0 : index
    %76 = vector.load %arg18[%c2_74, %c8_75, %c0_76] : memref<8x32x4xbf16, #tpu.memory_space<vmem>>, vector<6x16x4xbf16>
    %77 = vector.shape_cast %76 : vector<6x16x4xbf16> to vector<96x4xbf16>
    %c2_77 = arith.constant 2 : index
    %c9_78 = arith.constant 9 : index
    %c0_79 = arith.constant 0 : index
    %78 = vector.load %arg18[%c2_77, %c9_78, %c0_79] : memref<8x32x4xbf16, #tpu.memory_space<vmem>>, vector<6x16x4xbf16>
    %79 = vector.shape_cast %78 : vector<6x16x4xbf16> to vector<96x4xbf16>
    %80 = tpu.concatenate %63, %65, %67, %69, %71, %73, %75, %77, %79 in 1 : vector<96x4xbf16>, vector<96x4xbf16>, vector<96x4xbf16>, vector<96x4xbf16>, vector<96x4xbf16>, vector<96x4xbf16>, vector<96x4xbf16>, vector<96x4xbf16>, vector<96x4xbf16> -> vector<96x36xbf16>
    %c0_80 = arith.constant 0 : index
    %c0_81 = arith.constant 0 : index
    %81 = vector.load %arg6[%c0_80, %c0_81] : memref<36x4xbf16, #tpu.memory_space<vmem>>, vector<36x4xbf16>
    %cst_82 = arith.constant dense<0.000000e+00> : vector<96x4xf32>
    %82 = tpu.matmul %80, %81, %cst_82 {dimension_numbers = #tpu.dot_dimension_numbers<[1], [0], [0], [1], [0, 0, 1, 1], [], []>} : vector<96x36xbf16>, vector<36x4xbf16>, vector<96x4xf32> -> vector<96x4xf32>
    %c0_83 = arith.constant 0 : index
    %c0_84 = arith.constant 0 : index
    %83 = vector.load %arg7[%c0_83, %c0_84] : memref<1x4xf32, #tpu.memory_space<vmem>>, vector<1x4xf32>
    %84 = vector.broadcast %83 : vector<1x4xf32> to vector<96x4xf32>
    %85 = arith.mulf %82, %84 : vector<96x4xf32>
    %c0_85 = arith.constant 0 : index
    %c0_86 = arith.constant 0 : index
    %86 = vector.load %arg8[%c0_85, %c0_86] : memref<1x4xf32, #tpu.memory_space<vmem>>, vector<1x4xf32>
    %87 = vector.broadcast %86 : vector<1x4xf32> to vector<96x4xf32>
    %88 = arith.addf %85, %87 : vector<96x4xf32>
    %cst_87 = arith.constant 1.000000e-01 : f32
    %89 = vector.broadcast %cst_87 : f32 to vector<96x4xf32>
    %90 = arith.mulf %89, %88 : vector<96x4xf32>
    %91 = arith.maximumf %88, %90 : vector<96x4xf32>
    %92 = vector.shape_cast %91 : vector<96x4xf32> to vector<6x16x4xf32>
    %c1_i32 = arith.constant 1 : i32
    %93 = arith.subi %1, %c1_i32 : i32
    %94 = tpu.iota {dimensions = array<i32: 0>} : vector<6x1x1xi32>
    %95 = vector.broadcast %93 : i32 to vector<6x1x1xi32>
    %96 = arith.addi %94, %95 : vector<6x1x1xi32>
    %c0_i32_88 = arith.constant 0 : i32
    %97 = vector.broadcast %c0_i32_88 : i32 to vector<6x1x1xi32>
    %98 = arith.cmpi sge, %96, %97 : vector<6x1x1xi32>
    %c16_i32_89 = arith.constant 16 : i32
    %99 = vector.broadcast %c16_i32_89 : i32 to vector<6x1x1xi32>
    %100 = arith.cmpi slt, %96, %99 : vector<6x1x1xi32>
    %101 = arith.andi %98, %100 : vector<6x1x1xi1>
    %cst_90 = arith.constant 0.000000e+00 : f32
    %102 = vector.shape_cast %101 : vector<6x1x1xi1> to vector<6x1x1xi1>
    %103 = vector.broadcast %102 : vector<6x1x1xi1> to vector<6x16x4xi1>
    %104 = vector.broadcast %cst_90 : f32 to vector<6x16x4xf32>
    %105 = arith.select %103, %92, %104 : vector<6x16x4xi1>, vector<6x16x4xf32>
    %106 = arith.truncf %105 : vector<6x16x4xf32> to vector<6x16x4xbf16>
    %c0_91 = arith.constant 0 : index
    %c8_92 = arith.constant 8 : index
    %c0_93 = arith.constant 0 : index
    %107 = vector.load %arg18[%c0_91, %c8_92, %c0_93] : memref<8x32x4xbf16, #tpu.memory_space<vmem>>, vector<6x16x4xbf16>
    tpu.vector_store %arg18[%c0_91, %c8_92, %c0_93], %106 {strides = array<i32>} : memref<8x32x4xbf16, #tpu.memory_space<vmem>>, vector<6x16x4xbf16>,
    %c0_94 = arith.constant 0 : index
    %c7_95 = arith.constant 7 : index
    %c0_96 = arith.constant 0 : index
    %108 = vector.load %arg18[%c0_94, %c7_95, %c0_96] : memref<8x32x4xbf16, #tpu.memory_space<vmem>>, vector<4x16x4xbf16>
    %109 = vector.shape_cast %108 : vector<4x16x4xbf16> to vector<64x4xbf16>
    %c0_97 = arith.constant 0 : index
    %c8_98 = arith.constant 8 : index
    %c0_99 = arith.constant 0 : index
    %110 = vector.load %arg18[%c0_97, %c8_98, %c0_99] : memref<8x32x4xbf16, #tpu.memory_space<vmem>>, vector<4x16x4xbf16>
    %111 = vector.shape_cast %110 : vector<4x16x4xbf16> to vector<64x4xbf16>
    %c0_100 = arith.constant 0 : index
    %c9_101 = arith.constant 9 : index
    %c0_102 = arith.constant 0 : index
    %112 = vector.load %arg18[%c0_100, %c9_101, %c0_102] : memref<8x32x4xbf16, #tpu.memory_space<vmem>>, vector<4x16x4xbf16>
    %113 = vector.shape_cast %112 : vector<4x16x4xbf16> to vector<64x4xbf16>
    %c1_103 = arith.constant 1 : index
    %c7_104 = arith.constant 7 : index
    %c0_105 = arith.constant 0 : index
    %114 = vector.load %arg18[%c1_103, %c7_104, %c0_105] : memref<8x32x4xbf16, #tpu.memory_space<vmem>>, vector<4x16x4xbf16>
    %115 = vector.shape_cast %114 : vector<4x16x4xbf16> to vector<64x4xbf16>
    %c1_106 = arith.constant 1 : index
    %c8_107 = arith.constant 8 : index
    %c0_108 = arith.constant 0 : index
    %116 = vector.load %arg18[%c1_106, %c8_107, %c0_108] : memref<8x32x4xbf16, #tpu.memory_space<vmem>>, vector<4x16x4xbf16>
    %117 = vector.shape_cast %116 : vector<4x16x4xbf16> to vector<64x4xbf16>
    %c1_109 = arith.constant 1 : index
    %c9_110 = arith.constant 9 : index
    %c0_111 = arith.constant 0 : index
    %118 = vector.load %arg18[%c1_109, %c9_110, %c0_111] : memref<8x32x4xbf16, #tpu.memory_space<vmem>>, vector<4x16x4xbf16>
    %119 = vector.shape_cast %118 : vector<4x16x4xbf16> to vector<64x4xbf16>
    %c2_112 = arith.constant 2 : index
    %c7_113 = arith.constant 7 : index
    %c0_114 = arith.constant 0 : index
    %120 = vector.load %arg18[%c2_112, %c7_113, %c0_114] : memref<8x32x4xbf16, #tpu.memory_space<vmem>>, vector<4x16x4xbf16>
    %121 = vector.shape_cast %120 : vector<4x16x4xbf16> to vector<64x4xbf16>
    %c2_115 = arith.constant 2 : index
    %c8_116 = arith.constant 8 : index
    %c0_117 = arith.constant 0 : index
    %122 = vector.load %arg18[%c2_115, %c8_116, %c0_117] : memref<8x32x4xbf16, #tpu.memory_space<vmem>>, vector<4x16x4xbf16>
    %123 = vector.shape_cast %122 : vector<4x16x4xbf16> to vector<64x4xbf16>
    %c2_118 = arith.constant 2 : index
    %c9_119 = arith.constant 9 : index
    %c0_120 = arith.constant 0 : index
    %124 = vector.load %arg18[%c2_118, %c9_119, %c0_120] : memref<8x32x4xbf16, #tpu.memory_space<vmem>>, vector<4x16x4xbf16>
    %125 = vector.shape_cast %124 : vector<4x16x4xbf16> to vector<64x4xbf16>
    %126 = tpu.concatenate %109, %111, %113, %115, %117, %119, %121, %123, %125 in 1 : vector<64x4xbf16>, vector<64x4xbf16>, vector<64x4xbf16>, vector<64x4xbf16>, vector<64x4xbf16>, vector<64x4xbf16>, vector<64x4xbf16>, vector<64x4xbf16>, vector<64x4xbf16> -> vector<64x36xbf16>
    %c0_121 = arith.constant 0 : index
    %c0_122 = arith.constant 0 : index
    %127 = vector.load %arg9[%c0_121, %c0_122] : memref<36x4xbf16, #tpu.memory_space<vmem>>, vector<36x4xbf16>
    %cst_123 = arith.constant dense<0.000000e+00> : vector<64x4xf32>
    %128 = tpu.matmul %126, %127, %cst_123 {dimension_numbers = #tpu.dot_dimension_numbers<[1], [0], [0], [1], [0, 0, 1, 1], [], []>} : vector<64x36xbf16>, vector<36x4xbf16>, vector<64x4xf32> -> vector<64x4xf32>
    %c0_124 = arith.constant 0 : index
    %c0_125 = arith.constant 0 : index
    %129 = vector.load %arg10[%c0_124, %c0_125] : memref<1x4xf32, #tpu.memory_space<vmem>>, vector<1x4xf32>
    %130 = vector.broadcast %129 : vector<1x4xf32> to vector<64x4xf32>
    %131 = arith.mulf %128, %130 : vector<64x4xf32>
    %c0_126 = arith.constant 0 : index
    %c0_127 = arith.constant 0 : index
    %132 = vector.load %arg11[%c0_126, %c0_127] : memref<1x4xf32, #tpu.memory_space<vmem>>, vector<1x4xf32>
    %133 = vector.broadcast %132 : vector<1x4xf32> to vector<64x4xf32>
    %134 = arith.addf %131, %133 : vector<64x4xf32>
    %cst_128 = arith.constant 1.000000e-01 : f32
    %135 = vector.broadcast %cst_128 : f32 to vector<64x4xf32>
    %136 = arith.mulf %135, %134 : vector<64x4xf32>
    %137 = arith.maximumf %134, %136 : vector<64x4xf32>
    %138 = vector.extract_strided_slice %92 {offsets = [1, 0, 0], sizes = [4, 16, 4], strides = [1, 1, 1]} : vector<6x16x4xf32> to vector<4x16x4xf32>
    %139 = vector.shape_cast %138 : vector<4x16x4xf32> to vector<64x4xf32>
    %140 = tpu.concatenate %137, %139 in 1 : vector<64x4xf32>, vector<64x4xf32> -> vector<64x8xf32>
    %141 = arith.truncf %140 : vector<64x8xf32> to vector<64x8xbf16>
    %c0_129 = arith.constant 0 : index
    %c0_130 = arith.constant 0 : index
    %142 = vector.load %arg12[%c0_129, %c0_130] : memref<8x8xbf16, #tpu.memory_space<vmem>>, vector<8x8xbf16>
    %cst_131 = arith.constant dense<0.000000e+00> : vector<64x8xf32>
    %143 = tpu.matmul %141, %142, %cst_131 {dimension_numbers = #tpu.dot_dimension_numbers<[1], [0], [0], [1], [0, 0, 1, 1], [], []>} : vector<64x8xbf16>, vector<8x8xbf16>, vector<64x8xf32> -> vector<64x8xf32>
    %c0_132 = arith.constant 0 : index
    %c0_133 = arith.constant 0 : index
    %144 = vector.load %arg13[%c0_132, %c0_133] : memref<1x8xf32, #tpu.memory_space<vmem>>, vector<1x8xf32>
    %145 = vector.broadcast %144 : vector<1x8xf32> to vector<64x8xf32>
    %146 = arith.mulf %143, %145 : vector<64x8xf32>
    %c0_134 = arith.constant 0 : index
    %c0_135 = arith.constant 0 : index
    %147 = vector.load %arg14[%c0_134, %c0_135] : memref<1x8xf32, #tpu.memory_space<vmem>>, vector<1x8xf32>
    %148 = vector.broadcast %147 : vector<1x8xf32> to vector<64x8xf32>
    %149 = arith.addf %146, %148 : vector<64x8xf32>
    %cst_136 = arith.constant 1.000000e-01 : f32
    %150 = vector.broadcast %cst_136 : f32 to vector<64x8xf32>
    %151 = arith.mulf %150, %149 : vector<64x8xf32>
    %152 = arith.maximumf %149, %151 : vector<64x8xf32>
    %153 = vector.shape_cast %152 : vector<64x8xf32> to vector<4x16x8xf32>
    %c0_137 = arith.constant 0 : index
    %c0_138 = arith.constant 0 : index
    %c0_139 = arith.constant 0 : index
    %c0_140 = arith.constant 0 : index
    %154 = vector.load %arg15[%c0_137, %c0_138, %c0_139, %c0_140] : memref<1x4x16x8xf32, #tpu.memory_space<vmem>>, vector<1x4x16x8xf32>
    %155 = vector.shape_cast %154 : vector<1x4x16x8xf32> to vector<4x16x8xf32>
    %156 = vector.shape_cast %153 : vector<4x16x8xf32> to vector<1x4x16x8xf32>
    tpu.vector_store %arg15[%c0_137, %c0_138, %c0_139, %c0_140], %156 {strides = array<i32>} : memref<1x4x16x8xf32, #tpu.memory_space<vmem>>, vector<1x4x16x8xf32>,
    %157 = vector.extract_strided_slice %45 {offsets = [2, 0, 0], sizes = [4, 16, 8], strides = [1, 1, 1]} : vector<8x16x8xf32> to vector<4x16x8xf32>
    %158 = vector.shape_cast %157 : vector<4x16x8xf32> to vector<2x2x16x8xf32>
    %159 = vector.extract_strided_slice %158 {offsets = [0, 0, 0, 0], sizes = [2, 1, 16, 8], strides = [1, 1, 1, 1]} : vector<2x2x16x8xf32> to vector<2x1x16x8xf32>
    %160 = vector.shape_cast %159 : vector<2x1x16x8xf32> to vector<2x16x8xf32>
    %161 = vector.extract_strided_slice %158 {offsets = [0, 1, 0, 0], sizes = [2, 1, 16, 8], strides = [1, 1, 1, 1]} : vector<2x2x16x8xf32> to vector<2x1x16x8xf32>
    %162 = vector.shape_cast %161 : vector<2x1x16x8xf32> to vector<2x16x8xf32>
    %163 = arith.maximumf %160, %162 : vector<2x16x8xf32>
    %164 = vector.shape_cast %163 : vector<2x16x8xf32> to vector<2x8x2x8xf32>
    %165 = vector.extract_strided_slice %164 {offsets = [0, 0, 0, 0], sizes = [2, 8, 1, 8], strides = [1, 1, 1, 1]} : vector<2x8x2x8xf32> to vector<2x8x1x8xf32>
    %166 = vector.shape_cast %165 : vector<2x8x1x8xf32> to vector<2x8x8xf32>
    %167 = vector.extract_strided_slice %164 {offsets = [0, 0, 1, 0], sizes = [2, 8, 1, 8], strides = [1, 1, 1, 1]} : vector<2x8x2x8xf32> to vector<2x8x1x8xf32>
    %168 = vector.shape_cast %167 : vector<2x8x1x8xf32> to vector<2x8x8xf32>
    %169 = arith.maximumf %166, %168 : vector<2x8x8xf32>
    %c0_141 = arith.constant 0 : index
    %c0_142 = arith.constant 0 : index
    %c0_143 = arith.constant 0 : index
    %c0_144 = arith.constant 0 : index
    %170 = vector.load %arg16[%c0_141, %c0_142, %c0_143, %c0_144] : memref<1x2x8x16xf32, #tpu.memory_space<vmem>>, vector<1x2x8x8xf32>
    %171 = vector.shape_cast %170 : vector<1x2x8x8xf32> to vector<2x8x8xf32>
    %172 = vector.shape_cast %169 : vector<2x8x8xf32> to vector<1x2x8x8xf32>
    tpu.vector_store %arg16[%c0_141, %c0_142, %c0_143, %c0_144], %172 {strides = array<i32>} : memref<1x2x8x16xf32, #tpu.memory_space<vmem>>, vector<1x2x8x8xf32>,
    %173 = vector.shape_cast %153 : vector<4x16x8xf32> to vector<2x2x16x8xf32>
    %174 = vector.extract_strided_slice %173 {offsets = [0, 0, 0, 0], sizes = [2, 1, 16, 8], strides = [1, 1, 1, 1]} : vector<2x2x16x8xf32> to vector<2x1x16x8xf32>
    %175 = vector.shape_cast %174 : vector<2x1x16x8xf32> to vector<2x16x8xf32>
    %176 = vector.extract_strided_slice %173 {offsets = [0, 1, 0, 0], sizes = [2, 1, 16, 8], strides = [1, 1, 1, 1]} : vector<2x2x16x8xf32> to vector<2x1x16x8xf32>
    %177 = vector.shape_cast %176 : vector<2x1x16x8xf32> to vector<2x16x8xf32>
    %178 = arith.maximumf %175, %177 : vector<2x16x8xf32>
    %179 = vector.shape_cast %178 : vector<2x16x8xf32> to vector<2x8x2x8xf32>
    %180 = vector.extract_strided_slice %179 {offsets = [0, 0, 0, 0], sizes = [2, 8, 1, 8], strides = [1, 1, 1, 1]} : vector<2x8x2x8xf32> to vector<2x8x1x8xf32>
    %181 = vector.shape_cast %180 : vector<2x8x1x8xf32> to vector<2x8x8xf32>
    %182 = vector.extract_strided_slice %179 {offsets = [0, 0, 1, 0], sizes = [2, 8, 1, 8], strides = [1, 1, 1, 1]} : vector<2x8x2x8xf32> to vector<2x8x1x8xf32>
    %183 = vector.shape_cast %182 : vector<2x8x1x8xf32> to vector<2x8x8xf32>
    %184 = arith.maximumf %181, %183 : vector<2x8x8xf32>
    %c0_145 = arith.constant 0 : index
    %c0_146 = arith.constant 0 : index
    %c0_147 = arith.constant 0 : index
    %c8_148 = arith.constant 8 : index
    %185 = vector.load %arg16[%c0_145, %c0_146, %c0_147, %c8_148] : memref<1x2x8x16xf32, #tpu.memory_space<vmem>>, vector<1x2x8x8xf32>
    %186 = vector.shape_cast %185 : vector<1x2x8x8xf32> to vector<2x8x8xf32>
    %187 = vector.shape_cast %184 : vector<2x8x8xf32> to vector<1x2x8x8xf32>
    tpu.vector_store %arg16[%c0_145, %c0_146, %c0_147, %c8_148], %187 {strides = array<i32>} : memref<1x2x8x16xf32, #tpu.memory_space<vmem>>, vector<1x2x8x8xf32>,
    return
  }
  func.func @transform_0(%arg0: i32, %arg1: i32) -> (i32, i32, i32, i32) {
    %c0_i32 = arith.constant 0 : i32
    %c0_i32_0 = arith.constant 0 : i32
    %c0_i32_1 = arith.constant 0 : i32
    %c0_i32_2 = arith.constant 0 : i32
    return %arg0, %c0_i32, %c0_i32_0, %c0_i32_1 : i32, i32, i32, i32
  }
  func.func @transform_1(%arg0: i32, %arg1: i32) -> (i32, i32) {
    %c0_i32 = arith.constant 0 : i32
    %c0_i32_0 = arith.constant 0 : i32
    %c0_i32_1 = arith.constant 0 : i32
    return %c0_i32, %c0_i32_0 : i32, i32
  }
  func.func @transform_2(%arg0: i32, %arg1: i32) -> (i32, i32) {
    %c0_i32 = arith.constant 0 : i32
    %c0_i32_0 = arith.constant 0 : i32
    %c0_i32_1 = arith.constant 0 : i32
    return %c0_i32, %c0_i32_0 : i32, i32
  }
  func.func @transform_3(%arg0: i32, %arg1: i32) -> (i32, i32) {
    %c0_i32 = arith.constant 0 : i32
    %c0_i32_0 = arith.constant 0 : i32
    %c0_i32_1 = arith.constant 0 : i32
    return %c0_i32, %c0_i32_0 : i32, i32
  }
  func.func @transform_4(%arg0: i32, %arg1: i32) -> (i32, i32) {
    %c0_i32 = arith.constant 0 : i32
    %c0_i32_0 = arith.constant 0 : i32
    %c0_i32_1 = arith.constant 0 : i32
    return %c0_i32, %c0_i32_0 : i32, i32
  }
  func.func @transform_5(%arg0: i32, %arg1: i32) -> (i32, i32) {
    %c0_i32 = arith.constant 0 : i32
    %c0_i32_0 = arith.constant 0 : i32
    %c0_i32_1 = arith.constant 0 : i32
    return %c0_i32, %c0_i32_0 : i32, i32
  }
  func.func @transform_6(%arg0: i32, %arg1: i32) -> (i32, i32) {
    %c0_i32 = arith.constant 0 : i32
    %c0_i32_0 = arith.constant 0 : i32
    %c0_i32_1 = arith.constant 0 : i32
    return %c0_i32, %c0_i32_0 : i32, i32
  }
  func.func @transform_7(%arg0: i32, %arg1: i32) -> (i32, i32) {
    %c0_i32 = arith.constant 0 : i32
    %c0_i32_0 = arith.constant 0 : i32
    %c0_i32_1 = arith.constant 0 : i32
    return %c0_i32, %c0_i32_0 : i32, i32
  }
  func.func @transform_8(%arg0: i32, %arg1: i32) -> (i32, i32) {
    %c0_i32 = arith.constant 0 : i32
    %c0_i32_0 = arith.constant 0 : i32
    %c0_i32_1 = arith.constant 0 : i32
    return %c0_i32, %c0_i32_0 : i32, i32
  }
  func.func @transform_9(%arg0: i32, %arg1: i32) -> (i32, i32) {
    %c0_i32 = arith.constant 0 : i32
    %c0_i32_0 = arith.constant 0 : i32
    %c0_i32_1 = arith.constant 0 : i32
    return %c0_i32, %c0_i32_0 : i32, i32
  }
  func.func @transform_10(%arg0: i32, %arg1: i32) -> (i32, i32) {
    %c0_i32 = arith.constant 0 : i32
    %c0_i32_0 = arith.constant 0 : i32
    %c0_i32_1 = arith.constant 0 : i32
    return %c0_i32, %c0_i32_0 : i32, i32
  }
  func.func @transform_11(%arg0: i32, %arg1: i32) -> (i32, i32) {
    %c0_i32 = arith.constant 0 : i32
    %c0_i32_0 = arith.constant 0 : i32
    %c0_i32_1 = arith.constant 0 : i32
    return %c0_i32, %c0_i32_0 : i32, i32
  }
  func.func @transform_12(%arg0: i32, %arg1: i32) -> (i32, i32) {
    %c0_i32 = arith.constant 0 : i32
    %c0_i32_0 = arith.constant 0 : i32
    %c0_i32_1 = arith.constant 0 : i32
    return %c0_i32, %c0_i32_0 : i32, i32
  }
  func.func @transform_13(%arg0: i32, %arg1: i32) -> (i32, i32, i32, i32) {
    %c0_i32 = arith.constant 0 : i32
    %c0_i32_0 = arith.constant 0 : i32
    %c0_i32_1 = arith.constant 0 : i32
    return %arg0, %arg1, %c0_i32, %c0_i32_0 : i32, i32, i32, i32
  }
  func.func @transform_14(%arg0: i32, %arg1: i32) -> (i32, i32, i32, i32) {
    %c0_i32 = arith.constant 0 : i32
    %c0_i32_0 = arith.constant 0 : i32
    %c0_i32_1 = arith.constant 0 : i32
    return %arg0, %arg1, %c0_i32, %c0_i32_0 : i32, i32, i32, i32
  }
}

</mosaic_0001>

<bundles_post_ra>
// kernel: resblock_body.1
= control target key start
LH: loop header
LB: loop body
LE: loop exit
PB: predicated region body
PF: predicated region fallthrough
CT: control target
= control target key end

     0   :  { %s7104_s0 = inlined_call_operand.vmem [shape: f32[2,22,16,4], index: 0, kind: input, shape index: {}]   ;;  %s7105_s1 = inlined_call_operand.vmem [shape: bf16[36,8], index: 1, kind: input, shape index: {}]   ;;  %s7106_s2 = inlined_call_operand.vmem [shape: f32[1,8], index: 2, kind: input, shape index: {}]   ;;  %s7107_s3 = inlined_call_operand.vmem [shape: f32[1,8], index: 3, kind: input, shape index: {}]   ;;  %s7108_s4 = inlined_call_operand.vmem [shape: bf16[36,4], index: 4, kind: input, shape index: {}]   ;;  %s7109_s5 = inlined_call_operand.vmem [shape: f32[1,4], index: 5, kind: input, shape index: {}]   ;;  %s7110_s6 = inlined_call_operand.vmem [shape: f32[1,4], index: 6, kind: input, shape index: {}]   ;;  %s7111_s7 = inlined_call_operand.vmem [shape: bf16[36,4], index: 7, kind: input, shape index: {}]   ;;  %s7112_s8 = inlined_call_operand.vmem [shape: f32[1,4], index: 8, kind: input, shape index: {}]   ;;  %s7113_s9 = inlined_call_operand.vmem [shape: f32[1,4], index: 9, kind: input, shape index: {}]   ;;  %s7114_s10 = inlined_call_operand.vmem [shape: bf16[8,8], index: 10, kind: input, shape index: {}]   ;;  %s7115_s11 = inlined_call_operand.vmem [shape: f32[1,8], index: 11, kind: input, shape index: {}]   ;;  %s7116_s12 = inlined_call_operand.vmem [shape: f32[1,8], index: 12, kind: input, shape index: {}]   ;;  %s7117_s13 = inlined_call_operand.vmem [shape: f32[2,16,16,8], index: 13, kind: output, shape index: {0}]   ;;  %s7118_s14 = inlined_call_operand.hbm [shape: f32[2,8,8,16], index: 14, kind: output, shape index: {1}]  }
   0x1   :  { %7159 = sst [smem:[#allocation15_spill]] %s7104_s0 }
   0x2   :  { %7160 = sst [smem:[#allocation16_spill]] %s7105_s1 }
   0x3   :  { %7161 = sst [smem:[#allocation17_spill]] %s7106_s2 }
   0x4   :  { %7162 = sst [smem:[#allocation18_spill]] %s7107_s3 }
   0x5   :  { %7163 = sst [smem:[#allocation19_spill]] %s7118_s14 }
   0x6   :  { %20 = vsyncpa [#allocation5], 0 }
   0x7   :  { %22 = vsyncpa [#allocation5 + $0x1], 0  ;;  %s5657_s29 = smov 0   ;;  %s5659_s30 = smov 0  }
   0x8   :  { %s5661_s15 = smov 0   ;;  %s5663_s16 = smov 0  }
   0x9   :  { %s5665_s17 = smov 0   ;;  %s5667_s18 = smov 0  }
   0xa   :  { %s5669_s19 = smov 0   ;;  %s5671_s20 = smov 0  }
   0xb LB: > { %7164 = sst [smem:[#allocation7_spill]] %s5539_s29  ;;  %s5160_s21 = sadd.s32 4294967295, %s5567_s20   ;;  %s5567_s20 = sphi %s5671_s20, %s28_s20   ;;  %s5563_s19 = sphi %s5669_s19, %s7373_s19   ;;  %s5559_s18 = sphi %s5667_s18, %s7372_s18   ;;  %s5555_s17 = sphi %s5665_s17, %s7371_s17   ;;  %s5551_s16 = sphi %s5663_s16, %s7370_s16   ;;  %s5547_s15 = sphi %s5661_s15, %s7369_s15   ;;  %s5543_s30 = sphi %s5659_s30, %s7375_s30   ;;  %s5539_s29 = sphi %s5657_s29, %s7374_s29  }
   0xc   : > { %7165 = sst [smem:[#allocation8_spill]] %s5547_s15  ;;  %s5161_s22 = sadd.s32 4294967294, %s5567_s20  }
   0xd   : > { %7166 = sst [smem:[#allocation9_spill]] %s5559_s18  ;;  %s37_s23 = sadd.s32 1, %s5559_s18 }
   0xe   : > { %7167 = sst [smem:[#allocation10_spill]] %s5563_s19  ;;  %p38_p0 = scmp.ge.s32.totalorder %s37_s23, 4 }
   0xf   : > { %s40_s24 = sadd.s32 1, %s5563_s19  ;;  %p365_p1 = scmp.ne.s32.totalorder %s5547_s15, %s5543_s30 }
  0x10   : > { %p366_p2 = scmp.eq.s32.totalorder %s5160_s21, 7  ;;  %s7377_s23 = smov (%p38_p0, %s37_s23), 0 }
  0x11   : > { %7168 = sst [smem:[#allocation11_spill]] %s7377_s23  ;;  %s7379_s24 = smov (!%p38_p0, %s40_s24), %s5563_s19 }
  0x12   : > { %s351_s25 = ssub.s32 %s5559_s18, %s7377_s23  ;;  %p5708_p3 = por %p366_p2, %p365_p1 }
  0x13   : > { %p42_p4 = scmp.ge.s32.totalorder %s7379_s24, 2  ;;  %p371_p5 = scmp.ne.s32.totalorder %s5543_s30, %s5539_s29 }
  0x14   : > { %p372_p6 = scmp.eq.s32.totalorder %s5161_s22, 7  ;;  %p5164_p7 = scmp.ge.s32.totalorder %s5567_s20, 1 }
  0x15   : > { %s7381_s24 = smov (%p42_p4, %s7379_s24), 0  ;;  %p434_p9 = scmp.lt.s32.totalorder %s5567_s20, 9 }
  0x16   : > { %7170 = sst [smem:[#allocation12_spill]] %s7381_s24  ;;  %p5717_p8 = por %p372_p6, %p371_p5 }
  0x17   : > { %s350_s28 = ssub.s32 %s5563_s19, %s7381_s24  ;;  %s355_s21 = sadd.s32 1, %s5547_s15 }
  0x18   : > { %s7171_s27 = scalar_select %p5717_p8, 1, 0 }
  0x19   : > { %s352_s14 = sor.u32 %s351_s25, %s350_s28  ;;  %p435_p10 = pnand %p5164_p7, %p434_p9 }
  0x1a   : > { %7172 = sst [smem:[#allocation13_spill]] %s7171_s27  ;;  %p353_p11 = scmp.eq.s32.totalorder %s352_s14, 0  ;;  %vm509_vm0 = vcmask (!%p435_p10), 27648   ;;  %vm520_vm1 = vcmask (!%p435_p10), 31748   ;;  %v5569_v0 = vmov (!%p435_p10), 0   ;;  %vm7154_vm2 = vcmask (!%p435_p10), 1043456  }
  0x1b   : > { %438 = sbr.rel (%p435_p10) target bundleno = 1801 (0x709), region = 72  ;;  %p490_p12 = scmp.lt.s32.totalorder (!%p435_p10), %s5555_s17, 1  ;;  %521 = vst.msk [vmem:[#allocation2 + $0x8] sm:$0xf0] (!%p435_p10), %vm520_vm1, %v5569_v0  ;;  %522 = vst.msk [vmem:[#allocation2 + $0x18] sm:$0xf0] (!%p435_p10), %vm520_vm1, %v5569_v0 }
  0x1c   : > { %s5726_s23 = scalar_select %p353_p11, %s5547_s15, %s355_s21  }
  0x1d   : > { %510 = vst.msk [vmem:[#allocation2] sm:$0xf] (!%p435_p10), %vm509_vm0, %v5569_v0  ;;  %511 = vst.msk [vmem:[#allocation2 + $0x10] sm:$0xf] (!%p435_p10), %vm509_vm0, %v5569_v0  ;;  %s5252_s25 = sshll.u32 (!%p435_p10), %s5551_s16, 6  ;;  %s7174_s0 = sld [smem:[#allocation15_spill]] (!%p435_p10) }
  0x1e   : > { %7173 = sst [smem:[#allocation14_spill]] %s5726_s23  ;;  %512 = vst.msk [vmem:[#allocation2 + $0x20] sm:$0xf] (!%p435_p10), %vm509_vm0, %v5569_v0  ;;  %513 = vst.msk [vmem:[#allocation2 + $0x30] sm:$0xf] (!%p435_p10), %vm509_vm0, %v5569_v0  ;;  %s7175_s1 = sld [smem:[#allocation16_spill]] (!%p435_p10) }
  0x1f   : > { %514 = vst.msk [vmem:[#allocation2 + $0x40] sm:$0xf] (!%p435_p10), %vm509_vm0, %v5569_v0  ;;  %515 = vst.msk [vmem:[#allocation2 + $0x50] sm:$0xf] (!%p435_p10), %vm509_vm0, %v5569_v0  ;;  %vm7153_vm3 = vsmask.f32 (!%p435_p10), 3328 }
  0x20   : > { %516 = vst.msk [vmem:[#allocation2 + $0x60] sm:$0xf] (!%p435_p10), %vm509_vm0, %v5569_v0  ;;  %517 = vst.msk [vmem:[#allocation2 + $0x70] sm:$0xf] (!%p435_p10), %vm509_vm0, %v5569_v0  ;;  %vm7152_vm4 = vsmask.f32 (!%p435_p10), 4352 }
  0x21   : > { %518 = vst.msk [vmem:[#allocation2 + $0x80] sm:$0xf] (!%p435_p10), %vm509_vm0, %v5569_v0  ;;  %519 = vst.msk [vmem:[#allocation2 + $0x90] sm:$0xf] (!%p435_p10), %vm509_vm0, %v5569_v0  ;;  %s7127_s28 = smov (!%p435_p10), 12   ;;  %s7135_s21 = smov (!%p435_p10), 24  }
  0x22   : > { %523 = vst.msk [vmem:[#allocation2 + $0x28] sm:$0xf0] %vm520_vm1, %v5569_v0  ;;  %524 = vst.msk [vmem:[#allocation2 + $0x38] sm:$0xf0] %vm520_vm1, %v5569_v0  ;;  %s5768_s14 = scalar_select %p490_p12, %s5555_s17, 1  ;;  %vm7150_vm5 = vcmask 31744  }
  0x23   : > { %525 = vst.msk [vmem:[#allocation2 + $0x48] sm:$0xf0] %vm520_vm1, %v5569_v0  ;;  %526 = vst.msk [vmem:[#allocation2 + $0x58] sm:$0xf0] %vm520_vm1, %v5569_v0  ;;  %vm1819_vm6 = vcmask 64512   ;;  %vm7149_vm7 = vcmask 97280  }
  0x24   : > { %527 = vst.msk [vmem:[#allocation2 + $0x68] sm:$0xf0] %vm520_vm1, %v5569_v0  ;;  %528 = vst.msk [vmem:[#allocation2 + $0x78] sm:$0xf0] %vm520_vm1, %v5569_v0  ;;  %s5353_s22 = smul.u32 352, %s5768_s14  ;;  %vm7148_vm8 = vcmask 130048  }
  0x25   : > { %529 = vst.msk [vmem:[#allocation2 + $0x88] sm:$0xf0] %vm520_vm1, %v5569_v0  ;;  %530 = vst.msk [vmem:[#allocation2 + $0x98] sm:$0xf0] %vm520_vm1, %v5569_v0  ;;  %vm7151_vm9 = vcmask 1041408   ;;  %vm7147_vm10 = vcmask 162816  }
  0x26   : > { %531 = vst.msk [vmem:[#allocation3] sm:$0xf] %vm509_vm0, %v5569_v0  ;;  %532 = vst.msk [vmem:[#allocation3 + $0x10] sm:$0xf] %vm509_vm0, %v5569_v0  ;;  %s494_s24 = scalar_lea.vmem %s7174_s0, %s5353_s22  ;;  %s7123_s22 = smov 28   ;;  %vm7146_vm11 = vcmask 195584  }
  0x27   : > { %533 = vst.msk [vmem:[#allocation3 + $0x20] sm:$0xf] %vm509_vm0, %v5569_v0  ;;  %534 = vst.msk [vmem:[#allocation3 + $0x30] sm:$0xf] %vm509_vm0, %v5569_v0  ;;  %s5775_s19 = scalar_lea.vmem %s494_s24, %s5252_s25  ;;  %s7137_s24 = smov 4   ;;  %vm7145_vm12 = vcmask 228352  }
  0x28   : > { %535 = vst.msk [vmem:[#allocation3 + $0x40] sm:$0xf] %vm509_vm0, %v5569_v0  ;;  %536 = vst.msk [vmem:[#allocation3 + $0x50] sm:$0xf] %vm509_vm0, %v5569_v0  ;;  %v553_v1 = vld [vmem:[%s5775_s19 + $0x20] sm:$0xff]  ;;  %v554_v2 = vld [vmem:[%s5775_s19 + $0x28] sm:$0xff] }
  0x29   : > { %537 = vst.msk [vmem:[#allocation3 + $0x60] sm:$0xf] %vm509_vm0, %v5569_v0  ;;  %538 = vst.msk [vmem:[#allocation3 + $0x70] sm:$0xf] %vm509_vm0, %v5569_v0  ;;  %v549_v3 = vld [vmem:[%s5775_s19] sm:$0xff]  ;;  %v571_v4 = vpack.c.bf16 %v554_v2, %v553_v1  ;;  %v550_v5 = vld [vmem:[%s5775_s19 + $0x8] sm:$0xff] }
  0x2a   : > { %539 = vst.msk [vmem:[#allocation3 + $0x8] sm:$0xf0] %vm520_vm1, %v5569_v0  ;;  %540 = vst.msk [vmem:[#allocation3 + $0x18] sm:$0xf0] %vm520_vm1, %v5569_v0  ;;  %v555_v6 = vld [vmem:[%s5775_s19 + $0x30] sm:$0xff]  ;;  %v556_v7 = vld [vmem:[%s5775_s19 + $0x38] sm:$0xff]  ;;  %v569_v8 = vpack.c.bf16 %v550_v5, %v549_v3 }
  0x2b   : > { %541 = vst.msk [vmem:[#allocation3 + $0x28] sm:$0xf0] %vm520_vm1, %v5569_v0  ;;  %542 = vst.msk [vmem:[#allocation3 + $0x38] sm:$0xf0] %vm520_vm1, %v5569_v0  ;;  %v572_v9 = vpack.c.bf16 %v556_v7, %v555_v6  ;;  %v551_v10 = vld [vmem:[%s5775_s19 + $0x10] sm:$0xff]  ;;  %v552_v11 = vld [vmem:[%s5775_s19 + $0x18] sm:$0xff] }
  0x2c   : > { %543 = vst.msk [vmem:[#allocation3 + $0x48] sm:$0xf0] %vm520_vm1, %v5569_v0  ;;  %544 = vst.msk [vmem:[#allocation3 + $0x58] sm:$0xf0] %vm520_vm1, %v5569_v0  ;;  %v557_v12 = vld [vmem:[%s5775_s19 + $0x40] sm:$0xff]  ;;  %v591_v13 = vrot.slane %v571_v4, 4  ;;  %v570_v14 = vpack.c.bf16 %v552_v11, %v551_v10 }
  0x2d   : > { %545 = vst.msk [vmem:[#allocation3 + $0x68] sm:$0xf0] %vm520_vm1, %v5569_v0  ;;  %546 = vst.msk [vmem:[#allocation3 + $0x78] sm:$0xf0] %vm520_vm1, %v5569_v0  ;;  %v558_v15 = vld [vmem:[%s5775_s19 + $0x48] sm:$0xff]  ;;  %v559_v16 = vld [vmem:[%s5775_s19 + $0x50] sm:$0xff] }
  0x2e   : > { %v560_v17 = vld [vmem:[%s5775_s19 + $0x58] sm:$0xff]  ;;  %v589_v18 = vrot.slane %v569_v8, 4  ;;  %v592_v19 = vrot.slane %v572_v9, 4  ;;  %v573_v20 = vpack.c.bf16 %v558_v15, %v557_v12  ;;  %v561_v22 = vld [vmem:[%s5775_s19 + $0x60] sm:$0xff]  ;;  %v562_v23 = vld [vmem:[%s5775_s19 + $0x68] sm:$0xff]  ;;  %v590_v25 = vrot.slane %v570_v14, 4 }
  0x2f   : > { %v574_v21 = vpack.c.bf16 %v560_v17, %v559_v16  ;;  %v563_v24 = vld [vmem:[%s5775_s19 + $0x70] sm:$0xff]  ;;  %613 = vst.msk [vmem:[#allocation2 + $0x20] sm:$0xf0] %vm520_vm1, %v591_v13  ;;  %v575_v26 = vpack.c.bf16 %v562_v23, %v561_v22  ;;  %v564_v27 = vld [vmem:[%s5775_s19 + $0x78] sm:$0xff]  ;;  %v565_v28 = vld [vmem:[%s5775_s19 + $0x80] sm:$0xff]  ;;  %s7133_s25 = smov 8  }
  0x30   : > { %614 = vst.msk [vmem:[#allocation2 + $0x28] sm:$0xf] %vm509_vm0, %v591_v13  ;;  %v566_v29 = vld [vmem:[%s5775_s19 + $0x88] sm:$0xff]  ;;  %610 = vst.msk [vmem:[#allocation2 + $0x8] sm:$0xf] %vm509_vm0, %v589_v18  ;;  %v593_v30 = vrot.slane %v573_v20, 4  ;;  %v576_v32 = vpack.c.bf16 %v564_v27, %v563_v24 }
  0x31   : > { %609 = vst.msk [vmem:[#allocation2] sm:$0xf0] %vm520_vm1, %v589_v18  ;;  %615 = vst.msk [vmem:[#allocation2 + $0x30] sm:$0xf0] %vm520_vm1, %v592_v19  ;;  %v594_v31 = vrot.slane %v574_v21, 4  ;;  %v577_v33 = vpack.c.bf16 %v566_v29, %v565_v28  ;;  %v567_v34 = vld [vmem:[%s5775_s19 + $0x90] sm:$0xff] }
  0x32   : > { %616 = vst.msk [vmem:[#allocation2 + $0x38] sm:$0xf] %vm509_vm0, %v592_v19  ;;  %v568_v35 = vld [vmem:[%s5775_s19 + $0x98] sm:$0xff]  ;;  %612 = vst.msk [vmem:[#allocation2 + $0x18] sm:$0xf] %vm509_vm0, %v590_v25  ;;  %v595_v36 = vrot.slane %v575_v26, 4 }
  0x33   : > { %611 = vst.msk [vmem:[#allocation2 + $0x10] sm:$0xf0] %vm520_vm1, %v590_v25  ;;  %v578_v37 = vpack.c.bf16 %v568_v35, %v567_v34  ;;  %617 = vst.msk [vmem:[#allocation2 + $0x40] sm:$0xf0] %vm520_vm1, %v593_v30  ;;  %v596_v38 = vrot.slane %v576_v32, 4  ;;  %v597_v39 = vrot.slane %v577_v33, 4 }
  0x34   : > { %618 = vst.msk [vmem:[#allocation2 + $0x48] sm:$0xf] %vm509_vm0, %v593_v30  ;;  %620 = vst.msk [vmem:[#allocation2 + $0x58] sm:$0xf] %vm509_vm0, %v594_v31  ;;  %s7129_s19 = smov 16   ;;  %s7182_s0 = smov 24  }
  0x35   : > { %619 = vst.msk [vmem:[#allocation2 + $0x50] sm:$0xf0] %vm520_vm1, %v594_v31  ;;  %621 = vst.msk [vmem:[#allocation2 + $0x60] sm:$0xf0] %vm520_vm1, %v595_v36  ;;  %v598_v40 = vrot.slane %v578_v37, 4  ;;  %vm7144_vm13 = vcmask 261120  }
  0x36   : > { %622 = vst.msk [vmem:[#allocation2 + $0x68] sm:$0xf] %vm509_vm0, %v595_v36  ;;  %624 = vst.msk [vmem:[#allocation2 + $0x78] sm:$0xf] %vm509_vm0, %v596_v38  ;;  %v5819_v42 = vld [vmem:[#allocation2 + $0x20] sm:$0xf0] }
  0x37   : > { %623 = vst.msk [vmem:[#allocation2 + $0x70] sm:$0xf0] %vm520_vm1, %v596_v38  ;;  %625 = vst.msk [vmem:[#allocation2 + $0x80] sm:$0xf0] %vm520_vm1, %v597_v39  ;;  %v5817_v41 = vld [vmem:[#allocation2 + $0x28] sm:$0xf] }
  0x38   : > { %626 = vst.msk [vmem:[#allocation2 + $0x88] sm:$0xf] %vm509_vm0, %v597_v39  ;;  %628 = vst.msk [vmem:[#allocation2 + $0x98] sm:$0xf] %vm509_vm0, %v598_v40  ;;  %v1156_v43 = vrot.slane %v5819_v42, 4  ;;  %v1157_v44 = vrot.slane %v5817_v41, 4 }
  0x39   : > { %627 = vst.msk [vmem:[#allocation2 + $0x90] sm:$0xf0] %vm520_vm1, %v598_v40  ;;  %v630_v45 = vld [vmem:[#allocation2 + $0x8] sm:$0xf]  ;;  %v782_v46 = vld [vmem:[#allocation2] sm:$0xf0] }
  0x3a   : > { %v807_v47 = vrot.slane %v782_v46, 4  ;;  %v808_v48 = vrot.slane %v630_v45, 4  ;;  %v5823_v49 = vld [vmem:[#allocation2 + $0x38] sm:$0xf]  ;;  %v634_v50 = vld [vmem:[#allocation2 + $0x28] sm:$0xf]  ;;  %v1158_v51 = vsel %vm7154_vm2, %v1156_v43, %v1157_v44 }
  0x3b   : > { %v5826_v52 = vld [vmem:[#allocation2 + $0x30] sm:$0xf0]  ;;  %v1502_v53 = vrot.slane %v5823_v49, 4  ;;  %v632_v54 = vld [vmem:[#allocation2 + $0x18] sm:$0xf]  ;;  %1716 = vrot.lane.b32.xlu1 %v1158_v51, %s7129_s19  ;;  %v814_v63 = vrot.slane %v634_v50, 4 }
  0x3c   : > { %v809_v55 = vsel %vm7154_vm2, %v807_v47, %v808_v48  ;;  %v1501_v56 = vrot.slane %v5826_v52, 4  ;;  %v783_v57 = vld [vmem:[#allocation2 + $0x10] sm:$0xf0]  ;;  %v811_v59 = vrot.slane %v632_v54, 4  ;;  %v5833_v60 = vld [vmem:[#allocation2 + $0x20] sm:$0xf0] }
  0x3d   : > { %1666 = vrot.lane.b32.xlu0 %v809_v55, %s7137_s24  ;;  %v810_v58 = vrot.slane %v783_v57, 4  ;;  %v813_v62 = vrot.slane %v5833_v60, 4  ;;  %v978_v0 = vld [vmem:[#allocation2 + $0x18] sm:$0xf]  ;;  %v5838_v2 = vld [vmem:[#allocation2 + $0x10] sm:$0xf0] }
  0x3e   : > { %v1503_v61 = vsel %vm7154_vm2, %v1501_v56, %v1502_v53  ;;  %v1154_v3 = vrot.slane %v978_v0, 4  ;;  %v831_v4 = vld [vmem:[#allocation2 + $0x8] sm:$0x1f]  ;;  %v841_v5 = vshrl.u32 %v782_v46, 16  ;;  %v1153_v7 = vrot.slane %v5838_v2, 4  ;;  %v5457_v51 = vld [vmem:[%s7175_s1] sm:$0xff]  }
  0x3f   : > { %v812_v1 = vsel %vm7154_vm2, %v810_v58, %v811_v59  ;;  %1764 = vrot.lane.b32.xlu1 %v1503_v61, %s7123_s22  ;;  %v815_v6 = vsel %vm7154_vm2, %v813_v62, %v814_v63  ;;  %v844_v8 = vshll.u32 %v782_v46, 16  ;;  %v849_v9 = vshrl.u32 %v831_v4, 16  ;;  %v5843_v10 = vld [vmem:[#allocation2 + $0x28] sm:$0xf]  ;;  %v5846_v13 = vld [vmem:[#allocation2 + $0x20] sm:$0xf0]  ;;  %5285 = vmatprep.subr.bf16.mxu0 %v5457_v51 }
  0x40   : > { %v843_v11 = vrot.slane %v841_v5, 4  ;;  %v852_v12 = vshll.u32 %v831_v4, 16  ;;  %v1499_v14 = vrot.slane %v5843_v10, 4  ;;  %v858_v15 = vshrl.u32 %v783_v57, 16  ;;  %v832_v20 = vld [vmem:[#allocation2 + $0x18] sm:$0x1f]  ;;  %5286 = vmatpush3.bf16.msra.mxu0 %v5457_v51 }
  0x41   : > { %1668 = vrot.lane.b32.xlu0 %v812_v1, %s7137_s24  ;;  %v1155_v16 = vsel %vm7154_vm2, %v1153_v7, %v1154_v3  ;;  %v846_v17 = vrot.slane %v844_v8, 5  ;;  %v851_v18 = vrot.slane %v849_v9, 4  ;;  %v1498_v19 = vrot.slane %v5846_v13, 4  ;;  %v977_v25 = vld [vmem:[#allocation2 + $0x10] sm:$0xf8]  ;;  %s6140_s18 = sshll.u32 %s5551_s16, 2 }
  0x42   : > { %v854_v21 = vrot.slane %v852_v12, 5  ;;  %v860_v22 = vrot.slane %v858_v15, 4  ;;  %v861_v23 = vshll.u32 %v783_v57, 16  ;;  %v866_v24 = vshrl.u32 %v832_v20, 16  ;;  %v979_v30 = vld [vmem:[#allocation2 + $0x20] sm:$0xf8] }
  0x43   : > { %1670 = vrot.lane.b32.xlu1 %v815_v6, %s7137_s24  ;;  %v847_v26 = vor.u32 %v846_v17, %v843_v11  ;;  %v1500_v27 = vsel %vm7154_vm2, %v1498_v19, %v1499_v14  ;;  %v869_v28 = vshll.u32 %v832_v20, 16  ;;  %v994_v29 = vshrl.u32 %v977_v25, 16  ;;  %v1177_v50 = vld [vmem:[#allocation2 + $0x18] sm:$0x1f]  ;;  %v1178_v3 = vld [vmem:[#allocation2 + $0x28] sm:$0x1f] }
  0x44   : > { %v855_v31 = vor.u32 %v854_v21, %v851_v18  ;;  %v863_v32 = vrot.slane %v861_v23, 5  ;;  %v868_v33 = vrot.slane %v866_v24, 4  ;;  %v997_v34 = vshll.u32 %v977_v25, 16  ;;  %v1322_v7 = vld [vmem:[#allocation2 + $0x20] sm:$0xf8]  ;;  %s5186_s23 = sadd.s32 4294967294, %s6140_s18 }
  0x45   : > { %1714 = vrot.lane.b32.xlu0 %v1155_v16, %s7129_s19  ;;  %v871_v35 = vrot.slane %v869_v28, 5  ;;  %v996_v36 = vrot.slane %v994_v29, 3  ;;  %v1002_v37 = vshrl.u32 %v978_v0, 16  ;;  %v1005_v38 = vshll.u32 %v978_v0, 16  ;;  %s7183_s2 = sld [smem:[#allocation17_spill]]  ;;  %s7184_s3 = sld [smem:[#allocation18_spill]] }
  0x46   : > { %v856_v39 = vsel %vm7153_vm3, %v847_v26, %v855_v31  ;;  %v864_v40 = vor.u32 %v863_v32, %v860_v22  ;;  %v999_v43 = vrot.slane %v997_v34, 4  ;;  %v1011_v44 = vshrl.u32 %v979_v30, 16  ;;  %v1324_v22 = vld [vmem:[#allocation2 + $0x30] sm:$0xf8]  ;;  %s7158_s29 = sand.u32 1, %s5543_s30   ;;  %p498_p13 = scmp.lt.s32.totalorder %s6140_s18, 15 }
  0x47   : > { %1682 = vrot.lane.b32.xlu1 %v856_v39, %s7133_s25  ;;  %v872_v45 = vor.u32 %v871_v35, %v868_v33  ;;  %v1004_v46 = vrot.slane %v1002_v37, 3  ;;  %v1007_v47 = vrot.slane %v1005_v38, 4  ;;  %v1014_v48 = vshll.u32 %v979_v30, 16  ;;  %v1522_v38 = vld [vmem:[#allocation2 + $0x28] sm:$0x1f]  ;;  %s5165_s15 = sshll.u32 %s7158_s29, 4 }
  0x48   : > { %v1000_v53 = vor.u32 %v999_v43, %v996_v36  ;;  %v1013_v54 = vrot.slane %v1011_v44, 3  ;;  %v1019_v55 = vshrl.u32 %v5817_v41, 16  ;;  %v1022_v56 = vshll.u32 %v5817_v41, 16  ;;  %s6214_s27 = scalar_lea.vmem [#allocation4], %s5165_s15 }
  0x49   : > { %1762 = vrot.lane.b32.xlu0 %v1500_v27, %s7123_s22  ;;  %v873_v57 = vsel %vm7153_vm3, %v864_v40, %v872_v45  ;;  %v1008_v58 = vor.u32 %v1007_v47, %v1004_v46  ;;  %v1016_v59 = vrot.slane %v1014_v48, 4  ;;  %v1186_v61 = vshrl.u32 %v5838_v2, 16  ;;  %s7125_s22 = smov 20   ;;  %v636_v48 = vld [vmem:[#allocation2 + $0x38] sm:$0xf] }
  0x4a   : > { %v1021_v62 = vrot.slane %v1019_v55, 3  ;;  %v1024_v63 = vrot.slane %v1022_v56, 4  ;;  %v1189_v0 = vshll.u32 %v5838_v2, 16  ;;  %v1194_v1 = vshrl.u32 %v1177_v50, 16  ;;  %v5458_v2 = vld [vmem:[%s7175_s1 + $0x8] sm:$0xff]  }
  0x4b   : > { %1684 = vrot.lane.b32.xlu1 %v873_v57, %s7133_s25  ;;  %v1009_v4 = vsel %vm7152_vm4, %v1000_v53, %v1008_v58  ;;  %v1017_v5 = vor.u32 %v1016_v59, %v1013_v54  ;;  %v1188_v41 = vrot.slane %v1186_v61, 4  ;;  %v1197_v6 = vshll.u32 %v1177_v50, 16  ;;  %5287 = vmatprep.subr.bf16.mxu0 %v5458_v2  ;;  %v785_v55 = vld [vmem:[#allocation2 + $0x30] sm:$0xf0] }
  0x4c   : > { %v1025_v8 = vor.u32 %v1024_v63, %v1021_v62  ;;  %v1191_v9 = vrot.slane %v1189_v0, 5  ;;  %v1196_v11 = vrot.slane %v1194_v1, 4  ;;  %v1203_v12 = vshrl.u32 %v5819_v42, 16  ;;  %5288 = vmatpush3.bf16.msra.mxu0 %v5458_v2  ;;  %v1523_v63 = vld [vmem:[#allocation2 + $0x38] sm:$0x1f] }
  0x4d   : > { %1698 = vrot.lane.b32.xlu0 %v1009_v4, %s7127_s28  ;;  %v1199_v14 = vrot.slane %v1197_v6, 5  ;;  %v1206_v15 = vshll.u32 %v5819_v42, 16  ;;  %v1211_v16 = vshrl.u32 %v1178_v3, 16  ;;  %v1214_v17 = vshll.u32 %v1178_v3, 16  ;;  %v834_v6 = vld [vmem:[#allocation2 + $0x38] sm:$0x1f] }
  0x4e   : > { %v1026_v18 = vsel %vm7152_vm4, %v1017_v5, %v1025_v8  ;;  %v1192_v19 = vor.u32 %v1191_v9, %v1188_v41  ;;  %v1205_v20 = vrot.slane %v1203_v12, 4  ;;  %v1339_v21 = vshrl.u32 %v1322_v7, 16 }
  0x4f   : > { %1700 = vrot.lane.b32.xlu1 %v1026_v18, %s7127_s28  ;;  %v1200_v23 = vor.u32 %v1199_v14, %v1196_v11  ;;  %v1208_v24 = vrot.slane %v1206_v15, 5  ;;  %v1213_v25 = vrot.slane %v1211_v16, 4  ;;  %v1216_v26 = vrot.slane %v1214_v17, 5 }
  0x50   : > { %v1341_v27 = vrot.slane %v1339_v21, 3  ;;  %v1342_v28 = vshll.u32 %v1322_v7, 16  ;;  %v1347_v42 = vshrl.u32 %v5843_v10, 16  ;;  %v1350_v29 = vshll.u32 %v5843_v10, 16 }
  0x51   : > { %v1201_v30 = vsel %vm7153_vm3, %v1192_v19, %v1200_v23  ;;  %v1209_v31 = vor.u32 %v1208_v24, %v1205_v20  ;;  %v1217_v32 = vor.u32 %v1216_v26, %v1213_v25  ;;  %v1356_v33 = vshrl.u32 %v1324_v22, 16  ;;  %v833_v20 = vld [vmem:[#allocation2 + $0x28] sm:$0x1f]  ;;  %v983_v24 = vld [vmem:[#allocation2 + $0x40] sm:$0xf8] }
  0x52   : > { %1730 = vrot.lane.b32.xlu0 %v1201_v30, %s7125_s22  ;;  %v1344_v34 = vrot.slane %v1342_v28, 4  ;;  %v1349_v35 = vrot.slane %v1347_v42, 3  ;;  %v1352_v36 = vrot.slane %v1350_v29, 4  ;;  %v1359_v37 = vshll.u32 %v1324_v22, 16 }
  0x53   : > { %v1218_v39 = vsel %vm7153_vm3, %v1209_v31, %v1217_v32  ;;  %v1358_v40 = vrot.slane %v1356_v33, 3  ;;  %v1364_v43 = vshrl.u32 %v5823_v49, 16  ;;  %v1367_v10 = vshll.u32 %v5823_v49, 16  ;;  %v984_v32 = vld [vmem:[#allocation2 + $0x48] sm:$0xf] }
  0x54   : > { %1732 = vrot.lane.b32.xlu1 %v1218_v39, %s7125_s22  ;;  %v1345_v44 = vor.u32 %v1344_v34, %v1341_v27  ;;  %v1353_v45 = vor.u32 %v1352_v36, %v1349_v35  ;;  %v1361_v46 = vrot.slane %v1359_v37, 4  ;;  %v1531_v47 = vshrl.u32 %v5846_v13, 16  ;;  %s7131_s22 = smov 32   ;;  %v981_v37 = vld [vmem:[#allocation2 + $0x30] sm:$0xf8] }
  0x55   : > { %v1366_v50 = vrot.slane %v1364_v43, 3  ;;  %v1369_v51 = vrot.slane %v1367_v10, 4  ;;  %v1534_v53 = vshll.u32 %v5846_v13, 16  ;;  %v1539_v54 = vshrl.u32 %v1522_v38, 16  ;;  %v982_v10 = vld [vmem:[#allocation2 + $0x38] sm:$0xf] }
  0x56   : > { %v1354_v56 = vsel %vm7152_vm4, %v1345_v44, %v1353_v45  ;;  %v1362_v57 = vor.u32 %v1361_v46, %v1358_v40  ;;  %v1533_v58 = vrot.slane %v1531_v47, 4  ;;  %v1542_v59 = vshll.u32 %v1522_v38, 16 }
  0x57   : > { %1746 = vrot.lane.b32.xlu0 %v1354_v56, %s7135_s21  ;;  %v1370_v49 = vor.u32 %v1369_v51, %v1366_v50  ;;  %v1536_v61 = vrot.slane %v1534_v53, 5  ;;  %v1541_v62 = vrot.slane %v1539_v54, 4  ;;  %v816_v1 = vrot.slane %v785_v55, 4  ;;  %v1132_v53 = vld [vmem:[#allocation2 + $0x40] sm:$0xf0] }
  0x58   : > { %v1544_v0 = vrot.slane %v1542_v59, 5  ;;  %v817_v3 = vrot.slane %v636_v48, 4  ;;  %v1548_v5 = vshrl.u32 %v5826_v52, 16  ;;  %v1551_v41 = vshll.u32 %v5826_v52, 16 }
  0x59   : > { %v1371_v4 = vsel %vm7152_vm4, %v1362_v57, %v1370_v49  ;;  %v1537_v13 = vor.u32 %v1536_v61, %v1533_v58  ;;  %v1556_v9 = vshrl.u32 %v1523_v63, 16  ;;  %v1559_v11 = vshll.u32 %v1523_v63, 16  ;;  %v1131_v58 = vld [vmem:[#allocation2 + $0x30] sm:$0xf0] }
  0x5a   : > { %1748 = vrot.lane.b32.xlu1 %v1371_v4, %s7135_s21  ;;  %v1545_v7 = vor.u32 %v1544_v0, %v1541_v62  ;;  %v818_v8 = vsel %vm7154_vm2, %v816_v1, %v817_v3  ;;  %v1550_v12 = vrot.slane %v1548_v5, 4  ;;  %v1553_v2 = vrot.slane %v1551_v41, 5  ;;  %v1180_v4 = vld [vmem:[#allocation2 + $0x48] sm:$0x1f] }
  0x5b   : > { %v892_v14 = vshrl.u32 %v785_v55, 16  ;;  %v895_v15 = vshll.u32 %v785_v55, 16  ;;  %v1558_v17 = vrot.slane %v1556_v9, 4  ;;  %v1561_v18 = vrot.slane %v1559_v11, 5 }
  0x5c   : > { %v1546_v16 = vsel %vm7153_vm3, %v1537_v13, %v1545_v7  ;;  %v900_v19 = vshrl.u32 %v834_v6, 16  ;;  %v1554_v52 = vor.u32 %v1553_v2, %v1550_v12  ;;  %v903_v23 = vshll.u32 %v834_v6, 16  ;;  %v1179_v12 = vld [vmem:[#allocation2 + $0x38] sm:$0x1f] }
  0x5d   : > { %1778 = vrot.lane.b32.xlu0 %v1546_v16, %s7131_s22  ;;  %v894_v21 = vrot.slane %v892_v14, 4  ;;  %v897_v22 = vrot.slane %v895_v15, 5  ;;  %v1562_v25 = vor.u32 %v1561_v18, %v1558_v17  ;;  %v875_v27 = vshrl.u32 %v5833_v60, 16 }
  0x5e   : > { %1672 = vrot.lane.b32.xlu1 %v818_v8, %s7137_s24  ;;  %v902_v26 = vrot.slane %v900_v19, 4  ;;  %v878_v28 = vshll.u32 %v5833_v60, 16  ;;  %v905_v29 = vrot.slane %v903_v23, 5  ;;  %v883_v30 = vshrl.u32 %v833_v20, 16 }
  0x5f   : > { %v898_v42 = vor.u32 %v897_v22, %v894_v21  ;;  %v886_v31 = vshll.u32 %v833_v20, 16  ;;  %v1563_v33 = vsel %vm7153_vm3, %v1554_v52, %v1562_v25  ;;  %v877_v34 = vrot.slane %v875_v27, 4  ;;  %v1328_v52 = vld [vmem:[#allocation2 + $0x50] sm:$0xf8]  ;;  %v1329_v25 = vld [vmem:[#allocation2 + $0x58] sm:$0xf] }
  0x60   : > { %v880_v35 = vrot.slane %v878_v28, 5  ;;  %v1045_v36 = vshrl.u32 %v983_v24, 16  ;;  %v906_v38 = vor.u32 %v905_v29, %v902_v26  ;;  %v885_v39 = vrot.slane %v883_v30, 4  ;;  %v1326_v29 = vld [vmem:[#allocation2 + $0x40] sm:$0xf8] }
  0x61   : > { %1780 = vrot.lane.b32.xlu0 %v1563_v33, %s7131_s22  ;;  %v888_v40 = vrot.slane %v886_v31, 5  ;;  %v1048_v43 = vshll.u32 %v983_v24, 16  ;;  %v1053_v45 = vshrl.u32 %v984_v32, 16  ;;  %v1056_v46 = vshll.u32 %v984_v32, 16 }
  0x62   : > { %v881_v44 = vor.u32 %v880_v35, %v877_v34  ;;  %v1047_v60 = vrot.slane %v1045_v36, 3  ;;  %v907_v47 = vsel %vm7153_vm3, %v898_v42, %v906_v38  ;;  %v1028_v51 = vshrl.u32 %v981_v37, 16  ;;  %v1327_v38 = vld [vmem:[#allocation2 + $0x48] sm:$0xf] }
  0x63   : > { %v889_v48 = vor.u32 %v888_v40, %v885_v39  ;;  %v1050_v50 = vrot.slane %v1048_v43, 4  ;;  %1688 = vrot.lane.b32.xlu1 %v907_v47, %s7133_s25  ;;  %v1055_v54 = vrot.slane %v1053_v45, 3  ;;  %v1058_v55 = vrot.slane %v1056_v46, 4 }
  0x64   : > { %v1031_v56 = vshll.u32 %v981_v37, 16  ;;  %v1036_v57 = vshrl.u32 %v982_v10, 16  ;;  %v1030_v61 = vrot.slane %v1028_v51, 3  ;;  %v1039_v62 = vshll.u32 %v982_v10, 16 }
  0x65   : > { %v890_v59 = vsel %vm7153_vm3, %v881_v44, %v889_v48  ;;  %v1051_v49 = vor.u32 %v1050_v50, %v1047_v60  ;;  %v1059_v63 = vor.u32 %v1058_v55, %v1055_v54  ;;  %v1162_v3 = vrot.slane %v1132_v53, 4  ;;  %v1477_v44 = vld [vmem:[#allocation2 + $0x50] sm:$0xf0]  ;;  %v1476_v54 = vld [vmem:[#allocation2 + $0x40] sm:$0xf0] }
  0x66   : > { %1686 = vrot.lane.b32.xlu0 %v890_v59, %s7133_s25  ;;  %v1033_v0 = vrot.slane %v1031_v56, 4  ;;  %v1038_v1 = vrot.slane %v1036_v57, 3  ;;  %v1041_v13 = vrot.slane %v1039_v62, 4  ;;  %v1163_v5 = vrot.slane %v984_v32, 4  ;;  %v5914_v59 = vld [vmem:[#allocation2 + $0x40] sm:$0xf0] }
  0x67   : > { %v1159_v41 = vrot.slane %v1131_v58, 4  ;;  %v1160_v6 = vrot.slane %v982_v10, 4  ;;  %v1060_v7 = vsel %vm7152_vm4, %v1051_v49, %v1059_v63  ;;  %v1237_v9 = vshrl.u32 %v1132_v53, 16  ;;  %v5916_v63 = vld [vmem:[#allocation2 + $0x48] sm:$0xf] }
  0x68   : > { %v1034_v8 = vor.u32 %v1033_v0, %v1030_v61  ;;  %v1240_v11 = vshll.u32 %v1132_v53, 16  ;;  %1704 = vrot.lane.b32.xlu1 %v1060_v7, %s7127_s28  ;;  %v1042_v2 = vor.u32 %v1041_v13, %v1038_v1  ;;  %v1164_v14 = vsel %vm7154_vm2, %v1162_v3, %v1163_v5  ;;  %v1524_v13 = vld [vmem:[#allocation2 + $0x48] sm:$0x1f] }
  0x69   : > { %v1161_v15 = vsel %vm7154_vm2, %v1159_v41, %v1160_v6  ;;  %v1245_v16 = vshrl.u32 %v1180_v4, 16  ;;  %v1239_v17 = vrot.slane %v1237_v9, 4  ;;  %v1248_v19 = vshll.u32 %v1180_v4, 16 }
  0x6a   : > { %v1242_v18 = vrot.slane %v1240_v11, 5  ;;  %v1220_v20 = vshrl.u32 %v1131_v58, 16  ;;  %v1043_v21 = vsel %vm7152_vm4, %v1034_v8, %v1042_v2  ;;  %v1223_v23 = vshll.u32 %v1131_v58, 16  ;;  %v5924_v11 = vld [vmem:[#allocation2 + $0x58] sm:$0xf] }
  0x6b   : > { %v1247_v22 = vrot.slane %v1245_v16, 4  ;;  %v1228_v24 = vshrl.u32 %v1179_v12, 16  ;;  %1702 = vrot.lane.b32.xlu0 %v1043_v21, %s7127_s28  ;;  %v1250_v27 = vrot.slane %v1248_v19, 5  ;;  %v1231_v42 = vshll.u32 %v1179_v12, 16  ;;  %s7176_s28 = smov 20  }
  0x6c   : > { %v1243_v26 = vor.u32 %v1242_v18, %v1239_v17  ;;  %v1222_v28 = vrot.slane %v1220_v20, 4  ;;  %1720 = vrot.lane.b32.xlu1 %v1164_v14, %s7129_s19  ;;  %v1225_v30 = vrot.slane %v1223_v23, 5  ;;  %v1390_v32 = vshrl.u32 %v1328_v52, 16  ;;  %v787_v12 = vld [vmem:[#allocation2 + $0x50] sm:$0xf0] }
  0x6d   : > { %v1230_v31 = vrot.slane %v1228_v24, 4  ;;  %v1393_v33 = vshll.u32 %v1328_v52, 16  ;;  %v1251_v34 = vor.u32 %v1250_v27, %v1247_v22  ;;  %v1233_v35 = vrot.slane %v1231_v42, 5  ;;  %v1525_v16 = vld [vmem:[#allocation2 + $0x58] sm:$0x1f] }
  0x6e   : > { %v1398_v36 = vshrl.u32 %v1329_v25, 16  ;;  %v1401_v37 = vshll.u32 %v1329_v25, 16  ;;  %v1226_v39 = vor.u32 %v1225_v30, %v1222_v28  ;;  %v1392_v40 = vrot.slane %v1390_v32, 3  ;;  %v836_v30 = vld [vmem:[#allocation2 + $0x58] sm:$0x1f] }
  0x6f   : > { %v1395_v43 = vrot.slane %v1393_v33, 4  ;;  %v1373_v10 = vshrl.u32 %v1326_v29, 16  ;;  %1718 = vrot.lane.b32.xlu0 %v1161_v15, %s7129_s19  ;;  %v1252_v60 = vsel %vm7153_vm3, %v1243_v26, %v1251_v34  ;;  %v1234_v45 = vor.u32 %v1233_v35, %v1230_v31  ;;  %s7177_s19 = smov 28  }
  0x70   : > { %v1400_v46 = vrot.slane %v1398_v36, 3  ;;  %v1403_v47 = vrot.slane %v1401_v37, 4  ;;  %1736 = vrot.lane.b32.xlu1 %v1252_v60, %s7176_s28  ;;  %v1376_v51 = vshll.u32 %v1326_v29, 16  ;;  %v1381_v53 = vshrl.u32 %v1327_v38, 16  ;;  %v835_v36 = vld [vmem:[#allocation2 + $0x48] sm:$0x1f] }
  0x71   : > { %v1396_v48 = vor.u32 %v1395_v43, %v1392_v40  ;;  %v1375_v50 = vrot.slane %v1373_v10, 3  ;;  %v1235_v55 = vsel %vm7153_vm3, %v1226_v39, %v1234_v45  ;;  %v1384_v57 = vshll.u32 %v1327_v38, 16  ;;  %v987_v45 = vld [vmem:[#allocation2 + $0x60] sm:$0xf8] }
  0x72   : > { %v1404_v56 = vor.u32 %v1403_v47, %v1400_v46  ;;  %v1507_v58 = vrot.slane %v1477_v44, 4  ;;  %v1378_v49 = vrot.slane %v1376_v51, 4  ;;  %v1383_v61 = vrot.slane %v1381_v53, 3  ;;  %v988_v51 = vld [vmem:[#allocation2 + $0x68] sm:$0xf] }
  0x73   : > { %v1508_v62 = vrot.slane %v1329_v25, 4  ;;  %1734 = vrot.lane.b32.xlu0 %v1235_v55, %s7176_s28  ;;  %v1386_v1 = vrot.slane %v1384_v57, 4  ;;  %v1504_v3 = vrot.slane %v1476_v54, 4  ;;  %v1505_v4 = vrot.slane %v1327_v38, 4  ;;  %v985_v57 = vld [vmem:[#allocation2 + $0x50] sm:$0xf8] }
  0x74   : > { %v1405_v0 = vsel %vm7152_vm4, %v1396_v48, %v1404_v56  ;;  %v1379_v5 = vor.u32 %v1378_v49, %v1375_v50  ;;  %v819_v41 = vrot.slane %v5914_v59, 4  ;;  %v820_v8 = vrot.slane %v5916_v63, 4 }
  0x75   : > { %1752 = vrot.lane.b32.xlu1 %v1405_v0, %s7135_s21  ;;  %v1387_v6 = vor.u32 %v1386_v1, %v1383_v61  ;;  %v1509_v7 = vsel %vm7154_vm2, %v1507_v58, %v1508_v62  ;;  %v1565_v9 = vshrl.u32 %v1476_v54, 16  ;;  %v1568_v2 = vshll.u32 %v1476_v54, 16 }
  0x76   : > { %v1573_v14 = vshrl.u32 %v1524_v13, 16  ;;  %v1576_v15 = vshll.u32 %v1524_v13, 16  ;;  %v1506_v18 = vsel %vm7154_vm2, %v1504_v3, %v1505_v4  ;;  %v821_v19 = vsel %vm7154_vm2, %v819_v41, %v820_v8  ;;  %v986_v41 = vld [vmem:[#allocation2 + $0x58] sm:$0xf] }
  0x77   : > { %v1388_v17 = vsel %vm7152_vm4, %v1379_v5, %v1387_v6  ;;  %v1567_v20 = vrot.slane %v1565_v9, 4  ;;  %v1570_v52 = vrot.slane %v1568_v2, 5  ;;  %v822_v23 = vrot.slane %v787_v12, 4  ;;  %v1134_v2 = vld [vmem:[#allocation2 + $0x60] sm:$0xf0] }
  0x78   : > { %1750 = vrot.lane.b32.xlu0 %v1388_v17, %s7135_s21  ;;  %v1575_v21 = vrot.slane %v1573_v14, 4  ;;  %v1578_v22 = vrot.slane %v1576_v15, 5  ;;  %v823_v24 = vrot.slane %v5924_v11, 4  ;;  %v1582_v25 = vshrl.u32 %v1477_v44, 16 }
  0x79   : > { %1768 = vrot.lane.b32.xlu1 %v1509_v7, %s7177_s19  ;;  %v1585_v26 = vshll.u32 %v1477_v44, 16  ;;  %v1590_v27 = vshrl.u32 %v1525_v16, 16  ;;  %v1571_v28 = vor.u32 %v1570_v52, %v1567_v20  ;;  %v1593_v29 = vshll.u32 %v1525_v16, 16 }
  0x7a   : > { %v1579_v42 = vor.u32 %v1578_v22, %v1575_v21  ;;  %v926_v31 = vshrl.u32 %v787_v12, 16  ;;  %v824_v32 = vsel %vm7154_vm2, %v822_v23, %v823_v24  ;;  %v1584_v33 = vrot.slane %v1582_v25, 4 }
  0x7b   : > { %v1587_v34 = vrot.slane %v1585_v26, 5  ;;  %v1592_v35 = vrot.slane %v1590_v27, 4  ;;  %v1595_v38 = vrot.slane %v1593_v29, 5  ;;  %v929_v40 = vshll.u32 %v787_v12, 16  ;;  %v1182_v26 = vld [vmem:[#allocation2 + $0x68] sm:$0x1f] }
  0x7c   : > { %1766 = vrot.lane.b32.xlu0 %v1506_v18, %s7177_s19  ;;  %v1580_v37 = vsel %vm7153_vm3, %v1571_v28, %v1579_v42  ;;  %v928_v39 = vrot.slane %v926_v31, 4  ;;  %v934_v10 = vshrl.u32 %v836_v30, 16  ;;  %v937_v44 = vshll.u32 %v836_v30, 16  ;;  %v1133_v18 = vld [vmem:[#allocation2 + $0x50] sm:$0xf0] }
  0x7d   : > { %1674 = vrot.lane.b32.xlu1 %v821_v19, %s7137_s24  ;;  %v1588_v43 = vor.u32 %v1587_v34, %v1584_v33  ;;  %v909_v60 = vshrl.u32 %v5914_v59, 16  ;;  %v1596_v46 = vor.u32 %v1595_v38, %v1592_v35  ;;  %v931_v47 = vrot.slane %v929_v40, 5  ;;  %v1181_v34 = vld [vmem:[#allocation2 + $0x58] sm:$0x1f] }
  0x7e   : > { %v912_v48 = vshll.u32 %v5914_v59, 16  ;;  %v917_v50 = vshrl.u32 %v835_v36, 16  ;;  %v936_v53 = vrot.slane %v934_v10, 4  ;;  %v939_v54 = vrot.slane %v937_v44, 5  ;;  %v1332_v44 = vld [vmem:[#allocation2 + $0x70] sm:$0xf8] }
  0x7f   : > { %v911_v55 = vrot.slane %v909_v60, 4  ;;  %v920_v56 = vshll.u32 %v835_v36, 16  ;;  %v1597_v58 = vsel %vm7153_vm3, %v1588_v43, %v1596_v46  ;;  %v932_v49 = vor.u32 %v931_v47, %v928_v39 }
  0x80   : > { %1782 = vrot.lane.b32.xlu0 %v1580_v37, %s7131_s22  ;;  %v914_v61 = vrot.slane %v912_v48, 5  ;;  %v919_v62 = vrot.slane %v917_v50, 4  ;;  %v940_v0 = vor.u32 %v939_v54, %v936_v53  ;;  %v1079_v3 = vshrl.u32 %v987_v45, 16  ;;  %v1333_v48 = vld [vmem:[#allocation2 + $0x78] sm:$0xf] }
  0x81   : > { %1676 = vrot.lane.b32.xlu1 %v824_v32, %s7137_s24  ;;  %v922_v1 = vrot.slane %v920_v56, 5  ;;  %v1082_v59 = vshll.u32 %v987_v45, 16  ;;  %v1087_v13 = vshrl.u32 %v988_v51, 16  ;;  %v1090_v5 = vshll.u32 %v988_v51, 16 }
  0x82   : > { %v915_v4 = vor.u32 %v914_v61, %v911_v55  ;;  %v1062_v6 = vshrl.u32 %v985_v57, 16  ;;  %v941_v7 = vsel %vm7153_vm3, %v932_v49, %v940_v0  ;;  %v1081_v9 = vrot.slane %v1079_v3, 3  ;;  %v1330_v55 = vld [vmem:[#allocation2 + $0x60] sm:$0xf8]  ;;  %v1331_v3 = vld [vmem:[#allocation2 + $0x68] sm:$0xf] }
  0x83   : > { %v923_v8 = vor.u32 %v922_v1, %v919_v62  ;;  %v1084_v12 = vrot.slane %v1082_v59, 4  ;;  %v1089_v14 = vrot.slane %v1087_v13, 3  ;;  %v1092_v15 = vrot.slane %v1090_v5, 4 }
  0x84   : > { %1784 = vrot.lane.b32.xlu0 %v1597_v58, %s7131_s22  ;;  %v1064_v16 = vrot.slane %v1062_v6, 3  ;;  %v1065_v17 = vshll.u32 %v985_v57, 16  ;;  %v1070_v52 = vshrl.u32 %v986_v41, 16  ;;  %v1073_v21 = vshll.u32 %v986_v41, 16  ;;  %s7178_s22 = smov 12  }
  0x85   : > { %1692 = vrot.lane.b32.xlu1 %v941_v7, %s7133_s25  ;;  %v924_v19 = vsel %vm7153_vm3, %v915_v4, %v923_v8  ;;  %v1085_v20 = vor.u32 %v1084_v12, %v1081_v9  ;;  %v1093_v22 = vor.u32 %v1092_v15, %v1089_v14  ;;  %v1168_v24 = vrot.slane %v1134_v2, 4  ;;  %v1479_v9 = vld [vmem:[#allocation2 + $0x70] sm:$0xf0] }
  0x86   : > { %v1067_v23 = vrot.slane %v1065_v17, 4  ;;  %v1169_v25 = vrot.slane %v988_v51, 4  ;;  %v1072_v27 = vrot.slane %v1070_v52, 3  ;;  %v1075_v28 = vrot.slane %v1073_v21, 4 }
  0x87   : > { %v1165_v42 = vrot.slane %v1133_v18, 4  ;;  %v1166_v29 = vrot.slane %v986_v41, 4  ;;  %v1094_v30 = vsel %vm7152_vm4, %v1085_v20, %v1093_v22  ;;  %v1271_v33 = vshrl.u32 %v1134_v2, 16  ;;  %v5957_v20 = vld [vmem:[#allocation2 + $0x60] sm:$0xf0] }
  0x88   : > { %1690 = vrot.lane.b32.xlu0 %v924_v19, %s7133_s25  ;;  %v1068_v31 = vor.u32 %v1067_v23, %v1064_v16  ;;  %v1170_v32 = vsel %vm7154_vm2, %v1168_v24, %v1169_v25  ;;  %v1076_v35 = vor.u32 %v1075_v28, %v1072_v27  ;;  %v1274_v37 = vshll.u32 %v1134_v2, 16  ;;  %s7179_s25 = smov 16   ;;  %v1478_v16 = vld [vmem:[#allocation2 + $0x60] sm:$0xf0]  ;;  %v5959_v24 = vld [vmem:[#allocation2 + $0x68] sm:$0xf] }
  0x89   : > { %1708 = vrot.lane.b32.xlu1 %v1094_v30, %s7178_s22  ;;  %v1167_v36 = vsel %vm7154_vm2, %v1165_v42, %v1166_v29  ;;  %v1279_v38 = vshrl.u32 %v1182_v26, 16  ;;  %v1273_v39 = vrot.slane %v1271_v33, 4  ;;  %v1282_v40 = vshll.u32 %v1182_v26, 16  ;;  %v1526_v42 = vld [vmem:[#allocation2 + $0x68] sm:$0x1f] }
  0x8a   : > { %v1254_v43 = vshrl.u32 %v1133_v18, 16  ;;  %v1257_v10 = vshll.u32 %v1133_v18, 16  ;;  %v1077_v60 = vsel %vm7152_vm4, %v1068_v31, %v1076_v35  ;;  %v1276_v45 = vrot.slane %v1274_v37, 5  ;;  %v789_v35 = vld [vmem:[#allocation2 + $0x70] sm:$0xf0] }
  0x8b   : > { %v1281_v46 = vrot.slane %v1279_v38, 4  ;;  %v1262_v47 = vshrl.u32 %v1181_v34, 16  ;;  %v1284_v50 = vrot.slane %v1282_v40, 5  ;;  %v1265_v54 = vshll.u32 %v1181_v34, 16  ;;  %v5966_v34 = vld [vmem:[#allocation2 + $0x78] sm:$0xf] }
  0x8c   : > { %1706 = vrot.lane.b32.xlu0 %v1077_v60, %s7178_s22  ;;  %v1256_v51 = vrot.slane %v1254_v43, 4  ;;  %v1259_v53 = vrot.slane %v1257_v10, 5  ;;  %v1277_v56 = vor.u32 %v1276_v45, %v1273_v39  ;;  %v1424_v58 = vshrl.u32 %v1332_v44, 16  ;;  %v1527_v40 = vld [vmem:[#allocation2 + $0x78] sm:$0x1f] }
  0x8d   : > { %1724 = vrot.lane.b32.xlu1 %v1170_v32, %s7179_s25  ;;  %v1264_v57 = vrot.slane %v1262_v47, 4  ;;  %v1427_v49 = vshll.u32 %v1332_v44, 16  ;;  %v1285_v61 = vor.u32 %v1284_v50, %v1281_v46  ;;  %v1267_v0 = vrot.slane %v1265_v54, 5 }
  0x8e   : > { %v1260_v62 = vor.u32 %v1259_v53, %v1256_v51  ;;  %v1432_v1 = vshrl.u32 %v1333_v48, 16  ;;  %v1426_v59 = vrot.slane %v1424_v58, 3  ;;  %v1435_v13 = vshll.u32 %v1333_v48, 16  ;;  %v838_v58 = vld [vmem:[#allocation2 + $0x78] sm:$0x1f] }
  0x8f   : > { %v1429_v4 = vrot.slane %v1427_v49, 4  ;;  %v1407_v5 = vshrl.u32 %v1330_v55, 16  ;;  %v1286_v41 = vsel %vm7153_vm3, %v1277_v56, %v1285_v61  ;;  %v1268_v6 = vor.u32 %v1267_v0, %v1264_v57 }
  0x90   : > { %1722 = vrot.lane.b32.xlu0 %v1167_v36, %s7179_s25  ;;  %v1434_v7 = vrot.slane %v1432_v1, 3  ;;  %v1410_v8 = vshll.u32 %v1330_v55, 16  ;;  %v1437_v2 = vrot.slane %v1435_v13, 4  ;;  %v1415_v15 = vshrl.u32 %v1331_v3, 16 }
  0x91   : > { %1740 = vrot.lane.b32.xlu1 %v1286_v41, %s7176_s28  ;;  %v1430_v12 = vor.u32 %v1429_v4, %v1426_v59  ;;  %v1409_v14 = vrot.slane %v1407_v5, 3  ;;  %v1269_v17 = vsel %vm7153_vm3, %v1260_v62, %v1268_v6  ;;  %v1418_v19 = vshll.u32 %v1331_v3, 16 }
  0x92   : > { %v1412_v18 = vrot.slane %v1410_v8, 4  ;;  %v1438_v52 = vor.u32 %v1437_v2, %v1434_v7  ;;  %v1417_v21 = vrot.slane %v1415_v15, 3  ;;  %v1513_v22 = vrot.slane %v1479_v9, 4 }
  0x93   : > { %v1514_v23 = vrot.slane %v1333_v48, 4  ;;  %v1420_v26 = vrot.slane %v1418_v19, 4  ;;  %v1510_v27 = vrot.slane %v1478_v16, 4  ;;  %v1511_v28 = vrot.slane %v1331_v3, 4  ;;  %v837_v3 = vld [vmem:[#allocation2 + $0x68] sm:$0x1f] }
  0x94   : > { %1738 = vrot.lane.b32.xlu0 %v1269_v17, %s7176_s28  ;;  %v1413_v25 = vor.u32 %v1412_v18, %v1409_v14  ;;  %v1439_v29 = vsel %vm7152_vm4, %v1430_v12, %v1438_v52  ;;  %v825_v30 = vrot.slane %v5957_v20, 4  ;;  %v826_v32 = vrot.slane %v5959_v24, 4 }
  0x95   : > { %1756 = vrot.lane.b32.xlu1 %v1439_v29, %s7135_s21  ;;  %v1421_v31 = vor.u32 %v1420_v26, %v1417_v21  ;;  %v1599_v33 = vshrl.u32 %v1478_v16, 16  ;;  %v1515_v36 = vsel %vm7154_vm2, %v1513_v22, %v1514_v23  ;;  %v1602_v37 = vshll.u32 %v1478_v16, 16  ;;  %v992_v16 = vld [vmem:[#allocation2 + $0x88] sm:$0xf]  ;;  %v989_v21 = vld [vmem:[#allocation2 + $0x70] sm:$0xf8] }
  0x96   : > { %v1607_v38 = vshrl.u32 %v1526_v42, 16  ;;  %v1610_v39 = vshll.u32 %v1526_v42, 16  ;;  %v1512_v10 = vsel %vm7154_vm2, %v1510_v27, %v1511_v28  ;;  %v827_v44 = vsel %vm7154_vm2, %v825_v30, %v826_v32  ;;  %v990_v32 = vld [vmem:[#allocation2 + $0x78] sm:$0xf] }
  0x97   : > { %v1422_v43 = vsel %vm7152_vm4, %v1413_v25, %v1421_v31  ;;  %v1601_v60 = vrot.slane %v1599_v33, 4  ;;  %v1604_v45 = vrot.slane %v1602_v37, 5  ;;  %v828_v48 = vrot.slane %v789_v35, 4 }
  0x98   : > { %1754 = vrot.lane.b32.xlu0 %v1422_v43, %s7135_s21  ;;  %v1609_v46 = vrot.slane %v1607_v38, 4  ;;  %v1612_v47 = vrot.slane %v1610_v39, 5  ;;  %v829_v50 = vrot.slane %v5966_v34, 4  ;;  %v1616_v51 = vshrl.u32 %v1479_v9, 16  ;;  %s7180_s21 = smov 32  }
  0x99   : > { %1772 = vrot.lane.b32.xlu1 %v1515_v36, %s7177_s19  ;;  %v1619_v53 = vshll.u32 %v1479_v9, 16  ;;  %v1624_v54 = vshrl.u32 %v1527_v40, 16  ;;  %v1605_v55 = vor.u32 %v1604_v45, %v1601_v60  ;;  %v1627_v57 = vshll.u32 %v1527_v40, 16  ;;  %v991_v9 = vld [vmem:[#allocation2 + $0x80] sm:$0xf8] }
  0x9a   : > { %v1613_v56 = vor.u32 %v1612_v47, %v1609_v46  ;;  %v960_v49 = vshrl.u32 %v789_v35, 16  ;;  %v830_v61 = vsel %vm7154_vm2, %v828_v48, %v829_v50  ;;  %v1618_v62 = vrot.slane %v1616_v51, 4  ;;  %v1136_v39 = vld [vmem:[#allocation2 + $0x80] sm:$0xf0]  ;;  %v1135_v60 = vld [vmem:[#allocation2 + $0x70] sm:$0xf0] }
  0x9b   : > { %v1621_v0 = vrot.slane %v1619_v53, 5  ;;  %v1626_v1 = vrot.slane %v1624_v54, 4  ;;  %v1629_v4 = vrot.slane %v1627_v57, 5  ;;  %v963_v5 = vshll.u32 %v789_v35, 16 }
  0x9c   : > { %1770 = vrot.lane.b32.xlu0 %v1512_v10, %s7177_s19  ;;  %v1614_v59 = vsel %vm7153_vm3, %v1605_v55, %v1613_v56  ;;  %v962_v13 = vrot.slane %v960_v49, 4  ;;  %v968_v6 = vshrl.u32 %v838_v58, 16  ;;  %v971_v7 = vshll.u32 %v838_v58, 16  ;;  %v1184_v55 = vld [vmem:[#allocation2 + $0x88] sm:$0x1f] }
  0x9d   : > { %1678 = vrot.lane.b32.xlu1 %v827_v44, %s7137_s24  ;;  %v1622_v41 = vor.u32 %v1621_v0, %v1618_v62  ;;  %v943_v8 = vshrl.u32 %v5957_v20, 16  ;;  %v1630_v12 = vor.u32 %v1629_v4, %v1626_v1  ;;  %v965_v2 = vrot.slane %v963_v5, 5  ;;  %v5988_v56 = vld [vmem:[#allocation2 + $0x8] sm:$0xf] }
  0x9e   : > { %v946_v14 = vshll.u32 %v5957_v20, 16  ;;  %v951_v15 = vshrl.u32 %v837_v3, 16  ;;  %v970_v17 = vrot.slane %v968_v6, 4  ;;  %v973_v18 = vrot.slane %v971_v7, 5 }
  0x9f   : > { %v945_v19 = vrot.slane %v943_v8, 4  ;;  %v954_v52 = vshll.u32 %v837_v3, 16  ;;  %v1631_v22 = vsel %vm7153_vm3, %v1622_v41, %v1630_v12  ;;  %v966_v23 = vor.u32 %v965_v2, %v962_v13  ;;  %v629_v12 = vld [vmem:[#allocation2] sm:$0xf8] }
  0xa0   : > { %1786 = vrot.lane.b32.xlu0 %v1614_v59, %s7180_s21  ;;  %v948_v25 = vrot.slane %v946_v14, 5  ;;  %v953_v26 = vrot.slane %v951_v15, 4  ;;  %v974_v27 = vor.u32 %v973_v18, %v970_v17  ;;  %v1113_v42 = vshrl.u32 %v991_v9, 16  ;;  %v1183_v59 = vld [vmem:[#allocation2 + $0x78] sm:$0x1f] }
  0xa1   : > { %1680 = vrot.lane.b32.xlu1 %v830_v61, %s7137_s24  ;;  %v956_v28 = vrot.slane %v954_v52, 5  ;;  %v1116_v20 = vshll.u32 %v991_v9, 16  ;;  %v1121_v30 = vshrl.u32 %v992_v16, 16  ;;  %v1124_v31 = vshll.u32 %v992_v16, 16  ;;  %s7181_s24 = smov 8  }
  0xa2   : > { %v949_v29 = vor.u32 %v948_v25, %v945_v19  ;;  %v1096_v33 = vshrl.u32 %v989_v21, 16  ;;  %v975_v35 = vsel %vm7153_vm3, %v966_v23, %v974_v27  ;;  %v1115_v37 = vrot.slane %v1113_v42, 3  ;;  %v1336_v18 = vld [vmem:[#allocation2 + $0x90] sm:$0xf8]  ;;  %v6001_v25 = vld [vmem:[#allocation2 + $0x98] sm:$0xf] }
  0xa3   : > { %v957_v36 = vor.u32 %v956_v28, %v953_v26  ;;  %v1118_v38 = vrot.slane %v1116_v20, 4  ;;  %v1123_v40 = vrot.slane %v1121_v30, 3  ;;  %v1126_v43 = vrot.slane %v1124_v31, 4 }
  0xa4   : > { %1788 = vrot.lane.b32.xlu0 %v1631_v22, %s7180_s21  ;;  %v1098_v10 = vrot.slane %v1096_v33, 3  ;;  %v1099_v44 = vshll.u32 %v989_v21, 16  ;;  %v1104_v47 = vshrl.u32 %v990_v32, 16  ;;  %v1107_v48 = vshll.u32 %v990_v32, 16 }
  0xa5   : > { %1696 = vrot.lane.b32.xlu1 %v975_v35, %s7181_s24  ;;  %v958_v45 = vsel %vm7153_vm3, %v949_v29, %v957_v36  ;;  %v1119_v46 = vor.u32 %v1118_v38, %v1115_v37  ;;  %v1127_v50 = vor.u32 %v1126_v43, %v1123_v40  ;;  %v1174_v53 = vrot.slane %v1136_v39, 4  ;;  %v1335_v38 = vld [vmem:[#allocation2 + $0x88] sm:$0xf] }
  0xa6   : > { %v1101_v51 = vrot.slane %v1099_v44, 4  ;;  %v1175_v54 = vrot.slane %v992_v16, 4  ;;  %v655_v57 = vshrl.u32 %v5988_v56, 16  ;;  %v1106_v58 = vrot.slane %v1104_v47, 3 }
  0xa7   : > { %v1109_v49 = vrot.slane %v1107_v48, 4  ;;  %v1171_v61 = vrot.slane %v1135_v60, 4  ;;  %v1128_v62 = vsel %vm7152_vm4, %v1119_v46, %v1127_v50  ;;  %v1172_v1 = vrot.slane %v990_v32, 4  ;;  %v1334_v32 = vld [vmem:[#allocation2 + $0x80] sm:$0xf8] }
  0xa8   : > { %1694 = vrot.lane.b32.xlu0 %v958_v45, %s7181_s24  ;;  %v1102_v0 = vor.u32 %v1101_v51, %v1098_v10  ;;  %v1305_v3 = vshrl.u32 %v1136_v39, 16  ;;  %v1176_v13 = vsel %vm7154_vm2, %v1174_v53, %v1175_v54  ;;  %v1308_v5 = vshll.u32 %v1136_v39, 16 }
  0xa9   : > { %1712 = vrot.lane.b32.xlu1 %v1128_v62, %s7178_s22  ;;  %v1110_v4 = vor.u32 %v1109_v49, %v1106_v58  ;;  %v1313_v41 = vshrl.u32 %v1184_v55, 16  ;;  %v1316_v7 = vshll.u32 %v1184_v55, 16  ;;  %v1288_v8 = vshrl.u32 %v1135_v60, 16  ;;  %v1481_v49 = vld [vmem:[#allocation2 + $0x90] sm:$0xf0] }
  0xaa   : > { %v1307_v6 = vrot.slane %v1305_v3, 4  ;;  %v1291_v9 = vshll.u32 %v1135_v60, 16  ;;  %v1310_v14 = vrot.slane %v1308_v5, 5  ;;  %v1296_v16 = vshrl.u32 %v1183_v59, 16  ;;  %v5467_v62 = vld [vmem:[#allocation2 + $0x18] sm:$0xf] }
  0xab   : > { %v1111_v2 = vsel %vm7152_vm4, %v1102_v0, %v1110_v4  ;;  %v1315_v15 = vrot.slane %v1313_v41, 4  ;;  %v1318_v19 = vrot.slane %v1316_v7, 5  ;;  %v1290_v52 = vrot.slane %v1288_v8, 4  ;;  %v631_v41 = vld [vmem:[#allocation2 + $0x10] sm:$0xf8] }
  0xac   : > { %1710 = vrot.lane.b32.xlu0 %v1111_v2, %s7178_s22  ;;  %v1293_v21 = vrot.slane %v1291_v9, 5  ;;  %v1299_v22 = vshll.u32 %v1183_v59, 16  ;;  %v658_v26 = vshll.u32 %v5988_v56, 16  ;;  %v1173_v27 = vsel %vm7154_vm2, %v1171_v61, %v1172_v1 }
  0xad   : > { %v5996_v17 = vpop.permute.xlu1 %1716  ;;  %1728 = vrot.lane.b32.xlu1 %v1176_v13, %s7179_s25  ;;  %v1311_v28 = vor.u32 %v1310_v14, %v1307_v6  ;;  %v1298_v42 = vrot.slane %v1296_v16, 4  ;;  %v1319_v20 = vor.u32 %v1318_v19, %v1315_v15  ;;  %v1458_v31 = vshrl.u32 %v1336_v18, 16  ;;  %v1480_v6 = vld [vmem:[#allocation2 + $0x80] sm:$0xf0] }
  0xae   : > { %v1294_v29 = vor.u32 %v1293_v21, %v1290_v52  ;;  %v1301_v30 = vrot.slane %v1299_v22, 5  ;;  %v6006_v33 = vrot.slane %v655_v57, 3  ;;  %v647_v35 = vshrl.u32 %v629_v12, 16  ;;  %v1529_v22 = vld [vmem:[#allocation2 + $0x98] sm:$0x1f] }
  0xaf   : > { %v5999_v23 = vpop.permute.xlu0 %1666  ;;  %v1461_v36 = vshll.u32 %v1336_v18, 16  ;;  %v1466_v37 = vshrl.u32 %v6001_v25, 16  ;;  %v1320_v40 = vsel %vm7153_vm3, %v1311_v28, %v1319_v20  ;;  %v1460_v10 = vrot.slane %v1458_v31, 3 }
  0xb0   : > { %1726 = vrot.lane.b32.xlu0 %v1173_v27, %s7179_s25  ;;  %v1302_v43 = vor.u32 %v1301_v30, %v1298_v42  ;;  %v1469_v44 = vshll.u32 %v6001_v25, 16  ;;  %v650_v45 = vshll.u32 %v629_v12, 16  ;;  %v1441_v48 = vshrl.u32 %v1334_v32, 16 }
  0xb1   : > { %v6009_v39 = vpop.permute.xlu1 %1764  ;;  %1744 = vrot.lane.b32.xlu1 %v1320_v40, %s7176_s28  ;;  %v1463_v46 = vrot.slane %v1461_v36, 4  ;;  %v1468_v47 = vrot.slane %v1466_v37, 3  ;;  %v1444_v53 = vshll.u32 %v1334_v32, 16  ;;  %v1449_v54 = vshrl.u32 %v1335_v38, 16  ;;  %v1528_v36 = vld [vmem:[#allocation2 + $0x88] sm:$0x1f] }
  0xb2   : > { %v1303_v50 = vsel %vm7153_vm3, %v1294_v29, %v1302_v43  ;;  %v1471_v51 = vrot.slane %v1469_v44, 4  ;;  %v660_v55 = vrot.slane %v658_v26, 4  ;;  %v1443_v57 = vrot.slane %v1441_v48, 3 }
  0xb3   : > { %v6014_v60 = vpop.permute.xlu0 %1668  ;;  %v1464_v56 = vor.u32 %v1463_v46, %v1460_v10  ;;  %v1452_v58 = vshll.u32 %v1335_v38, 16  ;;  %v672_v0 = vshrl.u32 %v5467_v62, 16  ;;  %v1446_v3 = vrot.slane %v1444_v53, 4 }
  0xb4   : > { %1742 = vrot.lane.b32.xlu0 %v1303_v50, %s7176_s28  ;;  %v1472_v1 = vor.u32 %v1471_v51, %v1468_v47  ;;  %v1451_v59 = vrot.slane %v1449_v54, 3  ;;  %v649_v13 = vrot.slane %v647_v35, 3  ;;  %v652_v7 = vrot.slane %v650_v45, 4 }
  0xb5   : > { %v6018_v61 = vpop.permute.xlu1 %1670  ;;  %v1454_v5 = vrot.slane %v1452_v58, 4  ;;  %v1447_v9 = vor.u32 %v1446_v3, %v1443_v57  ;;  %v1519_v12 = vrot.slane %v1481_v49, 4  ;;  %v675_v2 = vshll.u32 %v5467_v62, 16 }
  0xb6   : > { %v1473_v8 = vsel %vm7152_vm4, %v1464_v56, %v1472_v1  ;;  %v1520_v15 = vrot.slane %v6001_v25, 4  ;;  %v664_v18 = vshrl.u32 %v631_v41, 16  ;;  %v667_v19 = vshll.u32 %v631_v41, 16 }
  0xb7   : > { %v6021_v4 = vpop.permute.xlu0 %1714  ;;  %1760 = vrot.lane.b32.xlu1 %v1473_v8, %s7182_s0  ;;  %v1455_v14 = vor.u32 %v1454_v5, %v1451_v59  ;;  %v1516_v52 = vrot.slane %v1480_v6, 4  ;;  %v1517_v21 = vrot.slane %v1335_v38, 4  ;;  %v661_v42 = vor.u32 %v660_v55, %v6006_v33  ;;  %v5459_v5 = vld [vmem:[%s7175_s1 + $0x10] ss:$0 sps:$4 sm:$0x33]   ;;  %s5578_s1 = smov 124  }
  0xb8   : > { %v1521_v28 = vsel %vm7154_vm2, %v1519_v12, %v1520_v15  ;;  %v653_v20 = vor.u32 %v652_v7, %v649_v13  ;;  %v674_v29 = vrot.slane %v672_v0, 3  ;;  %v1650_v30 = vshrl.u32 %v1481_v49, 16  ;;  %5349 = vmatprep.subr.msk.bf16.mxu0 %vm7151_vm9, %v5459_v5 }
  0xb9   : > { %v1683_v16 = vpop.permute.xlu1 %1682  ;;  %v1456_v27 = vsel %vm7152_vm4, %v1447_v9, %v1455_v14  ;;  %v677_v25 = vrot.slane %v675_v2, 4  ;;  %v1518_v31 = vsel %vm7154_vm2, %v1516_v52, %v1517_v21  ;;  %v1653_v32 = vshll.u32 %v1481_v49, 16 }
  0xba   : > { %1758 = vrot.lane.b32.xlu0 %v1456_v27, %s7182_s0  ;;  %v1658_v35 = vshrl.u32 %v1529_v22, 16  ;;  %v666_v38 = vrot.slane %v664_v18, 3  ;;  %v669_v40 = vrot.slane %v667_v19, 4  ;;  %v1652_v43 = vrot.slane %v1650_v30, 4 }
  0xbb   : > { %v6026_v26 = vpop.permute.xlu0 %1762  ;;  %1776 = vrot.lane.b32.xlu1 %v1521_v28, %s7177_s19  ;;  %v1655_v33 = vrot.slane %v1653_v32, 5  ;;  %v1661_v45 = vshll.u32 %v1529_v22, 16  ;;  %v1633_v46 = vshrl.u32 %v1480_v6, 16  ;;  %v662_v47 = vsel %vm7152_vm4, %v653_v20, %v661_v42 }
  0xbc   : > { %v1660_v44 = vrot.slane %v1658_v35, 4  ;;  %v1636_v48 = vshll.u32 %v1480_v6, 16  ;;  %v1641_v50 = vshrl.u32 %v1528_v36, 16  ;;  %v1644_v51 = vshll.u32 %v1528_v36, 16  ;;  %v633_v35 = vld [vmem:[#allocation2 + $0x20] sm:$0xf8] }
  0xbd   : > { %v1685_v37 = vpop.permute.xlu1 %1684  ;;  %v678_v53 = vor.u32 %v677_v25, %v674_v29  ;;  %v1656_v54 = vor.u32 %v1655_v33, %v1652_v43  ;;  %v1663_v55 = vrot.slane %v1661_v45, 5  ;;  %v1635_v56 = vrot.slane %v1633_v46, 4  ;;  %v635_v36 = vld [vmem:[#allocation2 + $0x30] sm:$0xf8]  ;;  %v5469_v33 = vld [vmem:[#allocation2 + $0x38] sm:$0xf] }
  0xbe   : > { %1774 = vrot.lane.b32.xlu0 %v1518_v31, %s7177_s19  ;;  %v670_v58 = vor.u32 %v669_v40, %v666_v38  ;;  %v1638_v49 = vrot.slane %v1636_v48, 5  ;;  %v1643_v62 = vrot.slane %v1641_v50, 4  ;;  %v1646_v0 = vrot.slane %v1644_v51, 5 }
  0xbf   : > { %v1699_v10 = vpop.permute.xlu0 %1698  ;;  %v1664_v1 = vor.u32 %v1663_v55, %v1660_v44  ;;  %v1797_v41 = vsel %vm7150_vm5, %v662_v47, %v5999_v23  ;;  %v1977_v23 = vsel %vm7151_vm9, %v5459_v5, 0  ;;  %vm7143_vm14 = vcmask 293888  }
  0xc0   : > { %v1639_v3 = vor.u32 %v1638_v49, %v1635_v56  ;;  %v1647_v59 = vor.u32 %v1646_v0, %v1643_v62  ;;  %v679_v7 = vsel %vm7152_vm4, %v670_v58, %v678_v53  ;;  %v1821_v9 = vsel %vm1819_vm6, %v1797_v41, %v1683_v16  ;;  %5290 = vmatpush3.bf16.msra.mxu0 %v1977_v23 }
  0xc1   : > { %v1701_v57 = vpop.permute.xlu1 %1700  ;;  %v1665_v6 = vsel %vm7153_vm3, %v1656_v54, %v1664_v1  ;;  %v1838_v2 = vsel %vm7149_vm7, %v1821_v9, %v1699_v10  ;;  %v1800_v14 = vsel %vm7150_vm5, %v679_v7, %v6014_v60  ;;  %v681_v43 = vshrl.u32 %v633_v35, 16 }
  0xc2   : > { %1792 = vrot.lane.b32.xlu1 %v1665_v6, %s7180_s21  ;;  %v1648_v8 = vsel %vm7153_vm3, %v1639_v3, %v1647_v59  ;;  %v1823_v16 = vsel %vm1819_vm6, %v1800_v14, %v1685_v37  ;;  %v1855_v18 = vsel %vm7148_vm8, %v1838_v2, %v6021_v4  ;;  %v5468_v37 = vld [vmem:[#allocation2 + $0x28] sm:$0xf]  ;;  %v684_v10 = vshll.u32 %v633_v35, 16 }
  0xc3   : > { %1790 = vrot.lane.b32.xlu0 %v1648_v8, %s7180_s21  ;;  %v1840_v19 = vsel %vm7149_vm7, %v1823_v16, %v1701_v57  ;;  %v689_v38 = vshrl.u32 %v5468_v37, 16  ;;  %v692_v40 = vshll.u32 %v5468_v37, 16  ;;  %v706_v44 = vshrl.u32 %v5469_v33, 16 }
  0xc4   : > { %v1731_v13 = vpop.permute.xlu0 %1730  ;;  %v1857_v60 = vsel %vm7148_vm8, %v1840_v19, %v5996_v17  ;;  %v709_v45 = vshll.u32 %v5469_v33, 16  ;;  %v698_v46 = vshrl.u32 %v635_v36, 16  ;;  %v683_v53 = vrot.slane %v681_v43, 3 }
  0xc5   : > { %v1872_v52 = vsel %vm7147_vm10, %v1855_v18, %v1731_v13  ;;  %v691_v50 = vrot.slane %v689_v38, 3  ;;  %v694_v51 = vrot.slane %v692_v40, 4  ;;  %v686_v54 = vrot.slane %v684_v10, 4 }
  0xc6   : > { %v1733_v12 = vpop.permute.xlu1 %1732  ;;  %v700_v55 = vrot.slane %v698_v46, 3  ;;  %v708_v57 = vrot.slane %v706_v44, 3  ;;  %v711_v58 = vrot.slane %v709_v45, 4  ;;  %v740_v40 = vshrl.u32 %v5924_v11, 16 }
  0xc7   : > { %v1874_v27 = vsel %vm7147_vm10, %v1857_v60, %v1733_v12  ;;  %v695_v0 = vor.u32 %v694_v51, %v691_v50  ;;  %v687_v1 = vor.u32 %v686_v54, %v683_v53  ;;  %v743_v43 = vshll.u32 %v5924_v11, 16 }
  0xc8   : > { %v712_v59 = vor.u32 %v711_v58, %v708_v57  ;;  %v742_v53 = vrot.slane %v740_v40, 3 }
  0xc9   : > { %v1747_v15 = vpop.permute.xlu0 %1746  ;;  %v696_v41 = vsel %vm7152_vm4, %v687_v1, %v695_v0  ;;  %v745_v54 = vrot.slane %v743_v43, 4 }
  0xca   : > { %v1889_v21 = vsel %vm7146_vm11, %v1872_v52, %v1747_v15  ;;  %v1803_v9 = vsel %vm7150_vm5, %v696_v41, %v6018_v61 }
  0xcb   : > { %v1906_v42 = vsel %vm7145_vm12, %v1889_v21, %v6026_v26 }
  0xcc   : > { %v1749_v22 = vpop.permute.xlu1 %1748 }
  0xcd   : > { %v1891_v4 = vsel %vm7146_vm11, %v1874_v27, %v1749_v22 }
  0xce   : > { %v1908_v30 = vsel %vm7145_vm12, %v1891_v4, %v6009_v39  ;;  %v701_v39 = vshll.u32 %v635_v36, 16  ;;  %v723_v36 = vshrl.u32 %v5916_v63, 16 }
  0xcf   : > { %v1779_v28 = vpop.permute.xlu0 %1778 }
  0xd0   : > { %v1923_v20 = vsel %vm7144_vm13, %v1906_v42, %v1779_v28  ;;  %v1673_v29 = vpop.permute.xlu1 %1672  ;;  %v703_v56 = vrot.slane %v701_v39, 4 }
  0xd1   : > { %5291 = vmatprep.mubr.msk.bf16.mxu0 %vm7143_vm14, %v1923_v20 }
  0xd2   : > { %v704_v3 = vor.u32 %v703_v56, %v700_v55 }
  0xd3   : > { %v1781_v25 = vpop.permute.xlu0 %1780 }
  0xd4   : > { %v1925_v17 = vsel %vm7144_vm13, %v1908_v30, %v1781_v25  ;;  %v713_v6 = vsel %vm7152_vm4, %v704_v3, %v712_v59 }
  0xd5   : > { %5292 = vmatmul.mubr.msk.bf16.vlgmr.msra.gmra.mrb[0].mxu0 %vm7143_vm14, %v1925_v17  ;;  %v1689_v31 = vpop.permute.xlu1 %1688  ;;  %v1806_v12 = vsel %vm7150_vm5, %v713_v6, %v1673_v29  ;;  %v637_v17 = vld [vmem:[#allocation2 + $0x40] sm:$0xf8] }
  0xd6   : > { %v1827_v16 = vsel %vm1819_vm6, %v1806_v12, %v1689_v31  ;;  %v715_v37 = vshrl.u32 %v637_v17, 16  ;;  %v718_v38 = vshll.u32 %v637_v17, 16  ;;  %v757_v17 = vshrl.u32 %v5959_v24, 16 }
  0xd8   : > { %v1687_v32 = vpop.permute.xlu0 %1686  ;;  %v717_v46 = vrot.slane %v715_v37, 3  ;;  %v720_v39 = vrot.slane %v718_v38, 4 }
  0xd9   : > { %v1825_v2 = vsel %vm1819_vm6, %v1803_v9, %v1687_v32  ;;  %v639_v32 = vld [vmem:[#allocation2 + $0x50] sm:$0xf8] }
  0xda   : > { %v1705_v26 = vpop.permute.xlu1 %1704  ;;  %v732_v10 = vshrl.u32 %v639_v32, 16  ;;  %v735_v33 = vshll.u32 %v639_v32, 16  ;;  %v721_v56 = vor.u32 %v720_v39, %v717_v46 }
  0xdb   : > { %v1844_v21 = vsel %vm7149_vm7, %v1827_v16, %v1705_v26  ;;  %v726_v26 = vshll.u32 %v5916_v63, 16 }
  0xdc   : > { %v734_v50 = vrot.slane %v732_v10, 3  ;;  %v737_v51 = vrot.slane %v735_v33, 4  ;;  %v759_v33 = vrot.slane %v757_v17, 3 }
  0xdd   : > { %v1703_v47 = vpop.permute.xlu0 %1702 }
  0xde   : > { %v1721_v48 = vpop.permute.xlu1 %1720  ;;  %v1842_v23 = vsel %vm7149_vm7, %v1825_v2, %v1703_v47  ;;  %v725_v47 = vrot.slane %v723_v36, 3  ;;  %v738_v58 = vor.u32 %v737_v51, %v734_v50 }
  0xdf   : > { %v1861_v27 = vsel %vm7148_vm8, %v1844_v21, %v1721_v48  ;;  %v728_v48 = vrot.slane %v726_v26, 4 }
  0xe1   : > { %v1719_v49 = vpop.permute.xlu0 %1718  ;;  %v729_v57 = vor.u32 %v728_v48, %v725_v47 }
  0xe2   : > { %v1737_v62 = vpop.permute.xlu1 %1736  ;;  %v1859_v18 = vsel %vm7148_vm8, %v1842_v23, %v1719_v49  ;;  %v746_v49 = vor.u32 %v745_v54, %v742_v53 }
  0xe3   : > { %v1878_v42 = vsel %vm7147_vm10, %v1861_v27, %v1737_v62  ;;  %v730_v11 = vsel %vm7152_vm4, %v721_v56, %v729_v57 }
  0xe4   : > { %v747_v1 = vsel %vm7152_vm4, %v738_v58, %v746_v49 }
  0xe5   : > { %v1735_v13 = vpop.permute.xlu0 %1734 }
  0xe6   : > { %v1876_v19 = vsel %vm7147_vm10, %v1859_v18, %v1735_v13 }
  0xe7   : > { %v1753_v5 = vpop.permute.xlu1 %1752 }
  0xe8   : > { %v1895_v4 = vsel %vm7146_vm11, %v1878_v42, %v1753_v5  ;;  %v777_v42 = vshll.u32 %v5966_v34, 16 }
  0xea   : > { %v1751_v7 = vpop.permute.xlu0 %1750  ;;  %v779_v40 = vrot.slane %v777_v42, 4 }
  0xeb   : > { %v1769_v8 = vpop.permute.xlu1 %1768  ;;  %v1893_v52 = vsel %vm7146_vm11, %v1876_v19, %v1751_v7 }
  0xec   : > { %v1912_v20 = vsel %vm7145_vm12, %v1895_v4, %v1769_v8  ;;  %v641_v4 = vld [vmem:[#allocation2 + $0x60] sm:$0xf8] }
  0xed   : > { %v749_v32 = vshrl.u32 %v641_v4, 16 }
  0xee   : > { %v1767_v14 = vpop.permute.xlu0 %1766 }
  0xef   : > { %v1675_v15 = vpop.permute.xlu1 %1674  ;;  %v1910_v61 = vsel %vm7145_vm12, %v1893_v52, %v1767_v14  ;;  %v751_v43 = vrot.slane %v749_v32, 3 }
  0xf0   : > { %v1809_v3 = vsel %vm7150_vm5, %v730_v11, %v1675_v15 }
  0xf2   : > { %v1783_v22 = vpop.permute.xlu0 %1782 }
  0xf3   : > { %v1677_v60 = vpop.permute.xlu1 %1676  ;;  %v1927_v28 = vsel %vm7144_vm13, %v1910_v61, %v1783_v22  ;;  %v643_v61 = vld [vmem:[#allocation2 + $0x70] sm:$0xf8] }
  0xf4   : > { %5295 = vmatprep.mubr.msk.bf16.mxu0 %vm7143_vm14, %v1927_v28  ;;  %v1812_v5 = vsel %vm7150_vm5, %v747_v1, %v1677_v60  ;;  %v774_v60 = vshrl.u32 %v5966_v34, 16 }
  0xf6   : > { %v1785_v29 = vpop.permute.xlu0 %1784  ;;  %v776_v38 = vrot.slane %v774_v60, 3 }
  0xf7   : > { %v1693_v30 = vpop.permute.xlu1 %1692  ;;  %v1929_v25 = vsel %vm7144_vm13, %v1912_v20, %v1785_v29  ;;  %v766_v20 = vshrl.u32 %v643_v61, 16  ;;  %v769_v29 = vshll.u32 %v643_v61, 16 }
  0xf8   : > { %5296 = vmatmul.mubr.msk.bf16.gmra.mrb[4].mxu0 %vm7143_vm14, %v1929_v25  ;;  %v1831_v8 = vsel %vm1819_vm6, %v1812_v5, %v1693_v30  ;;  %v780_v39 = vor.u32 %v779_v40, %v776_v38 }
  0xf9   : > { %v768_v26 = vrot.slane %v766_v20, 3  ;;  %v771_v37 = vrot.slane %v769_v29, 4 }
  0xfa   : > { %v1691_v31 = vpop.permute.xlu0 %1690 }
  0xfb   : > { %v1709_v35 = vpop.permute.xlu1 %1708  ;;  %v1829_v41 = vsel %vm1819_vm6, %v1809_v3, %v1691_v31  ;;  %v760_v31 = vshll.u32 %v5959_v24, 16  ;;  %v772_v46 = vor.u32 %v771_v37, %v768_v26 }
  0xfc   : > { %v1848_v14 = vsel %vm7149_vm7, %v1831_v8, %v1709_v35  ;;  %v752_v35 = vshll.u32 %v641_v4, 16 }
  0xfd   : > { %v781_v24 = vsel %vm7152_vm4, %v772_v46, %v780_v39  ;;  %v5579_v39 = vmov 1983009808  }
  0xfe   : > { %v1707_v44 = vpop.permute.xlu0 %1706  ;;  %v754_v10 = vrot.slane %v752_v35, 4 }
  0xff   : > { %v1725_v45 = vpop.permute.xlu1 %1724  ;;  %v1846_v6 = vsel %vm7149_vm7, %v1829_v41, %v1707_v44  ;;  %v762_v44 = vrot.slane %v760_v31, 4 }
 0x100   : > { %v1865_v18 = vsel %vm7148_vm8, %v1848_v14, %v1725_v45  ;;  %v755_v48 = vor.u32 %v754_v10, %v751_v43 }
 0x101   : > { %v763_v50 = vor.u32 %v762_v44, %v759_v33 }
 0x102   : > { %v1723_v55 = vpop.permute.xlu0 %1722 }
 0x103   : > { %v1741_v63 = vpop.permute.xlu1 %1740  ;;  %v1863_v9 = vsel %vm7148_vm8, %v1846_v6, %v1723_v55  ;;  %v764_v54 = vsel %vm7152_vm4, %v755_v48, %v763_v50  ;;  %v4502_v48 = vlaneseq }
 0x104   : > { %v1882_v21 = vsel %vm7147_vm10, %v1865_v18, %v1741_v63 }
 0x106   : > { %v1739_v62 = vpop.permute.xlu0 %1738 }
 0x107   : > { %v1757_v0 = vpop.permute.xlu1 %1756  ;;  %v1880_v2 = vsel %vm7147_vm10, %v1863_v9, %v1739_v62 }
 0x108   : > { %v1899_v22 = vsel %vm7146_vm11, %v1882_v21, %v1757_v0 }
 0x10a   : > { %v1755_v59 = vpop.permute.xlu0 %1754 }
 0x10b   : > { %v1773_v13 = vpop.permute.xlu1 %1772  ;;  %v1897_v23 = vsel %vm7146_vm11, %v1880_v2, %v1755_v59 }
 0x10c   : > { %v1916_v27 = vsel %vm7145_vm12, %v1899_v22, %v1773_v13 }
 0x10e   : > { %v1771_v7 = vpop.permute.xlu0 %1770 }
 0x10f   : > { %v1679_v12 = vpop.permute.xlu1 %1678  ;;  %v1914_v15 = vsel %vm7145_vm12, %v1897_v23, %v1771_v7 }
 0x110   : > { %v1815_v56 = vsel %vm7150_vm5, %v764_v54, %v1679_v12 }
 0x112   : > { %v1787_v16 = vpop.permute.xlu0 %1786 }
 0x113   : > { %v1931_v19 = vsel %vm7144_vm13, %v1914_v15, %v1787_v16  ;;  %v1681_v52 = vpop.permute.xlu1 %1680  ;;  %v6146_v15 = vld [vmem:[%s7183_s2] ss:$0 sm:$0xff]  ;;  %v6148_v16 = vstv %s5186_s23  ;;  %s7188_s23 = smov 4  }
 0x114   : > { %5299 = vmatprep.mubr.msk.bf16.mxu0 %vm7143_vm14, %v1931_v19  ;;  %v1818_v55 = vsel %vm7150_vm5, %v781_v24, %v1681_v52  ;;  %v6153_v19 = vld [vmem:[%s7184_s3] ss:$0 sm:$0xff]  ;;  %v2156_v61 = vadd.s32 1, %v6148_v16  ;;  %v2158_v24 = vadd.s32 3, %v6148_v16  ;;  %s5169_s3 = sshll.u32 %s5768_s14, 5 }
 0x116   : > { %v1789_v28 = vpop.permute.xlu0 %1788  ;;  %vm2164_vm15 = vcmp.ge.s32.totalorder %v2156_v61, 0 }
 0x117   : > { %v1933_v30 = vsel %vm7144_vm13, %v1916_v27, %v1789_v28  ;;  %v1697_v25 = vpop.permute.xlu1 %1696 }
 0x118   : > { %5300 = vmatmul.mubr.msk.bf16.gmra.mrb[8].mxu0 %vm7143_vm14, %v1933_v30  ;;  %v1835_v57 = vsel %vm1819_vm6, %v1818_v55, %v1697_v25 }
 0x11a   : > { %v1695_v36 = vpop.permute.xlu0 %1694 }
 0x11b   : > { %v1713_v34 = vpop.permute.xlu1 %1712  ;;  %v1833_v49 = vsel %vm1819_vm6, %v1815_v56, %v1695_v36 }
 0x11c   : > { %v1852_v62 = vsel %vm7149_vm7, %v1835_v57, %v1713_v34  ;;  %v2157_v57 = vadd.s32 2, %v6148_v16 }
 0x11e   : > { %v1711_v45 = vpop.permute.xlu0 %1710 }
 0x11f   : > { %v1729_v47 = vpop.permute.xlu1 %1728  ;;  %v1850_v0 = vsel %vm7149_vm7, %v1833_v49, %v1711_v45 }
 0x120   : > { %v1869_v1 = vsel %vm7148_vm8, %v1852_v62, %v1729_v47  ;;  %v4500_v47 = vunpack.c.l.s4 %v5579_v39  ;;  %v4503_v62 = vshrl.u32 %v4502_v48, 7 }
 0x122   : > { %v1727_v51 = vpop.permute.xlu0 %1726  ;;  %v4501_v49 = vunpack.c.0.s8 %v4500_v47 }
 0x123   : > { %v1745_v53 = vpop.permute.xlu1 %1744  ;;  %v1867_v13 = vsel %vm7148_vm8, %v1850_v0, %v1727_v51  ;;  %vm7155_vm8 = vcmask 1047559  }
 0x124   : > { %v1886_v5 = vsel %vm7147_vm10, %v1869_v1, %v1745_v53 }
 0x126   : > { %v1743_v63 = vpop.permute.xlu0 %1742 }
 0x127   : > { %v1884_v41 = vsel %vm7147_vm10, %v1867_v13, %v1743_v63 }
 0x129   : > { %v1761_v58 = vpop.permute.xlu1 %1760 }
 0x12a   : > { %v1903_v6 = vsel %vm7146_vm11, %v1886_v5, %v1761_v58 }
 0x12c   : > { %v1759_v11 = vpop.permute.xlu0 %1758 }
 0x12d   : > { %v1777_v3 = vpop.permute.xlu1 %1776  ;;  %v1901_v7 = vsel %vm7146_vm11, %v1884_v41, %v1759_v11 }
 0x12e   : > { %v1920_v8 = vsel %vm7145_vm12, %v1903_v6, %v1777_v3  ;;  %v6178_v6 = vsub.s32 %v4501_v49, %v4503_v62 }
 0x130   : > { %v1775_v59 = vpop.permute.xlu0 %1774 }
 0x131   : > { %v1918_v12 = vsel %vm7145_vm12, %v1901_v7, %v1775_v59  ;;  %vm2171_vm12 = vcmp.lt.s32.totalorder %v6148_v16, 16 }
 0x134   : > { %v1793_v9 = vpop.permute.xlu1 %1792 }
 0x135   : > { %v1937_v2 = vsel %vm7144_vm13, %v1920_v8, %v1793_v9  ;;  %v1791_v23 = vpop.permute.xlu0 %1790 }
 0x136   : > { %v1935_v14 = vsel %vm7144_vm13, %v1918_v12, %v1791_v23  ;;  %vm2163_vm13 = vcmp.ge.s32.totalorder %v6148_v16, 0 }
 0x137   : > { %5303 = vmatprep.mubr.msk.bf16.mxu0 %vm7143_vm14, %v1935_v14  ;;  %vm2179_vm10 = vmand %vm2163_vm13, %vm2171_vm12  ;;  %vm2165_vm12 = vcmp.ge.s32.totalorder %v2157_v57, 0  ;;  %vm2173_vm13 = vcmp.lt.s32.totalorder %v2157_v57, 16 }
 0x138   : > { %5304 = vmatmul.mubr.msk.bf16.gmra.mrb[12].mxu0 %vm7143_vm14, %v1937_v2  ;;  %vm2172_vm14 = vcmp.lt.s32.totalorder %v2156_v61, 16 }
 0x139   : > { %vm2180_vm11 = vmand %vm2164_vm15, %vm2172_vm14 }
 0x13a   : > { %vm6180_vm15 = vmand %vm2165_vm12, %vm2173_vm13  ;;  %vm4730_vm12 = vcmask 1043459   ;;  %vm4732_vm13 = vcmask 1044484  }
 0x1a8   : > { %v5293_v18 = vpop.f32.mrb[0].mxu0 }
 0x1a9   : > { %v2085_v52 = vmul.f32 %v5293_v18, %v6146_v15  ;;  %v2013_v21 = vpop.f32.mrb[1].mxu0 }
 0x1aa   : > { %v2083_v22 = vmul.f32 %v6146_v15, %v2013_v21  ;;  %v5294_v60 = vpop.f32.mrb[2].mxu0 }
 0x1ab   : > { %v2108_v27 = vadd.f32 %v6153_v19, %v2085_v52  ;;  %v2086_v28 = vmul.f32 %v5294_v60, %v6146_v15  ;;  %v2016_v42 = vpop.f32.mrb[3].mxu0 }
 0x1ac   : > { %v2106_v4 = vadd.f32 %v6153_v19, %v2083_v22  ;;  %v2084_v20 = vmul.f32 %v6146_v15, %v2016_v42  ;;  %v6185_v22 = vsub.s32 0, %v4503_v62 }
 0x1ad   : > { %v2124_v29 = vmul.f32 0.1, %v2108_v27  ;;  %v2109_v30 = vadd.f32 %v6153_v19, %v2086_v28 }
 0x1ae   : > { %v2122_v25 = vmul.f32 0.1, %v2106_v4  ;;  %v2107_v17 = vadd.f32 %v6153_v19, %v2084_v20 }
 0x1af   : > { %v2140_v31 = vmax.f32 %v2108_v27, %v2124_v29  ;;  %v2125_v32 = vmul.f32 0.1, %v2109_v30 }
 0x1b0   : > { %v2138_v35 = vmax.f32 %v2106_v4, %v2122_v25  ;;  %v2123_v36 = vmul.f32 0.1, %v2107_v17 }
 0x1b1   : > { %v2141_v26 = vmax.f32 %v2109_v30, %v2125_v32  ;;  %v2205_v38 = vsel %vm2180_vm11, %v2140_v31, 0.0 }
 0x1b2   : > { %v2139_v37 = vmax.f32 %v2107_v17, %v2123_v36  ;;  %v2203_v43 = vsel %vm2179_vm10, %v2138_v35, 0.0 }
 0x1b3   : > { %v2206_v40 = vsel %vm2180_vm11, %v2141_v26, 0.0  ;;  %vm2174_vm11 = vcmp.lt.s32.totalorder %v2158_v24, 16 }
 0x1b4   : > { %v2220_v34 = vpack.c.bf16 %v2206_v40, %v2205_v38  ;;  %v2204_v10 = vsel %vm2179_vm10, %v2139_v37, 0.0  ;;  %vm2166_vm10 = vcmp.ge.s32.totalorder %v2158_v24, 0 }
 0x1b5   : > { %v2219_v33 = vpack.c.bf16 %v2204_v10, %v2203_v43  ;;  %vm2182_vm14 = vmand %vm2166_vm10, %vm2174_vm11  ;;  %vm4726_vm10 = vcmask 1041409   ;;  %vm4728_vm11 = vcmask 1042434  }
 0x1b6   : > { %v2236_v44 = vrot.slane %v2220_v34, 4 }
 0x1b7   : > { %v2235_v45 = vrot.slane %v2219_v33, 4 }
 0x1b8   : > { %2245 = vrot.lane.b32.xlu1 %v2236_v44, %s5578_s1 }
 0x1b9   : > { %2243 = vrot.lane.b32.xlu0 %v2235_v45, %s5578_s1 }
 0x1cb   : > { %v5297_v46 = vpop.f32.mrb[4].mxu0 }
 0x1cc   : > { %v2089_v50 = vmul.f32 %v5297_v46, %v6146_v15  ;;  %v2029_v51 = vpop.f32.mrb[5].mxu0 }
 0x1cd   : > { %v2087_v53 = vmul.f32 %v6146_v15, %v2029_v51  ;;  %v5298_v54 = vpop.f32.mrb[6].mxu0 }
 0x1ce   : > { %v2112_v55 = vadd.f32 %v6153_v19, %v2089_v50  ;;  %v2090_v63 = vmul.f32 %v5298_v54, %v6146_v15  ;;  %v2032_v56 = vpop.f32.mrb[7].mxu0 }
 0x1cf   : > { %v2110_v58 = vadd.f32 %v6153_v19, %v2087_v53  ;;  %v2088_v11 = vmul.f32 %v6146_v15, %v2032_v56 }
 0x1d0   : > { %v2128_v0 = vmul.f32 0.1, %v2112_v55  ;;  %v2113_v1 = vadd.f32 %v6153_v19, %v2090_v63 }
 0x1d1   : > { %v2126_v3 = vmul.f32 0.1, %v2110_v58  ;;  %v2111_v59 = vadd.f32 %v6153_v19, %v2088_v11 }
 0x1d2   : > { %v2144_v13 = vmax.f32 %v2112_v55, %v2128_v0  ;;  %v2129_v5 = vmul.f32 0.1, %v2113_v1 }
 0x1d3   : > { %v2142_v41 = vmax.f32 %v2110_v58, %v2126_v3  ;;  %v2127_v7 = vmul.f32 0.1, %v2111_v59 }
 0x1d4   : > { %v2145_v8 = vmax.f32 %v2113_v1, %v2129_v5  ;;  %v2209_v23 = vsel %vm2182_vm14, %v2144_v13, 0.0 }
 0x1d5   : > { %v4490_v9 = vmax.f32 %v2142_v41, %v2144_v13  ;;  %v2143_v12 = vmax.f32 %v2111_v59, %v2127_v7  ;;  %v2207_v60 = vsel %vm6180_vm15, %v2142_v41, 0.0  ;;  %v2160_v41 = vadd.s32 5, %v6148_v16 }
 0x1d6   : > { %v2210_v14 = vsel %vm2182_vm14, %v2145_v8, 0.0  ;;  %vm7157_vm14 = vcmask 1045509  }
 0x1d7   : > { %v4498_v18 = vcombine.high %v4490_v9, %v4490_v9  ;;  %v4505_v52 = vrot.slane %v4490_v9, %v6178_v6  ;;  %v4491_v21 = vmax.f32 %v2143_v12, %v2145_v8  ;;  %v2222_v61 = vpack.c.bf16 %v2210_v14, %v2209_v23 }
 0x1d8   : > { %v2208_v27 = vsel %vm6180_vm15, %v2143_v12, 0.0  ;;  %vm7156_vm15 = vcmask 1046534   ;;  %v2159_v23 = vadd.s32 4, %v6148_v16  ;;  %vm2168_vm7 = vcmp.ge.s32.totalorder %v2160_v41, 0 }
 0x1d9   : > { %v4512_v28 = vrot.slane %v4498_v18, %v6178_v6  ;;  %v4513_v42 = vcombine.high %v4505_v52, %v4505_v52  ;;  %v5214_v4 = vrot.slane %v4505_v52, 9  ;;  %v4515_v20 = vcombine.high %v4491_v21, %v4491_v21 }
 0x1da   : > { %v4522_v29 = vrot.slane %v4491_v21, %v6178_v6  ;;  %v2238_v30 = vrot.slane %v2222_v61, 4  ;;  %v2221_v25 = vpack.c.bf16 %v2208_v27, %v2207_v60  ;;  %vm2176_vm5 = vcmp.lt.s32.totalorder %v2160_v41, 16 }
 0x1db   : > { %v4514_v17 = vcombine.high %v4512_v28, %v4512_v28  ;;  %v5215_v31 = vrot.slane %v4513_v42, 9  ;;  %v5216_v32 = vrot.slane %v4512_v28, 9  ;;  %v4630_v35 = vmax.f32 %v4505_v52, %v5214_v4  ;;  %vm2184_vm3 = vmand %vm2168_vm7, %vm2176_vm5 }
 0x1dc   : > { %v4529_v36 = vrot.slane %v4515_v20, %v6178_v6  ;;  %v4530_v26 = vcombine.high %v4522_v29, %v4522_v29  ;;  %v5218_v37 = vrot.slane %v4522_v29, 9  ;;  %2249 = vrot.lane.b32.xlu1 %v2238_v30, %s5578_s1  ;;  %v2237_v38 = vrot.slane %v2221_v25, 4 }
 0x1dd   : > { %v5217_v40 = vrot.slane %v4514_v17, 9  ;;  %v4631_v34 = vmax.f32 %v4513_v42, %v5215_v31  ;;  %v4632_v43 = vmax.f32 %v4512_v28, %v5216_v32  ;;  %v4665_v39 = vrot.slane %v4630_v35, %v6185_v22 }
 0x1de   : > { %v4531_v10 = vcombine.high %v4529_v36, %v4529_v36  ;;  %v5219_v33 = vrot.slane %v4530_v26, 9  ;;  %v5220_v44 = vrot.slane %v4529_v36, 9  ;;  %v4634_v45 = vmax.f32 %v4522_v29, %v5218_v37  ;;  %2247 = vrot.lane.b32.xlu0 %v2237_v38, %s5578_s1 }
 0x1df   : > { %v4633_v46 = vmax.f32 %v4514_v17, %v5217_v40  ;;  %v4669_v47 = vrot.slane %v4631_v34, %v6185_v22  ;;  %v4673_v48 = vrot.slane %v4632_v43, %v6185_v22  ;;  %vm2167_vm9 = vcmp.ge.s32.totalorder %v2159_v23, 0 }
 0x1e0   : > { %v5221_v50 = vrot.slane %v4531_v10, 9  ;;  %v4635_v51 = vmax.f32 %v4530_v26, %v5219_v33  ;;  %v4636_v24 = vmax.f32 %v4529_v36, %v5220_v44  ;;  %v4681_v55 = vrot.slane %v4634_v45, %v6185_v22 }
 0x1e1   : > { %v4677_v53 = vrot.slane %v4633_v46, %v6185_v22  ;;  %v4727_v54 = vsel %vm4726_vm10, %v4669_v47, %v4665_v39  ;;  %vm2175_vm4 = vcmp.lt.s32.totalorder %v2159_v23, 16 }
 0x1e2   : > { %v4637_v63 = vmax.f32 %v4531_v10, %v5221_v50  ;;  %v4729_v56 = vsel %vm4728_vm11, %v4673_v48, %v4727_v54  ;;  %v4685_v57 = vrot.slane %v4635_v51, %v6185_v22  ;;  %v4689_v49 = vrot.slane %v4636_v24, %v6185_v22  ;;  %vm2183_vm2 = vmand %vm2167_vm9, %vm2175_vm4 }
 0x1e3   : > { %v4731_v58 = vsel %vm4730_vm12, %v4677_v53, %v4729_v56 }
 0x1e4   : > { %v4733_v62 = vsel %vm4732_vm13, %v4681_v55, %v4731_v58  ;;  %v4693_v11 = vrot.slane %v4637_v63, %v6185_v22 }
 0x1e5   : > { %v4735_v0 = vsel %vm7157_vm14, %v4685_v57, %v4733_v62 }
 0x1e6   : > { %v4737_v1 = vsel %vm7156_vm15, %v4689_v49, %v4735_v0 }
 0x1e7   : > { %v4739_v3 = vsel %vm7155_vm8, %v4693_v11, %v4737_v1 }
 0x1e8   : > { %4749 = vst.msk [vmem:[%s6214_s27] sm:$0xff] %vm1819_vm6, %v4739_v3 }
 0x1eb   : > { %v5301_v59 = vpop.f32.mrb[8].mxu0 }
 0x1ec   : > { %v2093_v13 = vmul.f32 %v5301_v59, %v6146_v15  ;;  %v2045_v5 = vpop.f32.mrb[9].mxu0 }
 0x1ed   : > { %v2091_v7 = vmul.f32 %v6146_v15, %v2045_v5  ;;  %v5302_v8 = vpop.f32.mrb[10].mxu0 }
 0x1ee   : > { %v2116_v9 = vadd.f32 %v6153_v19, %v2093_v13  ;;  %v2094_v12 = vmul.f32 %v5302_v8, %v6146_v15  ;;  %v2048_v2 = vpop.f32.mrb[11].mxu0 }
 0x1ef   : > { %v2114_v14 = vadd.f32 %v6153_v19, %v2091_v7  ;;  %v2092_v18 = vmul.f32 %v6146_v15, %v2048_v2 }
 0x1f0   : > { %v2132_v52 = vmul.f32 0.1, %v2116_v9  ;;  %v2117_v21 = vadd.f32 %v6153_v19, %v2094_v12 }
 0x1f1   : > { %v2130_v61 = vmul.f32 0.1, %v2114_v14  ;;  %v2115_v60 = vadd.f32 %v6153_v19, %v2092_v18 }
 0x1f2   : > { %v2148_v27 = vmax.f32 %v2116_v9, %v2132_v52  ;;  %v2133_v28 = vmul.f32 0.1, %v2117_v21 }
 0x1f3   : > { %v2146_v42 = vmax.f32 %v2114_v14, %v2130_v61  ;;  %v2131_v4 = vmul.f32 0.1, %v2115_v60 }
 0x1f4   : > { %v2149_v20 = vmax.f32 %v2117_v21, %v2133_v28  ;;  %v2213_v25 = vsel %vm2184_vm3, %v2148_v27, 0.0  ;;  %v2162_v28 = vadd.s32 7, %v6148_v16 }
 0x1f5   : > { %v4492_v29 = vmax.f32 %v2146_v42, %v2148_v27  ;;  %v2147_v30 = vmax.f32 %v2115_v60, %v2131_v4  ;;  %v2211_v26 = vsel %vm2183_vm2, %v2146_v42, 0.0 }
 0x1f6   : > { %v2214_v17 = vsel %vm2184_vm3, %v2149_v20, 0.0  ;;  %vm2178_vm3 = vcmp.lt.s32.totalorder %v2162_v28, 16 }
 0x1f7   : > { %v4532_v31 = vcombine.high %v4492_v29, %v4492_v29  ;;  %v4539_v32 = vrot.slane %v4492_v29, %v6178_v6  ;;  %v4493_v35 = vmax.f32 %v2147_v30, %v2149_v20  ;;  %v2224_v36 = vpack.c.bf16 %v2214_v17, %v2213_v25 }
 0x1f8   : > { %v2212_v37 = vsel %vm2183_vm2, %v2147_v30, 0.0  ;;  %v2161_v20 = vadd.s32 6, %v6148_v16  ;;  %vm2170_vm2 = vcmp.ge.s32.totalorder %v2162_v28, 0 }
 0x1f9   : > { %v4546_v38 = vrot.slane %v4532_v31, %v6178_v6  ;;  %v4547_v40 = vcombine.high %v4539_v32, %v4539_v32  ;;  %v5222_v34 = vrot.slane %v4539_v32, 9  ;;  %v4549_v43 = vcombine.high %v4493_v35, %v4493_v35  ;;  %vm2186_vm7 = vmand %vm2170_vm2, %vm2178_vm3 }
 0x1fa   : > { %v4556_v10 = vrot.slane %v4493_v35, %v6178_v6  ;;  %v2240_v33 = vrot.slane %v2224_v36, 4  ;;  %v2223_v44 = vpack.c.bf16 %v2212_v37, %v2211_v26  ;;  %vm2169_vm4 = vcmp.ge.s32.totalorder %v2161_v20, 0 }
 0x1fb   : > { %v4548_v45 = vcombine.high %v4546_v38, %v4546_v38  ;;  %v5223_v46 = vrot.slane %v4547_v40, 9  ;;  %v5224_v39 = vrot.slane %v4546_v38, 9  ;;  %v4638_v47 = vmax.f32 %v4539_v32, %v5222_v34 }
 0x1fc   : > { %v4563_v48 = vrot.slane %v4549_v43, %v6178_v6  ;;  %v4564_v50 = vcombine.high %v4556_v10, %v4556_v10  ;;  %v5226_v51 = vrot.slane %v4556_v10, 9  ;;  %2253 = vrot.lane.b32.xlu1 %v2240_v33, %s5578_s1  ;;  %v2239_v24 = vrot.slane %v2223_v44, 4 }
 0x1fd   : > { %v5225_v53 = vrot.slane %v4548_v45, 9  ;;  %v4639_v54 = vmax.f32 %v4547_v40, %v5223_v46  ;;  %v4640_v55 = vmax.f32 %v4546_v38, %v5224_v39  ;;  %v4697_v62 = vrot.slane %v4638_v47, %v6185_v22 }
 0x1fe   : > { %v4565_v63 = vcombine.high %v4563_v48, %v4563_v48  ;;  %v5227_v56 = vrot.slane %v4564_v50, 9  ;;  %v5228_v57 = vrot.slane %v4563_v48, 9  ;;  %v4642_v58 = vmax.f32 %v4556_v10, %v5226_v51  ;;  %2251 = vrot.lane.b32.xlu0 %v2239_v24, %s5578_s1 }
 0x1ff   : > { %v4641_v49 = vmax.f32 %v4548_v45, %v5225_v53  ;;  %v4701_v11 = vrot.slane %v4639_v54, %v6185_v22  ;;  %v4705_v0 = vrot.slane %v4640_v55, %v6185_v22  ;;  %vm2177_vm5 = vcmp.lt.s32.totalorder %v2161_v20, 16 }
 0x200   : > { %v5229_v1 = vrot.slane %v4565_v63, 9  ;;  %v4643_v3 = vmax.f32 %v4564_v50, %v5227_v56  ;;  %v4644_v59 = vmax.f32 %v4563_v48, %v5228_v57  ;;  %v4713_v41 = vrot.slane %v4642_v58, %v6185_v22  ;;  %vm2185_vm9 = vmand %vm2169_vm4, %vm2177_vm5 }
 0x201   : > { %v4709_v13 = vrot.slane %v4641_v49, %v6185_v22  ;;  %v4740_v5 = vsel %vm4726_vm10, %v4701_v11, %v4697_v62  ;;  %vm7187_vm2 = vcmask 1043456   ;;  %vm7191_vm5 = vsmask.f32 3328 }
 0x202   : > { %v4645_v7 = vmax.f32 %v4565_v63, %v5229_v1  ;;  %v4741_v8 = vsel %vm4728_vm11, %v4705_v0, %v4740_v5  ;;  %v4717_v9 = vrot.slane %v4643_v3, %v6185_v22  ;;  %v4721_v2 = vrot.slane %v4644_v59, %v6185_v22  ;;  %vm7189_vm3 = vmmov %vm7187_vm2 }
 0x203   : > { %v4742_v12 = vsel %vm4730_vm12, %v4709_v13, %v4741_v8  ;;  %vm7190_vm4 = vmmov %vm7187_vm2 }
 0x204   : > { %v4743_v23 = vsel %vm4732_vm13, %v4713_v41, %v4742_v12  ;;  %v4725_v14 = vrot.slane %v4645_v7, %v6185_v22 }
 0x205   : > { %v4744_v18 = vsel %vm7157_vm14, %v4717_v9, %v4743_v23  ;;  %vm7264_vm14 = vcmask 195584  }
 0x206   : > { %v4745_v52 = vsel %vm7156_vm15, %v4721_v2, %v4744_v18  ;;  %vm7243_vm15 = vcmask 261120  }
 0x207   : > { %v4746_v21 = vsel %vm7155_vm8, %v4725_v14, %v4745_v52  ;;  %vm7242_vm8 = vcmask 228352  }
 0x208   : > { %4750 = vst.msk [vmem:[%s6214_s27 + $0x8] sm:$0xff] %vm1819_vm6, %v4746_v21 }
 0x20b   : > { %v5305_v61 = vpop.f32.mrb[12].mxu0 }
 0x20c   : > { %v2097_v60 = vmul.f32 %v5305_v61, %v6146_v15  ;;  %v2061_v27 = vpop.f32.mrb[13].mxu0 }
 0x20d   : > { %v2095_v42 = vmul.f32 %v6146_v15, %v2061_v27  ;;  %v5306_v4 = vpop.f32.mrb[14].mxu0 }
 0x20e   : > { %v2120_v29 = vadd.f32 %v6153_v19, %v2097_v60  ;;  %v2098_v30 = vmul.f32 %v5306_v4, %v6146_v15  ;;  %v2064_v25 = vpop.f32.mrb[15].mxu0 }
 0x20f   : > { %v2118_v17 = vadd.f32 %v6153_v19, %v2095_v42  ;;  %v2096_v31 = vmul.f32 %v6146_v15, %v2064_v25 }
 0x210   : > { %v2136_v32 = vmul.f32 0.1, %v2120_v29  ;;  %v2121_v35 = vadd.f32 %v6153_v19, %v2098_v30 }
 0x211   : > { %v2134_v36 = vmul.f32 0.1, %v2118_v17  ;;  %v2119_v26 = vadd.f32 %v6153_v19, %v2096_v31 }
 0x212   : > { %v2152_v16 = vmax.f32 %v2120_v29, %v2136_v32  ;;  %v2137_v37 = vmul.f32 0.1, %v2121_v35 }
 0x213   : > { %v2150_v38 = vmax.f32 %v2118_v17, %v2134_v36  ;;  %v2135_v40 = vmul.f32 0.1, %v2119_v26 }
 0x214   : > { %v2153_v34 = vmax.f32 %v2121_v35, %v2137_v37  ;;  %v2217_v10 = vsel %vm2186_vm7, %v2152_v16, 0.0 }
 0x215   : > { %v2151_v43 = vmax.f32 %v2119_v26, %v2135_v40  ;;  %v2215_v44 = vsel %vm2185_vm9, %v2150_v38, 0.0 }
 0x216   : > { %v2218_v15 = vsel %vm2186_vm7, %v2153_v34, 0.0  ;;  %vm7192_vm7 = vsmask.f32 4352 }
 0x217   : > { %v2226_v33 = vpack.c.bf16 %v2218_v15, %v2217_v10  ;;  %v2216_v45 = vsel %vm2185_vm9, %v2151_v43, 0.0  ;;  %vm7193_vm9 = vmmov %vm7191_vm5 }
 0x218   : > { %v2225_v46 = vpack.c.bf16 %v2216_v45, %v2215_v44 }
 0x219   : > { %v2242_v39 = vrot.slane %v2226_v33, 4 }
 0x21a   : > { %v2241_v47 = vrot.slane %v2225_v46, 4 }
 0x21b   : > { %2257 = vrot.lane.b32.xlu1 %v2242_v39, %s5578_s1 }
 0x21c   : > { %2255 = vrot.lane.b32.xlu0 %v2241_v47, %s5578_s1  ;;  %s5198_s1 = sadd.s32 4294967295, %s6140_s18  ;;  %s7383_s18 = smov (!%p498_p13, %s6140_s18), 15 }
 0x22a   : > { %v2246_v19 = vpop.permute.xlu1 %2245 }
 0x22b   : > { %2269 = vst.msk [vmem:[#allocation3 + $0x10] sm:$0xf0] %vm520_vm1, %v2246_v19  ;;  %v2244_v48 = vpop.permute.xlu0 %2243 }
 0x22c   : > { %2270 = vst.msk [vmem:[#allocation3 + $0x18] sm:$0xf] %vm509_vm0, %v2246_v19  ;;  %2268 = vst.msk [vmem:[#allocation3 + $0x8] sm:$0xf] %vm509_vm0, %v2244_v48 }
 0x22d   : > { %2267 = vst.msk [vmem:[#allocation3] sm:$0xf0] %vm520_vm1, %v2244_v48 }
 0x232   : > { %v2398_v51 = vld [vmem:[#allocation3 + $0x10] sm:$0xf0] }
 0x233   : > { %v2286_v50 = vld [vmem:[#allocation3 + $0x18] sm:$0xf]  ;;  %v2418_v53 = vrot.slane %v2398_v51, 4  ;;  %v2656_v55 = vld [vmem:[#allocation3 + $0x10] sm:$0xf0]  ;;  %v2457_v56 = vshrl.u32 %v2398_v51, 16 }
 0x234   : > { %v2543_v24 = vld [vmem:[#allocation3 + $0x18] sm:$0xf]  ;;  %v2419_v54 = vrot.slane %v2286_v50, 4  ;;  %v2674_v57 = vrot.slane %v2656_v55, 4  ;;  %v2460_v49 = vshll.u32 %v2398_v51, 16  ;;  %v2699_v42 = vshrl.u32 %v2656_v55, 16 }
 0x235   : > { %v2675_v63 = vrot.slane %v2543_v24, 4  ;;  %v2434_v58 = vld [vmem:[#allocation3 + $0x18] sm:$0x1f]  ;;  %v2284_v62 = vld [vmem:[#allocation3 + $0x8] sm:$0xf]  ;;  %v2459_v0 = vrot.slane %v2457_v56, 4 }
 0x236   : > { %v2420_v11 = vsel %vm7187_vm2, %v2418_v53, %v2419_v54  ;;  %v2465_v1 = vshrl.u32 %v2434_v58, 16  ;;  %v2468_v3 = vshll.u32 %v2434_v58, 16  ;;  %v2397_v59 = vld [vmem:[#allocation3] sm:$0xf0]  ;;  %v2462_v5 = vrot.slane %v2460_v49, 5  ;;  %vm7194_vm2 = vmmov %vm7191_vm5 }
 0x237   : > { %3061 = vrot.lane.b32.xlu1 %v2420_v11, %s7188_s23  ;;  %v2676_v13 = vsel %vm7189_vm3, %v2674_v57, %v2675_v63  ;;  %v2415_v41 = vrot.slane %v2397_v59, 4  ;;  %v2416_v7 = vrot.slane %v2284_v62, 4  ;;  %v2542_v8 = vld [vmem:[#allocation3 + $0x10] sm:$0xf8]  ;;  %v2692_v14 = vld [vmem:[#allocation3 + $0x18] sm:$0x1f] }
 0x238   : > { %3095 = vrot.lane.b32.xlu0 %v2676_v13, %s7179_s25  ;;  %v2467_v9 = vrot.slane %v2465_v1, 4  ;;  %v2470_v12 = vrot.slane %v2468_v3, 5  ;;  %v2555_v2 = vshrl.u32 %v2542_v8, 16  ;;  %v2558_v23 = vshll.u32 %v2542_v8, 16  ;;  %v2433_v25 = vld [vmem:[#allocation3 + $0x8] sm:$0x1f] }
 0x239   : > { %v2463_v18 = vor.u32 %v2462_v5, %v2459_v0  ;;  %v2417_v52 = vsel %vm7190_vm4, %v2415_v41, %v2416_v7  ;;  %v2563_v21 = vshrl.u32 %v2543_v24, 16  ;;  %v2566_v61 = vshll.u32 %v2543_v24, 16  ;;  %vm7195_vm4 = vmmov %vm7189_vm3 }
 0x23a   : > { %v2471_v60 = vor.u32 %v2470_v12, %v2467_v9  ;;  %v2557_v27 = vrot.slane %v2555_v2, 3  ;;  %v2560_v28 = vrot.slane %v2558_v23, 4  ;;  %v2702_v29 = vshll.u32 %v2656_v55, 16 }
 0x23b   : > { %v2565_v4 = vrot.slane %v2563_v21, 3  ;;  %v2568_v20 = vrot.slane %v2566_v61, 4  ;;  %v2707_v30 = vshrl.u32 %v2692_v14, 16  ;;  %v2701_v32 = vrot.slane %v2699_v42, 4 }
 0x23c   : > { %v2472_v17 = vsel %vm7191_vm5, %v2463_v18, %v2471_v60  ;;  %3059 = vrot.lane.b32.xlu0 %v2417_v52, %s7188_s23  ;;  %v2561_v31 = vor.u32 %v2560_v28, %v2557_v27  ;;  %v2710_v35 = vshll.u32 %v2692_v14, 16  ;;  %v2704_v26 = vrot.slane %v2702_v29, 5  ;;  %vm7196_vm5 = vmmov %vm7189_vm3 }
 0x23d   : > { %3073 = vrot.lane.b32.xlu1 %v2472_v17, %s7181_s24  ;;  %v2569_v36 = vor.u32 %v2568_v20, %v2565_v4  ;;  %v2709_v16 = vrot.slane %v2707_v30, 4  ;;  %v2440_v37 = vshrl.u32 %v2397_v59, 16  ;;  %v2443_v40 = vshll.u32 %v2397_v59, 16 }
 0x23e   : > { %v2712_v38 = vrot.slane %v2710_v35, 5  ;;  %v2448_v34 = vshrl.u32 %v2433_v25, 16  ;;  %v2451_v43 = vshll.u32 %v2433_v25, 16  ;;  %v2705_v15 = vor.u32 %v2704_v26, %v2701_v32 }
 0x23f   : > { %v2570_v10 = vsel %vm7192_vm7, %v2561_v31, %v2569_v36  ;;  %v2442_v33 = vrot.slane %v2440_v37, 4  ;;  %v2445_v45 = vrot.slane %v2443_v40, 5  ;;  %vm7197_vm7 = vmmov %vm7189_vm3 }
 0x240   : > { %3083 = vrot.lane.b32.xlu0 %v2570_v10, %s7178_s22  ;;  %v2713_v44 = vor.u32 %v2712_v38, %v2709_v16  ;;  %v2450_v46 = vrot.slane %v2448_v34, 4  ;;  %v2453_v39 = vrot.slane %v2451_v43, 5 }
 0x241   : > { %v2446_v19 = vor.u32 %v2445_v45, %v2442_v33 }
 0x242   : > { %v2714_v47 = vsel %vm7193_vm9, %v2705_v15, %v2713_v44  ;;  %v2454_v48 = vor.u32 %v2453_v39, %v2450_v46  ;;  %vm7198_vm9 = vmmov %vm7189_vm3 }
 0x244   : > { %3107 = vrot.lane.b32.xlu0 %v2714_v47, %s7176_s28  ;;  %v2455_v50 = vsel %vm7194_vm2, %v2446_v19, %v2454_v48  ;;  %vm7199_vm2 = vmmov %vm7189_vm3 }
 0x248   : > { %3071 = vrot.lane.b32.xlu0 %v2455_v50, %s7181_s24 }
 0x24e   : > { %v2250_v51 = vpop.permute.xlu1 %2249 }
 0x24f   : > { %2273 = vst.msk [vmem:[#allocation3 + $0x30] sm:$0xf0] %vm520_vm1, %v2250_v51 }
 0x250   : > { %2274 = vst.msk [vmem:[#allocation3 + $0x38] sm:$0xf] %vm509_vm0, %v2250_v51  ;;  %v2248_v24 = vpop.permute.xlu0 %2247 }
 0x251   : > { %2271 = vst.msk [vmem:[#allocation3 + $0x20] sm:$0xf0] %vm520_vm1, %v2248_v24 }
 0x252   : > { %2272 = vst.msk [vmem:[#allocation3 + $0x28] sm:$0xf] %vm509_vm0, %v2248_v24 }
 0x256   : > { %v2916_v54 = vld [vmem:[#allocation3 + $0x30] sm:$0xf0] }
 0x257   : > { %v6285_v53 = vld [vmem:[#allocation3 + $0x38] sm:$0xf]  ;;  %v2936_v63 = vrot.slane %v2916_v54, 4  ;;  %v6288_v57 = vld [vmem:[#allocation3 + $0x30] sm:$0xf0]  ;;  %v2975_v49 = vshrl.u32 %v2916_v54, 16 }
 0x258   : > { %v2547_v55 = vld [vmem:[#allocation3 + $0x38] sm:$0xf]  ;;  %v2937_v56 = vrot.slane %v6285_v53, 4  ;;  %v2680_v62 = vrot.slane %v6288_v57, 4  ;;  %v6291_v0 = vld [vmem:[#allocation3 + $0x30] sm:$0xf0] }
 0x259   : > { %v2681_v58 = vrot.slane %v2547_v55, 4  ;;  %v2290_v11 = vld [vmem:[#allocation3 + $0x38] sm:$0xf]  ;;  %v2978_v1 = vshll.u32 %v2916_v54, 16  ;;  %v2424_v59 = vrot.slane %v6291_v0, 4  ;;  %v2977_v52 = vrot.slane %v2975_v49, 4 }
 0x25a   : > { %v2938_v3 = vsel %vm7189_vm3, %v2936_v63, %v2937_v56  ;;  %v2425_v13 = vrot.slane %v2290_v11, 4  ;;  %v6295_v5 = vld [vmem:[#allocation3 + $0x28] sm:$0xf]  ;;  %v6297_v41 = vld [vmem:[#allocation3 + $0x20] sm:$0xf0]  ;;  %v2597_v25 = vshrl.u32 %v2547_v55, 16 }
 0x25b   : > { %3133 = vrot.lane.b32.xlu1 %v2938_v3, %s7177_s19  ;;  %v2682_v7 = vsel %vm7195_vm4, %v2680_v62, %v2681_v58  ;;  %v2933_v8 = vrot.slane %v6297_v41, 4  ;;  %v2934_v9 = vrot.slane %v6295_v5, 4  ;;  %v6303_v12 = vld [vmem:[#allocation3 + $0x28] sm:$0xf]  ;;  %v6305_v2 = vld [vmem:[#allocation3 + $0x20] sm:$0xf0] }
 0x25c   : > { %3099 = vrot.lane.b32.xlu0 %v2682_v7, %s7179_s25  ;;  %v2677_v23 = vrot.slane %v6305_v2, 4  ;;  %v2678_v14 = vrot.slane %v6303_v12, 4  ;;  %v2952_v18 = vld [vmem:[#allocation3 + $0x38] sm:$0x1f]  ;;  %v2426_v21 = vsel %vm7196_vm5, %v2424_v59, %v2425_v13  ;;  %v2980_v61 = vrot.slane %v2978_v1, 5  ;;  %v5460_v62 = vld [vmem:[%s7108_s4] sm:$0xff]  }
 0x25d   : > { %v2983_v60 = vshrl.u32 %v2952_v18, 16  ;;  %v2986_v27 = vshll.u32 %v2952_v18, 16  ;;  %v6311_v28 = vld [vmem:[#allocation3 + $0x28] sm:$0xf]  ;;  %v2935_v42 = vsel %vm7197_vm7, %v2933_v8, %v2934_v9  ;;  %v6315_v20 = vld [vmem:[#allocation3 + $0x20] sm:$0xf0]  ;;  %5307 = vmatprep.subr.bf16.mxu1 %v5460_v62 }
 0x25e   : > { %v2679_v4 = vsel %vm7198_vm9, %v2677_v23, %v2678_v14  ;;  %v2422_v29 = vrot.slane %v6311_v28, 4  ;;  %v2546_v30 = vld [vmem:[#allocation3 + $0x30] sm:$0xf8]  ;;  %v2981_v17 = vor.u32 %v2980_v61, %v2977_v52  ;;  %v2421_v35 = vrot.slane %v6315_v20, 4  ;;  %v2694_v46 = vld [vmem:[#allocation3 + $0x38] sm:$0x1f]  ;;  %5308 = vmatpush3.bf16.msra.mxu1 %v5460_v62 }
 0x25f   : > { %3065 = vrot.lane.b32.xlu1 %v2426_v21, %s7188_s23  ;;  %v2985_v31 = vrot.slane %v2983_v60, 4  ;;  %v2988_v32 = vrot.slane %v2986_v27, 5  ;;  %v2803_v36 = vld [vmem:[#allocation3 + $0x30] sm:$0xf8]  ;;  %v2589_v26 = vshrl.u32 %v2546_v30, 16  ;;  %v2592_v16 = vshll.u32 %v2546_v30, 16 }
 0x260   : > { %3131 = vrot.lane.b32.xlu0 %v2935_v42, %s7177_s19  ;;  %v2599_v37 = vrot.slane %v2597_v25, 3  ;;  %v2600_v38 = vshll.u32 %v2547_v55, 16  ;;  %v2423_v34 = vsel %vm7199_vm2, %v2421_v35, %v2422_v29  ;;  %v2831_v43 = vshrl.u32 %v2803_v36, 16  ;;  %v2436_v49 = vld [vmem:[#allocation3 + $0x38] sm:$0x1f]  ;;  %v5461_v42 = vld [vmem:[%s7108_s4 + $0x8] sm:$0xff]  }
 0x261   : > { %v2989_v40 = vor.u32 %v2988_v32, %v2985_v31  ;;  %v2834_v10 = vshll.u32 %v2803_v36, 16  ;;  %v2591_v15 = vrot.slane %v2589_v26, 3  ;;  %v2594_v33 = vrot.slane %v2592_v16, 4  ;;  %v2801_v59 = vld [vmem:[#allocation3 + $0x20] sm:$0xf8]  ;;  %5309 = vmatprep.subr.bf16.mxu1 %v5461_v42 }
 0x262   : > { %v2602_v44 = vrot.slane %v2600_v38, 4  ;;  %v2839_v45 = vshrl.u32 %v6285_v53, 16  ;;  %vm7200_vm3 = vsmask.f32 3328  ;;  %v2833_v47 = vrot.slane %v2831_v43, 3  ;;  %5310 = vmatpush3.bf16.msra.mxu1 %v5461_v42 }
 0x263   : > { %3097 = vrot.lane.b32.xlu1 %v2679_v4, %s7179_s25  ;;  %v2990_v39 = vsel %vm7200_vm3, %v2981_v17, %v2989_v40  ;;  %v2836_v19 = vrot.slane %v2834_v10, 4  ;;  %v2842_v48 = vshll.u32 %v6285_v53, 16  ;;  %v2595_v50 = vor.u32 %v2594_v33, %v2591_v15  ;;  %v2544_v27 = vld [vmem:[#allocation3 + $0x20] sm:$0xf8]  ;;  %vm7203_vm7 = vmmov %vm7200_vm3  ;;  %v2951_v43 = vld [vmem:[#allocation3 + $0x28] sm:$0x1f] }
 0x264   : > { %3145 = vrot.lane.b32.xlu0 %v2990_v39, %s7180_s21  ;;  %v2603_v51 = vor.u32 %v2602_v44, %v2599_v37  ;;  %v2841_v24 = vrot.slane %v2839_v45, 3  ;;  %v2733_v54 = vshrl.u32 %v6288_v57, 16  ;;  %v2736_v56 = vshll.u32 %v6288_v57, 16  ;;  %vm7204_vm9 = vmmov %vm7200_vm3 }
 0x265   : > { %v2837_v55 = vor.u32 %v2836_v19, %v2833_v47  ;;  %v2844_v63 = vrot.slane %v2842_v48, 4  ;;  %v2741_v58 = vshrl.u32 %v2694_v46, 16  ;;  %vm7201_vm4 = vsmask.f32 4352 }
 0x266   : > { %v2604_v11 = vsel %vm7201_vm4, %v2595_v50, %v2603_v51  ;;  %v2735_v53 = vrot.slane %v2733_v54, 4  ;;  %v2744_v1 = vshll.u32 %v2694_v46, 16  ;;  %v2491_v3 = vshrl.u32 %v6291_v0, 16  ;;  %vm7202_vm5 = vmmov %vm7201_vm4 }
 0x267   : > { %3063 = vrot.lane.b32.xlu1 %v2423_v34, %s7188_s23  ;;  %v2845_v13 = vor.u32 %v2844_v63, %v2841_v24  ;;  %v2738_v7 = vrot.slane %v2736_v56, 5  ;;  %v2743_v8 = vrot.slane %v2741_v58, 4  ;;  %v2494_v57 = vshll.u32 %v6291_v0, 16  ;;  %v2693_v24 = vld [vmem:[#allocation3 + $0x28] sm:$0x1f]  ;;  %vm7205_vm2 = vmmov %vm7201_vm4 }
 0x268   : > { %3087 = vrot.lane.b32.xlu0 %v2604_v11, %s7178_s22  ;;  %v2746_v9 = vrot.slane %v2744_v1, 5  ;;  %v2493_v23 = vrot.slane %v2491_v3, 4  ;;  %v2499_v14 = vshrl.u32 %v2436_v49, 16  ;;  %v2502_v18 = vshll.u32 %v2436_v49, 16  ;;  %vm7207_vm4 = vmmov %vm7205_vm2 }
 0x269   : > { %v2846_v52 = vsel %vm7202_vm5, %v2837_v55, %v2845_v13  ;;  %v2739_v21 = vor.u32 %v2738_v7, %v2735_v53  ;;  %v2496_v61 = vrot.slane %v2494_v57, 5  ;;  %v2814_v60 = vshrl.u32 %v2801_v59, 16  ;;  %v6359_v56 = vld [vmem:[%s7108_s4 + $0x10] ss:$0 sps:$4 sm:$0x33]   ;;  %vm7208_vm5 = vmmov %vm7203_vm7 }
 0x26a   : > { %v2747_v4 = vor.u32 %v2746_v9, %v2743_v8  ;;  %v2501_v0 = vrot.slane %v2499_v14, 4  ;;  %v2504_v29 = vrot.slane %v2502_v18, 5  ;;  %v2817_v30 = vshll.u32 %v2801_v59, 16  ;;  %v2435_v13 = vld [vmem:[#allocation3 + $0x28] sm:$0x1f] }
 0x26b   : > { %3121 = vrot.lane.b32.xlu1 %v2846_v52, %s7182_s0  ;;  %v2497_v25 = vor.u32 %v2496_v61, %v2493_v23  ;;  %v2816_v17 = vrot.slane %v2814_v60, 3  ;;  %v2822_v31 = vshrl.u32 %v6295_v5, 16  ;;  %v2825_v32 = vshll.u32 %v6295_v5, 16 }
 0x26c   : > { %v2748_v35 = vsel %vm7203_vm7, %v2739_v21, %v2747_v4  ;;  %v2505_v36 = vor.u32 %v2504_v29, %v2501_v0  ;;  %v2819_v26 = vrot.slane %v2817_v30, 4  ;;  %v2572_v16 = vshrl.u32 %v2544_v27, 16  ;;  %vm7209_vm7 = vmmov %vm7208_vm5 }
 0x26d   : > { %3111 = vrot.lane.b32.xlu0 %v2748_v35, %s7176_s28  ;;  %v2824_v37 = vrot.slane %v2822_v31, 3  ;;  %v2827_v38 = vrot.slane %v2825_v32, 4  ;;  %v2575_v40 = vshll.u32 %v2544_v27, 16  ;;  %v2580_v34 = vshrl.u32 %v6303_v12, 16 }
 0x26e   : > { %v2506_v10 = vsel %vm7204_vm9, %v2497_v25, %v2505_v36  ;;  %v2820_v15 = vor.u32 %v2819_v26, %v2816_v17  ;;  %v2574_v33 = vrot.slane %v2572_v16, 3  ;;  %v2583_v5 = vshll.u32 %v6303_v12, 16  ;;  %v2254_v47 = vpop.permute.xlu1 %2253 }
 0x26f   : > { %3077 = vrot.lane.b32.xlu1 %v2506_v10, %s7181_s24  ;;  %v2828_v44 = vor.u32 %v2827_v38, %v2824_v37  ;;  %v2577_v45 = vrot.slane %v2575_v40, 4  ;;  %v2582_v46 = vrot.slane %v2580_v34, 3  ;;  %v2958_v39 = vshrl.u32 %v6297_v41, 16  ;;  %2277 = vst.msk [vmem:[#allocation3 + $0x50] sm:$0xf0] %vm520_vm1, %v2254_v47 }
 0x270   : > { %v2585_v19 = vrot.slane %v2583_v5, 4  ;;  %v2961_v48 = vshll.u32 %v6297_v41, 16  ;;  %v2966_v50 = vshrl.u32 %v2951_v43, 16  ;;  %v2969_v51 = vshll.u32 %v2951_v43, 16  ;;  %2278 = vst.msk [vmem:[#allocation3 + $0x58] sm:$0xf] %vm509_vm0, %v2254_v47  ;;  %v2252_v41 = vpop.permute.xlu0 %2251 }
 0x271   : > { %v2829_v12 = vsel %vm7205_vm2, %v2820_v15, %v2828_v44  ;;  %v2578_v54 = vor.u32 %v2577_v45, %v2574_v33  ;;  %v2960_v55 = vrot.slane %v2958_v39, 4  ;;  %v2716_v63 = vshrl.u32 %v6305_v2, 16  ;;  %2275 = vst.msk [vmem:[#allocation3 + $0x40] sm:$0xf0] %vm520_vm1, %v2252_v41  ;;  %vm7211_vm2 = vmmov %vm7208_vm5 }
 0x272   : > { %3119 = vrot.lane.b32.xlu0 %v2829_v12, %s7182_s0  ;;  %v2586_v58 = vor.u32 %v2585_v19, %v2582_v46  ;;  %v2963_v49 = vrot.slane %v2961_v48, 5  ;;  %v2968_v62 = vrot.slane %v2966_v50, 4  ;;  %v2971_v11 = vrot.slane %v2969_v51, 5  ;;  %2276 = vst.msk [vmem:[#allocation3 + $0x48] sm:$0xf] %vm509_vm0, %v2252_v41 }
 0x273   : > { %v2718_v53 = vrot.slane %v2716_v63, 4  ;;  %v2719_v1 = vshll.u32 %v6305_v2, 16  ;;  %v2724_v3 = vshrl.u32 %v2693_v24, 16  ;;  %v2727_v59 = vshll.u32 %v2693_v24, 16 }
 0x274   : > { %vm7206_vm3 = vcmask 1041408   ;;  %v2587_v7 = vsel %vm7207_vm4, %v2578_v54, %v2586_v58  ;;  %v2964_v8 = vor.u32 %v2963_v49, %v2960_v55  ;;  %v2972_v57 = vor.u32 %v2971_v11, %v2968_v62 }
 0x275   : > { %5350 = vmatprep.subr.msk.bf16.mxu1 %vm7206_vm3, %v6359_v56  ;;  %v2474_v9 = vshrl.u32 %v6315_v20, 16  ;;  %3085 = vrot.lane.b32.xlu1 %v2587_v7, %s7178_s22  ;;  %v2721_v23 = vrot.slane %v2719_v1, 5  ;;  %v2726_v14 = vrot.slane %v2724_v3, 4  ;;  %v2729_v18 = vrot.slane %v2727_v59, 5 }
 0x276   : > { %v2477_v52 = vshll.u32 %v6315_v20, 16  ;;  %v2973_v2 = vsel %vm7208_vm5, %v2964_v8, %v2972_v57  ;;  %v2482_v61 = vshrl.u32 %v2435_v13, 16  ;;  %v2485_v60 = vshll.u32 %v2435_v13, 16  ;;  %v2918_v25 = vld [vmem:[#allocation3 + $0x50] sm:$0xf0] }
 0x277   : > { %v2476_v21 = vrot.slane %v2474_v9, 4  ;;  %3143 = vrot.lane.b32.xlu0 %v2973_v2, %s7180_s21  ;;  %v2722_v27 = vor.u32 %v2721_v23, %v2718_v53  ;;  %v2730_v42 = vor.u32 %v2729_v18, %v2726_v14  ;;  %v6373_v30 = vld [vmem:[#allocation3 + $0x58] sm:$0xf]  ;;  %v2942_v32 = vrot.slane %v2918_v25, 4  ;;  %v6377_v36 = vld [vmem:[#allocation3 + $0x50] sm:$0xf0] }
 0x278   : > { %v2479_v4 = vrot.slane %v2477_v52, 5  ;;  %v2484_v0 = vrot.slane %v2482_v61, 4  ;;  %v2487_v29 = vrot.slane %v2485_v60, 5  ;;  %v2943_v20 = vrot.slane %v6373_v30, 4  ;;  %v2551_v35 = vld [vmem:[#allocation3 + $0x58] sm:$0xf] }
 0x279   : > { %v2731_v17 = vsel %vm7209_vm7, %v2722_v27, %v2730_v42  ;;  %v2686_v16 = vrot.slane %v6377_v36, 4  ;;  %v2687_v37 = vrot.slane %v2551_v35, 4  ;;  %v6381_v38 = vld [vmem:[#allocation3 + $0x58] sm:$0xf]  ;;  %v6383_v40 = vld [vmem:[#allocation3 + $0x50] sm:$0xf0] }
 0x27a   : > { %v2480_v31 = vor.u32 %v2479_v4, %v2476_v21  ;;  %3109 = vrot.lane.b32.xlu1 %v2731_v17, %s7176_s28  ;;  %v2488_v26 = vor.u32 %v2487_v29, %v2484_v0  ;;  %vm7210_vm9 = vcmask 1043456   ;;  %v2430_v43 = vrot.slane %v6383_v40, 4  ;;  %v6388_v15 = vld [vmem:[#allocation3 + $0x48] sm:$0xf]  ;;  %v6390_v33 = vld [vmem:[#allocation3 + $0x40] sm:$0xf0] }
 0x27b   : > { %v2944_v34 = vsel %vm7210_vm9, %v2942_v32, %v2943_v20  ;;  %v2431_v10 = vrot.slane %v6381_v38, 4  ;;  %v2939_v44 = vrot.slane %v6390_v33, 4  ;;  %v2940_v45 = vrot.slane %v6388_v15, 4  ;;  %v6395_v46 = vld [vmem:[#allocation3 + $0x48] sm:$0xf]  ;;  %vm7212_vm3 = vmmov %vm7210_vm9 }
 0x27c   : > { %v2489_v5 = vsel %vm7211_vm2, %v2480_v31, %v2488_v26  ;;  %v6397_v39 = vld [vmem:[#allocation3 + $0x40] sm:$0xf0]  ;;  %v2688_v47 = vsel %vm7212_vm3, %v2686_v16, %v2687_v37  ;;  %v2684_v48 = vrot.slane %v6395_v46, 4  ;;  %v2954_v50 = vld [vmem:[#allocation3 + $0x58] sm:$0x1f]  ;;  %v3009_v51 = vshrl.u32 %v2918_v25, 16  ;;  %vm7213_vm4 = vmmov %vm7212_vm3 }
 0x27d   : > { %3075 = vrot.lane.b32.xlu0 %v2489_v5, %s7181_s24  ;;  %v2683_v19 = vrot.slane %v6397_v39, 4  ;;  %v2432_v24 = vsel %vm7213_vm4, %v2430_v43, %v2431_v10  ;;  %v3012_v12 = vshll.u32 %v2918_v25, 16  ;;  %v3017_v54 = vshrl.u32 %v2954_v50, 16  ;;  %v6405_v63 = vld [vmem:[#allocation3 + $0x48] sm:$0xf]  ;;  %vm7214_vm5 = vmmov %vm7212_vm3 }
 0x27e   : > { %3137 = vrot.lane.b32.xlu1 %v2944_v34, %s7177_s19  ;;  %v3020_v55 = vshll.u32 %v2954_v50, 16  ;;  %v2941_v41 = vsel %vm7214_vm5, %v2939_v44, %v2940_v45  ;;  %vm7215_vm7 = vmmov %vm7212_vm3  ;;  %v3011_v49 = vrot.slane %v3009_v51, 4  ;;  %v6409_v62 = vld [vmem:[#allocation3 + $0x40] sm:$0xf0]  ;;  %v2428_v11 = vrot.slane %v6405_v63, 4 }
 0x27f   : > { %v2685_v58 = vsel %vm7215_vm7, %v2683_v19, %v2684_v48  ;;  %v2550_v53 = vld [vmem:[#allocation3 + $0x50] sm:$0xf8]  ;;  %v3014_v1 = vrot.slane %v3012_v12, 5  ;;  %v3019_v3 = vrot.slane %v3017_v54, 4  ;;  %v2427_v13 = vrot.slane %v6409_v62, 4  ;;  %vm7216_vm9 = vmmov %vm7212_vm3 }
 0x280   : > { %v3022_v59 = vrot.slane %v3020_v55, 5  ;;  %v2807_v7 = vld [vmem:[#allocation3 + $0x50] sm:$0xf8]  ;;  %v2623_v8 = vshrl.u32 %v2550_v53, 16  ;;  %v2626_v57 = vshll.u32 %v2550_v53, 16  ;;  %v2631_v9 = vshrl.u32 %v2551_v35, 16  ;;  %vm7219_vm5 = vmmov %vm7211_vm2 }
 0x281   : > { %3103 = vrot.lane.b32.xlu0 %v2688_v47, %s7179_s25  ;;  %v2634_v23 = vshll.u32 %v2551_v35, 16  ;;  %v3015_v14 = vor.u32 %v3014_v1, %v3011_v49  ;;  %v2429_v52 = vsel %vm7216_vm9, %v2427_v13, %v2428_v11  ;;  %v2865_v2 = vshrl.u32 %v2807_v7, 16  ;;  %v2696_v42 = vld [vmem:[#allocation3 + $0x58] sm:$0x1f]  ;;  %v2805_v45 = vld [vmem:[#allocation3 + $0x40] sm:$0xf8]  ;;  %vm7220_vm7 = vmmov %vm7211_vm2 }
 0x282   : > { %3069 = vrot.lane.b32.xlu1 %v2432_v24, %s7188_s23  ;;  %v3023_v18 = vor.u32 %v3022_v59, %v3019_v3  ;;  %v2625_v21 = vrot.slane %v2623_v8, 3  ;;  %v2628_v61 = vrot.slane %v2626_v57, 4  ;;  %v2633_v60 = vrot.slane %v2631_v9, 3  ;;  %v2438_v34 = vld [vmem:[#allocation3 + $0x58] sm:$0x1f] }
 0x283   : > { %v2636_v27 = vrot.slane %v2634_v23, 4  ;;  %v2867_v0 = vrot.slane %v2865_v2, 3  ;;  %v2868_v29 = vshll.u32 %v2807_v7, 16  ;;  %v2873_v25 = vshrl.u32 %v6373_v30, 16 }
 0x284   : > { %v3024_v4 = vsel %vm7211_vm2, %v3015_v14, %v3023_v18  ;;  %v2629_v17 = vor.u32 %v2628_v61, %v2625_v21  ;;  %v2876_v32 = vshll.u32 %v6373_v30, 16  ;;  %v2767_v20 = vshrl.u32 %v6377_v36, 16 }
 0x285   : > { %3135 = vrot.lane.b32.xlu0 %v2941_v41, %s7177_s19  ;;  %v2637_v31 = vor.u32 %v2636_v27, %v2633_v60  ;;  %v2870_v35 = vrot.slane %v2868_v29, 4  ;;  %v2875_v26 = vrot.slane %v2873_v25, 3  ;;  %v2770_v16 = vshll.u32 %v6377_v36, 16  ;;  %v2953_v27 = vld [vmem:[#allocation3 + $0x48] sm:$0x1f] }
 0x286   : > { %3101 = vrot.lane.b32.xlu1 %v2685_v58, %s7179_s25  ;;  %v2775_v37 = vshrl.u32 %v2696_v42, 16  ;;  %vm7217_vm3 = vsmask.f32 4352  ;;  %v2878_v10 = vrot.slane %v2876_v32, 4  ;;  %v2769_v5 = vrot.slane %v2767_v20, 4 }
 0x287   : > { %v2638_v43 = vsel %vm7217_vm3, %v2629_v17, %v2637_v31  ;;  %v2778_v44 = vshll.u32 %v2696_v42, 16  ;;  %v2871_v47 = vor.u32 %v2870_v35, %v2867_v0  ;;  %v2772_v19 = vrot.slane %v2770_v16, 5  ;;  %v2548_v58 = vld [vmem:[#allocation3 + $0x40] sm:$0xf8]  ;;  %vm7218_vm4 = vmmov %vm7217_vm3  ;;  %v2695_v20 = vld [vmem:[#allocation3 + $0x48] sm:$0x1f] }
 0x288   : > { %v2777_v48 = vrot.slane %v2775_v37, 4  ;;  %v2525_v30 = vshrl.u32 %v6383_v40, 16  ;;  %v2879_v50 = vor.u32 %v2878_v10, %v2875_v26  ;;  %v2528_v24 = vshll.u32 %v6383_v40, 16  ;;  %vm7221_vm9 = vmmov %vm7217_vm3 }
 0x289   : > { %3149 = vrot.lane.b32.xlu0 %v3024_v4, %s7180_s21  ;;  %v2780_v51 = vrot.slane %v2778_v44, 5  ;;  %v2533_v36 = vshrl.u32 %v2438_v34, 16  ;;  %v2773_v12 = vor.u32 %v2772_v19, %v2769_v5  ;;  %v2536_v55 = vshll.u32 %v2438_v34, 16  ;;  %v2437_v19 = vld [vmem:[#allocation3 + $0x48] sm:$0x1f]  ;;  %vm7222_vm2 = vmmov %vm7217_vm3 }
 0x28a   : > { %3067 = vrot.lane.b32.xlu1 %v2429_v52, %s7188_s23  ;;  %v2527_v54 = vrot.slane %v2525_v30, 4  ;;  %v2848_v41 = vshrl.u32 %v2805_v45, 16  ;;  %v2880_v49 = vsel %vm7218_vm4, %v2871_v47, %v2879_v50  ;;  %v2530_v53 = vrot.slane %v2528_v24, 5  ;;  %vm7223_vm3 = vmmov %vm7219_vm5 }
 0x28b   : > { %v2781_v11 = vor.u32 %v2780_v51, %v2777_v48  ;;  %v2535_v1 = vrot.slane %v2533_v36, 4  ;;  %v2538_v3 = vrot.slane %v2536_v55, 5  ;;  %v2851_v13 = vshll.u32 %v2805_v45, 16  ;;  %vm7224_vm4 = vmmov %vm7223_vm3 }
 0x28c   : > { %v2850_v59 = vrot.slane %v2848_v41, 3  ;;  %v2856_v7 = vshrl.u32 %v6388_v15, 16  ;;  %v2531_v8 = vor.u32 %v2530_v53, %v2527_v54  ;;  %v2859_v57 = vshll.u32 %v6388_v15, 16 }
 0x28d   : > { %3091 = vrot.lane.b32.xlu0 %v2638_v43, %s7178_s22  ;;  %v2782_v40 = vsel %vm7219_vm5, %v2773_v12, %v2781_v11  ;;  %v2606_v9 = vshrl.u32 %v2548_v58, 16  ;;  %v2539_v23 = vor.u32 %v2538_v3, %v2535_v1  ;;  %v2853_v14 = vrot.slane %v2851_v13, 4  ;;  %v2258_v29 = vpop.permute.xlu1 %2257  ;;  %vm7225_vm5 = vmmov %vm7223_vm3 }
 0x28e   : > { %3125 = vrot.lane.b32.xlu1 %v2880_v49, %s7182_s0  ;;  %v2858_v18 = vrot.slane %v2856_v7, 3  ;;  %v2609_v52 = vshll.u32 %v2548_v58, 16  ;;  %v2861_v2 = vrot.slane %v2859_v57, 4  ;;  %v2614_v61 = vshrl.u32 %v6395_v46, 16  ;;  %2281 = vst.msk [vmem:[#allocation3 + $0x70] sm:$0xf0] %vm520_vm1, %v2258_v29 }
 0x28f   : > { %v2608_v21 = vrot.slane %v2606_v9, 3  ;;  %v2617_v60 = vshll.u32 %v6395_v46, 16  ;;  %v2540_v42 = vsel %vm7220_vm7, %v2531_v8, %v2539_v23  ;;  %v2854_v4 = vor.u32 %v2853_v14, %v2850_v59  ;;  %2282 = vst.msk [vmem:[#allocation3 + $0x78] sm:$0xf] %vm509_vm0, %v2258_v29  ;;  %v2256_v46 = vpop.permute.xlu0 %2255 }
 0x290   : > { %v2611_v0 = vrot.slane %v2609_v52, 4  ;;  %v2992_v15 = vshrl.u32 %v6390_v33, 16  ;;  %v2862_v25 = vor.u32 %v2861_v2, %v2858_v18  ;;  %v2616_v17 = vrot.slane %v2614_v61, 3  ;;  %2279 = vst.msk [vmem:[#allocation3 + $0x60] sm:$0xf0] %vm520_vm1, %v2256_v46 }
 0x291   : > { %3115 = vrot.lane.b32.xlu0 %v2782_v40, %s7176_s28  ;;  %v2619_v31 = vrot.slane %v2617_v60, 4  ;;  %v2995_v32 = vshll.u32 %v6390_v33, 16  ;;  %v3000_v16 = vshrl.u32 %v2953_v27, 16  ;;  %v3003_v37 = vshll.u32 %v2953_v27, 16  ;;  %2280 = vst.msk [vmem:[#allocation3 + $0x68] sm:$0xf] %vm509_vm0, %v2256_v46 }
 0x292   : > { %3081 = vrot.lane.b32.xlu1 %v2540_v42, %s7181_s24  ;;  %v2612_v35 = vor.u32 %v2611_v0, %v2608_v21  ;;  %v2994_v26 = vrot.slane %v2992_v15, 4  ;;  %v2863_v34 = vsel %vm7221_vm9, %v2854_v4, %v2862_v25  ;;  %v2750_v10 = vshrl.u32 %v6397_v39, 16 }
 0x293   : > { %v2620_v43 = vor.u32 %v2619_v31, %v2616_v17  ;;  %v2997_v33 = vrot.slane %v2995_v32, 5  ;;  %v3002_v5 = vrot.slane %v3000_v16, 4  ;;  %v3005_v44 = vrot.slane %v3003_v37, 5 }
 0x294   : > { %v2753_v45 = vshll.u32 %v6397_v39, 16  ;;  %v2758_v47 = vshrl.u32 %v2695_v20, 16  ;;  %v2752_v50 = vrot.slane %v2750_v10, 4  ;;  %v2761_v51 = vshll.u32 %v2695_v20, 16 }
 0x295   : > { %3123 = vrot.lane.b32.xlu0 %v2863_v34, %s7182_s0  ;;  %v2621_v48 = vsel %vm7222_vm2, %v2612_v35, %v2620_v43  ;;  %v2998_v30 = vor.u32 %v2997_v33, %v2994_v26  ;;  %v3006_v24 = vor.u32 %v3005_v44, %v3002_v5  ;;  %v2508_v54 = vshrl.u32 %v6409_v62, 16  ;;  %v6455_v40 = vld [vmem:[#allocation3 + $0x70] sm:$0xf0] }
 0x296   : > { %3089 = vrot.lane.b32.xlu1 %v2621_v48, %s7178_s22  ;;  %v2755_v36 = vrot.slane %v2753_v45, 5  ;;  %v2760_v12 = vrot.slane %v2758_v47, 4  ;;  %v2763_v55 = vrot.slane %v2761_v51, 5  ;;  %v2511_v41 = vshll.u32 %v6409_v62, 16  ;;  %v2812_v7 = vld [vmem:[#allocation3 + $0x78] sm:$0xf] }
 0x297   : > { %v2516_v39 = vshrl.u32 %v2437_v19, 16  ;;  %v2519_v58 = vshll.u32 %v2437_v19, 16  ;;  %v3007_v49 = vsel %vm7223_vm3, %v2998_v30, %v3006_v24  ;;  %v2510_v53 = vrot.slane %v2508_v54, 4  ;;  %v2919_v52 = vld [vmem:[#allocation3 + $0x60] sm:$0xf0] }
 0x298   : > { %v2756_v11 = vor.u32 %v2755_v36, %v2752_v50  ;;  %v2764_v1 = vor.u32 %v2763_v55, %v2760_v12  ;;  %v2513_v3 = vrot.slane %v2511_v41, 5  ;;  %v2949_v8 = vrot.slane %v2812_v7, 4  ;;  %v2810_v57 = vld [vmem:[#allocation3 + $0x68] sm:$0xf]  ;;  %v2809_v2 = vld [vmem:[#allocation3 + $0x60] sm:$0xf8] }
 0x299   : > { %3147 = vrot.lane.b32.xlu0 %v3007_v49, %s7180_s21  ;;  %v2518_v59 = vrot.slane %v2516_v39, 4  ;;  %v2521_v13 = vrot.slane %v2519_v58, 5  ;;  %v2907_v9 = vshrl.u32 %v2812_v7, 16  ;;  %v2948_v18 = vrot.slane %v6455_v40, 4  ;;  %v2553_v42 = vld [vmem:[#allocation3 + $0x68] sm:$0xf] }
 0x29a   : > { %v2765_v62 = vsel %vm7224_vm4, %v2756_v11, %v2764_v1  ;;  %v2514_v23 = vor.u32 %v2513_v3, %v2510_v53  ;;  %v2945_v21 = vrot.slane %v2919_v52, 4  ;;  %v2946_v61 = vrot.slane %v2810_v57, 4  ;;  %v2661_v25 = vld [vmem:[#allocation3 + $0x60] sm:$0xf0]  ;;  %v2955_v17 = vld [vmem:[#allocation3 + $0x68] sm:$0x1f] }
 0x29b   : > { %v2522_v14 = vor.u32 %v2521_v13, %v2518_v59  ;;  %3113 = vrot.lane.b32.xlu1 %v2765_v62, %s7176_s28  ;;  %v2882_v60 = vshrl.u32 %v2809_v2, 16  ;;  %v2885_v27 = vshll.u32 %v2809_v2, 16  ;;  %vm7226_vm7 = vcmask 1043456   ;;  %v2811_v35 = vld [vmem:[#allocation3 + $0x70] sm:$0xf8] }
 0x29c   : > { %v2950_v0 = vsel %vm7226_vm7, %v2948_v18, %v2949_v8  ;;  %v2890_v15 = vshrl.u32 %v2810_v57, 16  ;;  %v2893_v29 = vshll.u32 %v2810_v57, 16  ;;  %vm7227_vm9 = vmmov %vm7226_vm7  ;;  %v2689_v46 = vrot.slane %v2661_v25, 4  ;;  %v2552_v48 = vld [vmem:[#allocation3 + $0x60] sm:$0xf8] }
 0x29d   : > { %v2523_v4 = vsel %vm7225_vm5, %v2514_v23, %v2522_v14  ;;  %v2947_v31 = vsel %vm7227_vm9, %v2945_v21, %v2946_v61  ;;  %v2884_v32 = vrot.slane %v2882_v60, 3  ;;  %v2887_v20 = vrot.slane %v2885_v27, 4  ;;  %vm7228_vm2 = vmmov %vm7226_vm7  ;;  %v2697_v59 = vld [vmem:[#allocation3 + $0x68] sm:$0x1f]  ;;  %v2956_v21 = vld [vmem:[#allocation3 + $0x78] sm:$0x1f] }
 0x29e   : > { %3079 = vrot.lane.b32.xlu0 %v2523_v4, %s7181_s24  ;;  %v2892_v26 = vrot.slane %v2890_v15, 3  ;;  %v2895_v16 = vrot.slane %v2893_v29, 4  ;;  %v2690_v37 = vrot.slane %v2553_v42, 4  ;;  %v3026_v34 = vshrl.u32 %v2919_v52, 16  ;;  %vm7232_vm9 = vmmov %vm7224_vm4 }
 0x29f   : > { %3141 = vrot.lane.b32.xlu1 %v2950_v0, %s7177_s19  ;;  %v2888_v43 = vor.u32 %v2887_v20, %v2884_v32  ;;  %v3029_v33 = vshll.u32 %v2919_v52, 16  ;;  %v3034_v10 = vshrl.u32 %v2955_v17, 16  ;;  %v3037_v5 = vshll.u32 %v2955_v17, 16 }
 0x2a0   : > { %v2896_v44 = vor.u32 %v2895_v16, %v2892_v26  ;;  %v2691_v45 = vsel %vm7228_vm2, %v2689_v46, %v2690_v37  ;;  %v3028_v47 = vrot.slane %v3026_v34, 4  ;;  %v2899_v19 = vshrl.u32 %v2811_v35, 16 }
 0x2a1   : > { %v3031_v30 = vrot.slane %v3029_v33, 5  ;;  %v3036_v50 = vrot.slane %v3034_v10, 4  ;;  %v3039_v51 = vrot.slane %v3037_v5, 5  ;;  %v2902_v24 = vshll.u32 %v2811_v35, 16 }
 0x2a2   : > { %3139 = vrot.lane.b32.xlu0 %v2947_v31, %s7177_s19  ;;  %vm7229_vm3 = vsmask.f32 4352  ;;  %v2901_v12 = vrot.slane %v2899_v19, 3  ;;  %v2909_v54 = vrot.slane %v2907_v9, 3  ;;  %v2910_v55 = vshll.u32 %v2812_v7, 16 }
 0x2a3   : > { %v2897_v36 = vsel %vm7229_vm3, %v2888_v43, %v2896_v44  ;;  %3105 = vrot.lane.b32.xlu1 %v2691_v45, %s7179_s25  ;;  %v3032_v41 = vor.u32 %v3031_v30, %v3028_v47  ;;  %v3040_v39 = vor.u32 %v3039_v51, %v3036_v50  ;;  %v2904_v58 = vrot.slane %v2902_v24, 4  ;;  %vm7230_vm5 = vmmov %vm7229_vm3  ;;  %v2283_v50 = vld [vmem:[#allocation3] sm:$0xf8] }
 0x2a4   : > { %v2640_v49 = vshrl.u32 %v2552_v48, 16  ;;  %v2912_v11 = vrot.slane %v2910_v55, 4  ;;  %v2643_v53 = vshll.u32 %v2552_v48, 16  ;;  %v2648_v1 = vshrl.u32 %v2553_v42, 16  ;;  %vm7231_vm7 = vmmov %vm7229_vm3 }
 0x2a5   : > { %v2651_v3 = vshll.u32 %v2553_v42, 16  ;;  %v2905_v13 = vor.u32 %v2904_v58, %v2901_v12  ;;  %v2784_v57 = vshrl.u32 %v2661_v25, 16  ;;  %v2787_v18 = vshll.u32 %v2661_v25, 16  ;;  %vm7234_vm3 = vmmov %vm7224_vm4  ;;  %v5470_v12 = vld [vmem:[#allocation3 + $0x8] sm:$0xf] }
 0x2a6   : > { %3127 = vrot.lane.b32.xlu0 %v2897_v36, %s7182_s0  ;;  %v2642_v8 = vrot.slane %v2640_v49, 3  ;;  %v2913_v62 = vor.u32 %v2912_v11, %v2909_v54  ;;  %v2645_v23 = vrot.slane %v2643_v53, 4  ;;  %v2650_v9 = vrot.slane %v2648_v1, 3 }
 0x2a7   : > { %v2653_v7 = vrot.slane %v2651_v3, 4  ;;  %v2786_v14 = vrot.slane %v2784_v57, 4  ;;  %v2792_v52 = vshrl.u32 %v2697_v59, 16  ;;  %v2795_v2 = vshll.u32 %v2697_v59, 16  ;;  %v2285_v3 = vld [vmem:[#allocation3 + $0x10] sm:$0xf8] }
 0x2a8   : > { %v3041_v61 = vsel %vm7224_vm4, %v3032_v41, %v3040_v39  ;;  %v2914_v60 = vsel %vm7230_vm5, %v2905_v13, %v2913_v62  ;;  %v2646_v27 = vor.u32 %v2645_v23, %v2642_v8  ;;  %v2789_v4 = vrot.slane %v2787_v18, 5  ;;  %vm7235_vm4 = vmmov %vm7230_vm5 }
 0x2a9   : > { %v2654_v42 = vor.u32 %v2653_v7, %v2650_v9  ;;  %3129 = vrot.lane.b32.xlu1 %v2914_v60, %s7182_s0  ;;  %v2794_v0 = vrot.slane %v2792_v52, 4  ;;  %v2797_v15 = vrot.slane %v2795_v2, 5  ;;  %v3043_v29 = vshrl.u32 %v6455_v40, 16  ;;  %v3062_v47 = vpop.permute.xlu1 %3061  ;;  %v5471_v9 = vld [vmem:[#allocation3 + $0x18] sm:$0xf] }
 0x2aa   : > { %3151 = vrot.lane.b32.xlu0 %v3041_v61, %s7180_s21  ;;  %v3046_v25 = vshll.u32 %v6455_v40, 16  ;;  %v3051_v17 = vshrl.u32 %v2956_v21, 16  ;;  %v3054_v31 = vshll.u32 %v2956_v21, 16  ;;  %v2790_v20 = vor.u32 %v2789_v4, %v2786_v14  ;;  %v3096_v40 = vpop.permute.xlu0 %3095 }
 0x2ab   : > { %v2655_v32 = vsel %vm7231_vm7, %v2646_v27, %v2654_v42  ;;  %v2798_v46 = vor.u32 %v2797_v15, %v2794_v0  ;;  %v3045_v35 = vrot.slane %v3043_v29, 4  ;;  %vm7233_vm2 = vcmask 1041408  }
 0x2ac   : > { %v3048_v26 = vrot.slane %v3046_v25, 5  ;;  %v3053_v16 = vrot.slane %v3051_v17, 4  ;;  %v3056_v37 = vrot.slane %v3054_v31, 5  ;;  %v3290_v10 = vsel %vm7233_vm2, %v6359_v56, 0 }
 0x2ad   : > { %3093 = vrot.lane.b32.xlu1 %v2655_v32, %s7178_s22  ;;  %v2799_v34 = vsel %vm7232_vm9, %v2790_v20, %v2798_v46  ;;  %5312 = vmatpush3.bf16.msra.mxu1 %v3290_v10  ;;  %v2296_v24 = vshrl.u32 %v2283_v50, 16  ;;  %v2299_v36 = vshll.u32 %v2283_v50, 16  ;;  %v2304_v56 = vshrl.u32 %v5470_v12, 16 }
 0x2ae   : > { %v3049_v43 = vor.u32 %v3048_v26, %v3045_v35  ;;  %v3057_v33 = vor.u32 %v3056_v37, %v3053_v16  ;;  %v3060_v44 = vpop.permute.xlu0 %3059  ;;  %v2307_v54 = vshll.u32 %v5470_v12, 16  ;;  %v2313_v57 = vshrl.u32 %v2285_v3, 16 }
 0x2af   : > { %v3074_v48 = vpop.permute.xlu1 %3073  ;;  %v2298_v39 = vrot.slane %v2296_v24, 3  ;;  %v2301_v58 = vrot.slane %v2299_v36, 4  ;;  %v2306_v49 = vrot.slane %v2304_v56, 3  ;;  %v2316_v23 = vshll.u32 %v2285_v3, 16 }
 0x2b0   : > { %v3058_v5 = vsel %vm7234_vm3, %v3049_v43, %v3057_v33  ;;  %v2309_v11 = vrot.slane %v2307_v54, 4  ;;  %v2321_v7 = vshrl.u32 %v5471_v9, 16  ;;  %v2324_v14 = vshll.u32 %v5471_v9, 16  ;;  %vm7240_vm3 = vmmov %vm7235_vm4  ;;  %v5472_v9 = vld [vmem:[#allocation3 + $0x38] sm:$0xf] }
 0x2b1   : > { %3117 = vrot.lane.b32.xlu1 %v2799_v34, %s7176_s28  ;;  %v2302_v59 = vor.u32 %v2301_v58, %v2298_v39  ;;  %vm7236_vm5 = vcmask 31744   ;;  %v2315_v60 = vrot.slane %v2313_v57, 3  ;;  %v2318_v27 = vrot.slane %v2316_v23, 4 }
 0x2b2   : > { %v3084_v45 = vpop.permute.xlu0 %3083  ;;  %v2310_v13 = vor.u32 %v2309_v11, %v2306_v49  ;;  %v2323_v42 = vrot.slane %v2321_v7, 3  ;;  %v2326_v4 = vrot.slane %v2324_v14, 4  ;;  %vm7237_vm7 = vcmask 97280  }
 0x2b3   : > { %v2319_v25 = vor.u32 %v2318_v27, %v2315_v60  ;;  %vm7238_vm9 = vcmask 130048   ;;  %vm7239_vm2 = vcmask 162816   ;;  %v2338_v24 = vshrl.u32 %v6311_v28, 16 }
 0x2b4   : > { %v2311_v18 = vsel %vm7235_vm4, %v2302_v59, %v2310_v13  ;;  %v2327_v17 = vor.u32 %v2326_v4, %v2323_v42  ;;  %vm7241_vm4 = vcmask 195584   ;;  %v2341_v36 = vshll.u32 %v6311_v28, 16 }
 0x2b5   : > { %3153 = vrot.lane.b32.xlu1 %v3058_v5, %s7180_s21  ;;  %v3157_v2 = vsel %vm7236_vm5, %v2311_v18, %v3060_v44  ;;  %v2340_v49 = vrot.slane %v2338_v24, 3  ;;  %v2358_v7 = vshll.u32 %v5472_v9, 16  ;;  %v2293_v24 = vld [vmem:[#allocation3 + $0x50] sm:$0xf8] }
 0x2b6   : > { %v3108_v19 = vpop.permute.xlu0 %3107  ;;  %v2328_v46 = vsel %vm7240_vm3, %v2319_v25, %v2327_v17  ;;  %vm7246_vm3 = vcmask 162816   ;;  %v2343_v11 = vrot.slane %v2341_v36, 4 }
 0x2b7   : > { %v3160_v26 = vsel %vm7236_vm5, %v2328_v46, %v3062_v47  ;;  %vm7247_vm5 = vmmov %vm7242_vm8  ;;  %v2375_v46 = vshll.u32 %v6405_v63, 16 }
 0x2b8   : > { %v3176_v37 = vsel %vm1819_vm6, %v3160_v26, %v3074_v48  ;;  %v2344_v59 = vor.u32 %v2343_v11, %v2340_v49  ;;  %v2381_v11 = vshrl.u32 %v2293_v24, 16 }
 0x2ba   : > { %v3072_v30 = vpop.permute.xlu0 %3071 }
 0x2bb   : > { %v3174_v21 = vsel %vm1819_vm6, %v3157_v2, %v3072_v30 }
 0x2bc   : > { %v3186_v0 = vsel %vm7237_vm7, %v3174_v21, %v3084_v45 }
 0x2bd   : > { %v3198_v31 = vsel %vm7238_vm9, %v3186_v0, %v3096_v40  ;;  %vm7244_vm9 = vcmask 293888   ;;  %v2287_v40 = vld [vmem:[#allocation3 + $0x20] sm:$0xf8]  ;;  %v2360_v0 = vrot.slane %v2358_v7, 4 }
 0x2be   : > { %v3210_v20 = vsel %vm7239_vm2, %v3198_v31, %v3108_v19  ;;  %vm7245_vm2 = vcmask 130048   ;;  %v2330_v19 = vshrl.u32 %v2287_v40, 16  ;;  %v2333_v50 = vshll.u32 %v2287_v40, 16 }
 0x2c0   : > { %v2332_v39 = vrot.slane %v2330_v19, 3  ;;  %v2335_v58 = vrot.slane %v2333_v50, 4 }
 0x2c2   : > { %v2336_v3 = vor.u32 %v2335_v58, %v2332_v39 }
 0x2cd   : > { %v3134_v51 = vpop.permute.xlu1 %3133 }
 0x2ce   : > { %v6484_v55 = vpop.permute.xlu0 %3099 }
 0x2d1   : > { %v6486_v41 = vpop.permute.xlu1 %3065 }
 0x2d2   : > { %v3132_v53 = vpop.permute.xlu0 %3131 }
 0x2d5   : > { %v3098_v1 = vpop.permute.xlu1 %3097 }
 0x2d6   : > { %v3146_v8 = vpop.permute.xlu0 %3145 }
 0x2d9   : > { %v6488_v62 = vpop.permute.xlu1 %3063 }
 0x2da   : > { %v6491_v52 = vpop.permute.xlu0 %3087 }
 0x2dd   : > { %v3122_v61 = vpop.permute.xlu1 %3121 }
 0x2df   : > { %v6496_v15 = vpop.permute.xlu0 %3111 }
 0x2e1   : > { %v6498_v29 = vpop.permute.xlu1 %3077 }
 0x2e4   : > { %v3120_v32 = vpop.permute.xlu0 %3119 }
 0x2e5   : > { %v3222_v35 = vsel %vm7241_vm4, %v3210_v20, %v3120_v32  ;;  %v2372_v20 = vshrl.u32 %v6405_v63, 16 }
 0x2e6   : > { %v3234_v33 = vsel %vm7242_vm8, %v3222_v35, %v3132_v53  ;;  %vm7248_vm8 = vmmov %vm7243_vm15 }
 0x2e7   : > { %v3086_v16 = vpop.permute.xlu1 %3085 }
 0x2e8   : > { %v3188_v34 = vsel %vm7237_vm7, %v3176_v37, %v3086_v16  ;;  %vm7250_vm7 = vsmask.f32 4352 }
 0x2e9   : > { %v3144_v43 = vpop.permute.xlu0 %3143  ;;  %v3200_v5 = vsel %vm7245_vm2, %v3188_v34, %v3098_v1  ;;  %v2289_v1 = vld [vmem:[#allocation3 + $0x30] sm:$0xf8]  ;;  %v2345_v14 = vsel %vm7250_vm7, %v2336_v3, %v2344_v59  ;;  %vm7252_vm2 = vcmask 97280   ;;  %v2389_v59 = vshrl.u32 %v6381_v38, 16 }
 0x2ea   : > { %v3246_v10 = vsel %vm7243_vm15, %v3234_v33, %v3144_v43  ;;  %vm7249_vm15 = vmmov %vm7244_vm9  ;;  %v2347_v28 = vshrl.u32 %v2289_v1, 16  ;;  %v2350_v23 = vshll.u32 %v2289_v1, 16  ;;  %v2374_v33 = vrot.slane %v2372_v20, 3 }
 0x2eb   : > { %5313 = vmatprep.mubr.msk.bf16.mxu1 %vm7244_vm9, %v3246_v10  ;;  %vm7251_vm9 = vcmask 31744   ;;  %v2377_v10 = vrot.slane %v2375_v46, 4 }
 0x2ec   : > { %v3110_v44 = vpop.permute.xlu1 %3109  ;;  %v3163_v2 = vsel %vm7251_vm9, %v2345_v14, %v6488_v62  ;;  %v2349_v27 = vrot.slane %v2347_v28, 3  ;;  %v2352_v42 = vrot.slane %v2350_v23, 4  ;;  %v2383_v14 = vrot.slane %v2381_v11, 3 }
 0x2ed   : > { %v3212_v45 = vsel %vm7246_vm3, %v3200_v5, %v3110_v44  ;;  %vm7253_vm3 = vcmask 130048   ;;  %v2378_v19 = vor.u32 %v2377_v10, %v2374_v33  ;;  %v6588_v10 = vld [vmem:[%s7110_s6] ss:$0 sm:$0xff] }
 0x2ee   : > { %v3224_v47 = vsel %vm7241_vm4, %v3212_v45, %v3122_v61  ;;  %v2291_v61 = vld [vmem:[#allocation3 + $0x40] sm:$0xf8]  ;;  %v2353_v62 = vor.u32 %v2352_v42, %v2349_v27  ;;  %vm7254_vm4 = vcmask 162816  }
 0x2ef   : > { %v3076_v30 = vpop.permute.xlu0 %3075  ;;  %v3236_v48 = vsel %vm7247_vm5, %v3224_v47, %v3134_v51  ;;  %v2364_v31 = vshrl.u32 %v2291_v61, 16  ;;  %v2367_v32 = vshll.u32 %v2291_v61, 16  ;;  %vm7255_vm5 = vmmov %vm7250_vm7 }
 0x2f0   : > { %v6516_v12 = vpop.permute.xlu1 %3137  ;;  %v3248_v56 = vsel %vm7248_vm8, %v3236_v48, %v3146_v8  ;;  %v2355_v8 = vshrl.u32 %v5472_v9, 16  ;;  %v3178_v21 = vsel %vm1819_vm6, %v3163_v2, %v3076_v30  ;;  %vm7256_vm8 = vcmask 195584   ;;  %vm7258_vm7 = vmmov %vm7252_vm2 }
 0x2f1   : > { %5314 = vmatmul.mubr.msk.bf16.vlgmr.msra.gmra.mrb[0].mxu1 %vm7249_vm15, %v3248_v56  ;;  %v3190_v17 = vsel %vm7252_vm2, %v3178_v21, %v6491_v52  ;;  %v2366_v34 = vrot.slane %v2364_v31, 3  ;;  %v2369_v43 = vrot.slane %v2367_v32, 4  ;;  %vm7257_vm15 = vmmov %vm7251_vm9  ;;  %vm7259_vm9 = vcmask 228352  }
 0x2f2   : > { %v2357_v4 = vrot.slane %v2355_v8, 3  ;;  %v3202_v37 = vsel %vm7253_vm3, %v3190_v17, %v6484_v55  ;;  %vm7260_vm2 = vcmask 261120   ;;  %vm7261_vm3 = vcmask 293888  }
 0x2f3   : > { %v6520_v54 = vpop.permute.xlu0 %3103  ;;  %v3214_v52 = vsel %vm7254_vm4, %v3202_v37, %v6496_v15  ;;  %v2370_v55 = vor.u32 %v2369_v43, %v2366_v34  ;;  %vm7262_vm4 = vcmask 130048   ;;  %v2391_v2 = vrot.slane %v2389_v59, 3 }
 0x2f4   : > { %v6522_v53 = vpop.permute.xlu1 %3069  ;;  %v2361_v26 = vor.u32 %v2360_v0, %v2357_v4 }
 0x2f6   : > { %v2362_v5 = vsel %vm7255_vm5, %v2353_v62, %v2361_v26 }
 0x2f7   : > { %v3136_v51 = vpop.permute.xlu0 %3135  ;;  %v3166_v45 = vsel %vm7257_vm15, %v2362_v5, %v6486_v41  ;;  %v2379_v41 = vsel %vm7255_vm5, %v2370_v55, %v2378_v19  ;;  %vm7269_vm5 = vcmask 195584  }
 0x2f8   : > { %v3102_v13 = vpop.permute.xlu1 %3101  ;;  %v3180_v47 = vsel %vm1819_vm6, %v3166_v45, %v6498_v29 }
 0x2fb   : > { %v3150_v57 = vpop.permute.xlu0 %3149 }
 0x2fc   : > { %v3068_v18 = vpop.permute.xlu1 %3067 }
 0x2fd   : > { %v3169_v29 = vsel %vm7257_vm15, %v2379_v41, %v3068_v18  ;;  %vm7271_vm15 = vmmov %vm7260_vm2 }
 0x2ff   : > { %v3092_v60 = vpop.permute.xlu0 %3091 }
 0x300   : > { %v3126_v25 = vpop.permute.xlu1 %3125 }
 0x303   : > { %v3116_v35 = vpop.permute.xlu0 %3115 }
 0x304   : > { %v3082_v16 = vpop.permute.xlu1 %3081 }
 0x307   : > { %v3124_v40 = vpop.permute.xlu0 %3123 }
 0x308   : > { %v3226_v44 = vsel %vm7256_vm8, %v3214_v52, %v3124_v40  ;;  %v3090_v63 = vpop.permute.xlu1 %3089  ;;  %vm7263_vm8 = vcmask 162816  }
 0x309   : > { %v3192_v30 = vsel %vm7258_vm7, %v3180_v47, %v3090_v63  ;;  %v3238_v48 = vsel %vm7259_vm9, %v3226_v44, %v3136_v51  ;;  %v2384_v51 = vshll.u32 %v2293_v24, 16  ;;  %vm7265_vm7 = vmmov %vm7259_vm9  ;;  %vm7266_vm9 = vcmask 97280  }
 0x30a   : > { %v3204_v36 = vsel %vm7262_vm4, %v3192_v30, %v3102_v13  ;;  %v2392_v13 = vshll.u32 %v6381_v38, 16 }
 0x30b   : > { %v3148_v50 = vpop.permute.xlu0 %3147  ;;  %v2386_v18 = vrot.slane %v2384_v51, 4 }
 0x30c   : > { %v3250_v15 = vsel %vm7260_vm2, %v3238_v48, %v3148_v50  ;;  %v2394_v21 = vrot.slane %v2392_v13, 4 }
 0x30d   : > { %5317 = vmatprep.mubr.msk.bf16.mxu1 %vm7261_vm3, %v3250_v15  ;;  %v3114_v56 = vpop.permute.xlu1 %3113 }
 0x30e   : > { %v3216_v39 = vsel %vm7263_vm8, %v3204_v36, %v3114_v56  ;;  %v2395_v42 = vor.u32 %v2394_v21, %v2391_v2 }
 0x30f   : > { %v3228_v58 = vsel %vm7264_vm14, %v3216_v39, %v3126_v25  ;;  %vm7267_vm14 = vmmov %vm7262_vm4 }
 0x310   : > { %v3080_v49 = vpop.permute.xlu0 %3079  ;;  %v3240_v3 = vsel %vm7265_vm7, %v3228_v58, %v6516_v12  ;;  %vm7268_vm4 = vmmov %vm7263_vm8 }
 0x311   : > { %v3182_v1 = vsel %vm1819_vm6, %v3169_v29, %v3080_v49  ;;  %v3142_v23 = vpop.permute.xlu1 %3141  ;;  %v3252_v9 = vsel %vm7260_vm2, %v3240_v3, %v3150_v57  ;;  %vm7270_vm8 = vmmov %vm7265_vm7  ;;  %vm7272_vm7 = vsmask.f32 4352  ;;  %vm7274_vm2 = vcmask 31744  }
 0x312   : > { %v3194_v28 = vsel %vm7266_vm9, %v3182_v1, %v3092_v60  ;;  %5318 = vmatmul.mubr.msk.bf16.gmra.mrb[4].mxu1 %vm7261_vm3, %v3252_v9  ;;  %v2387_v60 = vor.u32 %v2386_v18, %v2383_v14  ;;  %vm7273_vm9 = vmmov %vm7261_vm3  ;;  %vm7275_vm3 = vcmask 97280  }
 0x313   : > { %v3206_v7 = vsel %vm7267_vm14, %v3194_v28, %v6520_v54 }
 0x314   : > { %v3140_v8 = vpop.permute.xlu0 %3139  ;;  %v3218_v61 = vsel %vm7268_vm4, %v3206_v7, %v3116_v35  ;;  %v2396_v54 = vsel %vm7272_vm7, %v2387_v60, %v2395_v42  ;;  %vm7276_vm7 = vmmov %vm7273_vm9 }
 0x315   : > { %v3106_v12 = vpop.permute.xlu1 %3105  ;;  %v3172_v17 = vsel %vm7274_vm2, %v2396_v54, %v6522_v53  ;;  %v6581_v53 = vld [vmem:[%s7109_s5] ss:$0 sm:$0xff] }
 0x316   : > { %v3184_v31 = vsel %vm1819_vm6, %v3172_v17, %v3082_v16  ;;  %v6583_v16 = vstv %s5198_s1 }
 0x317   : > { %v3437_v40 = vadd.s32 1, %v6583_v16  ;;  %v6614_v9 = vadd.s32 3, %v6583_v16 }
 0x318   : > { %v3128_v27 = vpop.permute.xlu0 %3127 }
 0x319   : > { %v3230_v38 = vsel %vm7269_vm5, %v3218_v61, %v3128_v27  ;;  %vm3449_vm2 = vcmp.lt.s32.totalorder %v3437_v40, 16 }
 0x31a   : > { %v3242_v57 = vsel %vm7270_vm8, %v3230_v38, %v3140_v8  ;;  %v6617_v8 = vadd.s32 2, %v6583_v16 }
 0x31b   : > { %v3130_v4 = vpop.permute.xlu1 %3129 }
 0x31c   : > { %v3152_v0 = vpop.permute.xlu0 %3151 }
 0x31d   : > { %v3254_v25 = vsel %vm7271_vm15, %v3242_v57, %v3152_v0 }
 0x31e   : > { %5321 = vmatprep.mubr.msk.bf16.mxu1 %vm7273_vm9, %v3254_v25  ;;  %vm3443_vm9 = vcmp.ge.s32.totalorder %v3437_v40, 0 }
 0x31f   : > { %v3094_v32 = vpop.permute.xlu1 %3093 }
 0x320   : > { %v3196_v20 = vsel %vm7275_vm3, %v3184_v31, %v3094_v32  ;;  %vm3442_vm3 = vcmp.ge.s32.totalorder %v6583_v16, 0 }
 0x321   : > { %v3208_v46 = vsel %vm7267_vm14, %v3196_v20, %v3106_v12  ;;  %vm3448_vm14 = vcmp.lt.s32.totalorder %v6583_v16, 16 }
 0x323   : > { %v3118_v35 = vpop.permute.xlu1 %3117 }
 0x324   : > { %v3220_v62 = vsel %vm7268_vm4, %v3208_v46, %v3118_v35  ;;  %vm3455_vm4 = vmand %vm3443_vm9, %vm3449_vm2  ;;  %vm7280_vm9 = vsmask.f32 3328  ;;  %vm7281_vm2 = vsmask.f32 4352 }
 0x325   : > { %v3232_v26 = vsel %vm7269_vm5, %v3220_v62, %v3130_v4  ;;  %vm3454_vm5 = vmand %vm3442_vm3, %vm3448_vm14  ;;  %vm3445_vm3 = vcmp.ge.s32.totalorder %v6614_v9, 0  ;;  %vm3451_vm14 = vcmp.lt.s32.totalorder %v6614_v9, 16 }
 0x326   : > { %v3244_v37 = vsel %vm7270_vm8, %v3232_v26, %v3142_v23  ;;  %vm7277_vm8 = vcmask 1043456  }
 0x327   : > { %v3154_v34 = vpop.permute.xlu1 %3153 }
 0x328   : > { %v3256_v43 = vsel %vm7271_vm15, %v3244_v37, %v3154_v34  ;;  %vm7278_vm15 = vmmov %vm7277_vm8 }
 0x329   : > { %5322 = vmatmul.mubr.msk.bf16.gmra.mrb[8].mxu1 %vm7276_vm7, %v3256_v43  ;;  %vm7279_vm7 = vmmov %vm7277_vm8 }
 0x3c4   : > { %v5315_v33 = vpop.f32.mrb[0].mxu1 }
 0x3c5   : > { %v3382_v52 = vmul.f32 %v5315_v33, %v6581_v53  ;;  %v3326_v5 = vpop.f32.mrb[1].mxu1 }
 0x3c6   : > { %v3380_v44 = vmul.f32 %v6581_v53, %v3326_v5  ;;  %v5316_v63 = vpop.f32.mrb[2].mxu1 }
 0x3c7   : > { %v3401_v45 = vadd.f32 %v6588_v10, %v3382_v52  ;;  %v3383_v47 = vmul.f32 %v5316_v63, %v6581_v53  ;;  %v3329_v55 = vpop.f32.mrb[3].mxu1 }
 0x3c8   : > { %v3399_v19 = vadd.f32 %v6588_v10, %v3380_v44  ;;  %v3381_v30 = vmul.f32 %v6581_v53, %v3329_v55 }
 0x3c9   : > { %v3413_v48 = vmul.f32 0.1, %v3401_v45  ;;  %v3402_v50 = vadd.f32 %v6588_v10, %v3383_v47 }
 0x3ca   : > { %v3411_v15 = vmul.f32 0.1, %v3399_v19  ;;  %v3400_v24 = vadd.f32 %v6588_v10, %v3381_v30 }
 0x3cb   : > { %v6601_v36 = vmax.f32 %v3401_v45, %v3413_v48  ;;  %v3414_v56 = vmul.f32 0.1, %v3402_v50 }
 0x3cc   : > { %v3423_v41 = vmax.f32 %v3399_v19, %v3411_v15  ;;  %v3412_v39 = vmul.f32 0.1, %v3400_v24 }
 0x3cd   : > { %v6603_v29 = vmax.f32 %v3402_v50, %v3414_v56  ;;  %v3474_v49 = vsel %vm3455_vm4, %v6601_v36, 0.0 }
 0x3ce   : > { %v3424_v58 = vmax.f32 %v3400_v24, %v3412_v39  ;;  %v3472_v1 = vsel %vm3454_vm5, %v3423_v41, 0.0 }
 0x3cf   : > { %v5437_v11 = vpack.i.bf16 %v6603_v29, %v6601_v36  ;;  %v3475_v51 = vsel %vm3455_vm4, %v6603_v29, 0.0  ;;  %vm7282_vm4 = vmmov %vm7280_vm9 }
 0x3d0   : > { %v3485_v3 = vpack.c.bf16 %v3475_v51, %v3474_v49  ;;  %v3473_v59 = vsel %vm3454_vm5, %v3424_v58, 0.0  ;;  %vm3444_vm5 = vcmp.ge.s32.totalorder %v6617_v8, 0 }
 0x3d1   : > { %v3484_v13 = vpack.c.bf16 %v3473_v59, %v3472_v1 }
 0x3d2   : > { %v3497_v28 = vrot.slane %v3485_v3, 4 }
 0x3d3   : > { %v3496_v23 = vrot.slane %v3484_v13, 4 }
 0x3d4   : > { %3510 = vst.msk [vmem:[#allocation3 + $0x10] sm:$0xf0] %vm520_vm1, %v3497_v28 }
 0x3d5   : > { %3511 = vst.msk [vmem:[#allocation3 + $0x18] sm:$0xf] %vm509_vm0, %v3497_v28  ;;  %3509 = vst.msk [vmem:[#allocation3 + $0x8] sm:$0xf] %vm509_vm0, %v3496_v23 }
 0x3d6   : > { %3508 = vst.msk [vmem:[#allocation3] sm:$0xf0] %vm520_vm1, %v3496_v23 }
 0x3db   : > { %v3768_v14 = vld [vmem:[#allocation3 + $0x10] sm:$0xf0] }
 0x3dc   : > { %v3693_v7 = vld [vmem:[#allocation3 + $0x18] sm:$0xf]  ;;  %v3780_v2 = vrot.slane %v3768_v14, 4  ;;  %v3597_v12 = vld [vmem:[#allocation3 + $0x10] sm:$0xf0]  ;;  %v3797_v55 = vshrl.u32 %v3768_v14, 16 }
 0x3dd   : > { %v6619_v18 = vld [vmem:[#allocation3 + $0x18] sm:$0xf]  ;;  %v3781_v21 = vrot.slane %v3693_v7, 4  ;;  %v3709_v27 = vshrl.u32 %v3693_v7, 16  ;;  %v3611_v38 = vrot.slane %v3597_v12, 4  ;;  %v3642_v42 = vshrl.u32 %v3597_v12, 16 }
 0x3de   : > { %v3612_v61 = vrot.slane %v6619_v18, 4  ;;  %v3621_v60 = vld [vmem:[#allocation3 + $0x18] sm:$0x1f]  ;;  %v3645_v4 = vshll.u32 %v3597_v12, 16  ;;  %v3712_v57 = vshll.u32 %v3693_v7, 16  ;;  %v3800_v48 = vshll.u32 %v3768_v14, 16 }
 0x3df   : > { %v3782_v0 = vsel %vm7277_vm8, %v3780_v2, %v3781_v21  ;;  %v3650_v25 = vshrl.u32 %v3621_v60, 16  ;;  %v3653_v54 = vshll.u32 %v3621_v60, 16  ;;  %v6623_v17 = vld [vmem:[#allocation3 + $0x8] sm:$0xf]  ;;  %v3596_v31 = vld [vmem:[#allocation3] sm:$0xf0] }
 0x3e0   : > { %4060 = vrot.lane.b32.xlu0 %v3782_v0, %s7179_s25  ;;  %v3613_v32 = vsel %vm7278_vm15, %v3611_v38, %v3612_v61  ;;  %v3644_v20 = vrot.slane %v3642_v42, 4  ;;  %v3647_v46 = vrot.slane %v3645_v4, 5  ;;  %v3608_v35 = vrot.slane %v3596_v31, 4  ;;  %v3692_v62 = vld [vmem:[#allocation3 + $0x10] sm:$0xf8]  ;;  %vm3457_vm15 = vmand %vm3445_vm3, %vm3451_vm14 }
 0x3e1   : > { %4038 = vrot.lane.b32.xlu1 %v3613_v32, %s7188_s23  ;;  %v3652_v26 = vrot.slane %v3650_v25, 4  ;;  %v3655_v37 = vrot.slane %v3653_v54, 5  ;;  %v3609_v34 = vrot.slane %v6623_v17, 4  ;;  %v3701_v43 = vshrl.u32 %v3692_v62, 16  ;;  %v3792_v33 = vld [vmem:[#allocation3 + $0x18] sm:$0x1f] }
 0x3e2   : > { %v3648_v52 = vor.u32 %v3647_v46, %v3644_v20  ;;  %v3704_v40 = vshll.u32 %v3692_v62, 16  ;;  %v3711_v5 = vrot.slane %v3709_v27, 3  ;;  %v3714_v44 = vrot.slane %v3712_v57, 4  ;;  %v3620_v15 = vld [vmem:[#allocation3 + $0x8] sm:$0x1f] }
 0x3e3   : > { %v3656_v63 = vor.u32 %v3655_v37, %v3652_v26  ;;  %v3610_v45 = vsel %vm7279_vm7, %v3608_v35, %v3609_v34  ;;  %v3703_v47 = vrot.slane %v3701_v43, 3  ;;  %v3805_v50 = vshrl.u32 %v3792_v33, 16 }
 0x3e4   : > { %4036 = vrot.lane.b32.xlu0 %v3610_v45, %s7188_s23  ;;  %v3706_v19 = vrot.slane %v3704_v40, 4  ;;  %v3715_v30 = vor.u32 %v3714_v44, %v3711_v5  ;;  %v3799_v56 = vrot.slane %v3797_v55, 4  ;;  %v3808_v41 = vshll.u32 %v3792_v33, 16 }
 0x3e5   : > { %v3657_v24 = vsel %vm7280_vm9, %v3648_v52, %v3656_v63  ;;  %v3625_v39 = vshrl.u32 %v3596_v31, 16  ;;  %v3802_v49 = vrot.slane %v3800_v48, 5  ;;  %v3807_v51 = vrot.slane %v3805_v50, 4  ;;  %v5319_v3 = vpop.f32.mrb[4].mxu1  ;;  %vm7283_vm9 = vmmov %vm7282_vm4 }
 0x3e6   : > { %4046 = vrot.lane.b32.xlu1 %v3657_v24, %s7181_s24  ;;  %v3707_v58 = vor.u32 %v3706_v19, %v3703_v47  ;;  %v3628_v1 = vshll.u32 %v3596_v31, 16  ;;  %v3810_v59 = vrot.slane %v3808_v41, 5  ;;  %v3633_v28 = vshrl.u32 %v3620_v15, 16  ;;  %v3342_v14 = vpop.f32.mrb[5].mxu1 }
 0x3e7   : > { %v3627_v13 = vrot.slane %v3625_v39, 4  ;;  %v3636_v23 = vshll.u32 %v3620_v15, 16  ;;  %v3386_v7 = vmul.f32 %v5319_v3, %v6581_v53  ;;  %v3803_v21 = vor.u32 %v3802_v49, %v3799_v56  ;;  %v5320_v27 = vpop.f32.mrb[6].mxu1 }
 0x3e8   : > { %v3716_v2 = vsel %vm7281_vm2, %v3707_v58, %v3715_v30  ;;  %v3630_v12 = vrot.slane %v3628_v1, 5  ;;  %v3384_v61 = vmul.f32 %v6581_v53, %v3342_v14  ;;  %v3811_v38 = vor.u32 %v3810_v59, %v3807_v51  ;;  %v3345_v0 = vpop.f32.mrb[7].mxu1 }
 0x3e9   : > { %4052 = vrot.lane.b32.xlu0 %v3716_v2, %s7178_s22  ;;  %v3635_v60 = vrot.slane %v3633_v28, 4  ;;  %v3638_v42 = vrot.slane %v3636_v23, 5  ;;  %v3405_v4 = vadd.f32 %v6588_v10, %v3386_v7  ;;  %v3387_v57 = vmul.f32 %v5320_v27, %v6581_v53 }
 0x3ea   : > { %v3403_v25 = vadd.f32 %v6588_v10, %v3384_v61  ;;  %v3385_v54 = vmul.f32 %v6581_v53, %v3345_v0  ;;  %v3631_v31 = vor.u32 %v3630_v12, %v3627_v13  ;;  %v3812_v46 = vsel %vm7282_vm4, %v3803_v21, %v3811_v38 }
 0x3eb   : > { %v3417_v32 = vmul.f32 0.1, %v3405_v4  ;;  %v3406_v20 = vadd.f32 %v6588_v10, %v3387_v57  ;;  %v3639_v35 = vor.u32 %v3638_v42, %v3635_v60  ;;  %vm3450_vm8 = vcmp.lt.s32.totalorder %v6617_v8, 16 }
 0x3ec   : > { %v3415_v62 = vmul.f32 0.1, %v3403_v25  ;;  %v3404_v26 = vadd.f32 %v6588_v10, %v3385_v54  ;;  %vm3456_vm7 = vmand %vm3444_vm5, %vm3450_vm8  ;;  %v3441_v50 = vadd.s32 5, %v6583_v16  ;;  %v3440_v15 = vadd.s32 4, %v6583_v16 }
 0x3ed   : > { %4068 = vrot.lane.b32.xlu0 %v3812_v46, %s7176_s28  ;;  %v6649_v37 = vmax.f32 %v3405_v4, %v3417_v32  ;;  %v3418_v34 = vmul.f32 0.1, %v3406_v20  ;;  %v3640_v8 = vsel %vm7283_vm9, %v3631_v31, %v3639_v35  ;;  %vm7284_vm5 = vcmask 1043456  }
 0x3ee   : > { %v6655_v43 = vmax.f32 %v3403_v25, %v3415_v62  ;;  %v3416_v33 = vmul.f32 0.1, %v3404_v26  ;;  %vm3447_vm2 = vcmp.ge.s32.totalorder %v3441_v50, 0  ;;  %vm3453_vm3 = vcmp.lt.s32.totalorder %v3441_v50, 16  ;;  %vm7285_vm8 = vmmov %vm7284_vm5 }
 0x3ef   : > { %v6657_v52 = vmax.f32 %v3406_v20, %v3418_v34  ;;  %v3478_v5 = vsel %vm3457_vm15, %v6649_v37, 0.0  ;;  %vm3446_vm14 = vcmp.ge.s32.totalorder %v3440_v15, 0  ;;  %vm3452_vm4 = vcmp.lt.s32.totalorder %v3440_v15, 16 }
 0x3f0   : > { %v6660_v40 = vmax.f32 %v3404_v26, %v3416_v33  ;;  %v3476_v63 = vsel %vm3456_vm7, %v6655_v43, 0.0  ;;  %vm6719_vm9 = vmand %vm3446_vm14, %vm3452_vm4  ;;  %vm7293_vm14 = vsmask.f32 3328 }
 0x3f1   : > { %4044 = vrot.lane.b32.xlu0 %v3640_v8, %s7181_s24  ;;  %v5447_v44 = vpack.i.bf16 %v6657_v52, %v6649_v37  ;;  %v3479_v9 = vsel %vm3457_vm15, %v6657_v52, 0.0  ;;  %vm6709_vm15 = vmand %vm3447_vm2, %vm3453_vm3 }
 0x3f2   : > { %v3487_v45 = vpack.c.bf16 %v3479_v9, %v3478_v5  ;;  %v5442_v47 = vpack.i.bf16 %v6660_v40, %v6655_v43  ;;  %v3477_v55 = vsel %vm3456_vm7, %v6660_v40, 0.0  ;;  %vm7288_vm7 = vmmov %vm7284_vm5  ;;  %v3537_v40 = vshrl.u32 %v6623_v17, 16 }
 0x3f3   : > { %v3486_v19 = vpack.c.bf16 %v3477_v55, %v3476_v63  ;;  %vm7291_vm2 = vmmov %vm7284_vm5 }
 0x3f4   : > { %v3499_v30 = vrot.slane %v3487_v45, 4  ;;  %vm7292_vm3 = vmmov %vm7291_vm2 }
 0x3f5   : > { %v3498_v48 = vrot.slane %v3486_v19, 4  ;;  %vm7294_vm4 = vmmov %vm7291_vm2 }
 0x3f6   : > { %3514 = vst.msk [vmem:[#allocation3 + $0x30] sm:$0xf0] %vm520_vm1, %v3499_v30 }
 0x3f7   : > { %3515 = vst.msk [vmem:[#allocation3 + $0x38] sm:$0xf] %vm509_vm0, %v3499_v30  ;;  %3513 = vst.msk [vmem:[#allocation3 + $0x28] sm:$0xf] %vm509_vm0, %v3498_v48 }
 0x3f8   : > { %3512 = vst.msk [vmem:[#allocation3 + $0x20] sm:$0xf0] %vm520_vm1, %v3498_v48 }
 0x3fc   : > { %v5323_v24 = vpop.f32.mrb[8].mxu1 }
 0x3fd   : > { %v3941_v41 = vld [vmem:[#allocation3 + $0x30] sm:$0xf0]  ;;  %v3390_v39 = vmul.f32 %v5323_v24, %v6581_v53  ;;  %v3358_v58 = vpop.f32.mrb[9].mxu1 }
 0x3fe   : > { %v6677_v56 = vld [vmem:[#allocation3 + $0x38] sm:$0xf]  ;;  %v3955_v49 = vrot.slane %v3941_v41, 4  ;;  %v3986_v3 = vshrl.u32 %v3941_v41, 16  ;;  %v3388_v59 = vmul.f32 %v6581_v53, %v3358_v58  ;;  %v5324_v16 = vpop.f32.mrb[10].mxu1  ;;  %v3989_v5 = vshll.u32 %v3941_v41, 16 }
 0x3ff   : > { %v3956_v51 = vrot.slane %v6677_v56, 4  ;;  %v6681_v1 = vld [vmem:[#allocation3 + $0x38] sm:$0xf]  ;;  %v6684_v13 = vld [vmem:[#allocation3 + $0x30] sm:$0xf0]  ;;  %v3409_v7 = vadd.f32 %v6588_v10, %v3390_v39  ;;  %v3391_v14 = vmul.f32 %v5324_v16, %v6581_v53  ;;  %v3361_v2 = vpop.f32.mrb[11].mxu1 }
 0x400   : > { %v3787_v28 = vrot.slane %v6681_v1, 4  ;;  %v6687_v23 = vld [vmem:[#allocation3 + $0x38] sm:$0xf]  ;;  %v3786_v12 = vrot.slane %v6684_v13, 4  ;;  %v6693_v61 = vld [vmem:[#allocation3 + $0x30] sm:$0xf0]  ;;  %v3407_v38 = vadd.f32 %v6588_v10, %v3388_v59  ;;  %v3389_v60 = vmul.f32 %v6581_v53, %v3361_v2 }
 0x401   : > { %v3957_v21 = vsel %vm7284_vm5, %v3955_v49, %v3956_v51  ;;  %v6695_v27 = vld [vmem:[#allocation3 + $0x28] sm:$0xf]  ;;  %v3617_v42 = vrot.slane %v6693_v61, 4  ;;  %v3618_v4 = vrot.slane %v6687_v23, 4  ;;  %v6702_v57 = vld [vmem:[#allocation3 + $0x20] sm:$0xf0]  ;;  %v3410_v25 = vadd.f32 %v6588_v10, %v3391_v14 }
 0x402   : > { %4086 = vrot.lane.b32.xlu1 %v3957_v21, %s7177_s19  ;;  %v3421_v0 = vmul.f32 0.1, %v3409_v7  ;;  %v3788_v54 = vsel %vm7285_vm8, %v3786_v12, %v3787_v28  ;;  %v3952_v31 = vrot.slane %v6702_v57, 4  ;;  %v3965_v32 = vld [vmem:[#allocation3 + $0x38] sm:$0x1f]  ;;  %v3408_v46 = vadd.f32 %v6588_v10, %v3389_v60 }
 0x403   : > { %v3419_v20 = vmul.f32 0.1, %v3407_v38  ;;  %4064 = vrot.lane.b32.xlu0 %v3788_v54, %s7179_s25  ;;  %v3619_v35 = vsel %vm7288_vm7, %v3617_v42, %v3618_v4  ;;  %v3953_v62 = vrot.slane %v6695_v27, 4  ;;  %v3422_v33 = vmul.f32 0.1, %v3410_v25 }
 0x404   : > { %v3433_v26 = vmax.f32 %v3409_v7, %v3421_v0  ;;  %v3988_v8 = vrot.slane %v3986_v3, 4  ;;  %v6723_v9 = vld [vmem:[#allocation3 + $0x20] sm:$0xf0]  ;;  %v3420_v10 = vmul.f32 0.1, %v3408_v46  ;;  %v3994_v55 = vshrl.u32 %v3965_v32, 16 }
 0x405   : > { %v6725_v63 = vmax.f32 %v3407_v38, %v3419_v20  ;;  %v3954_v45 = vsel %vm7291_vm2, %v3952_v31, %v3953_v62  ;;  %v6729_v19 = vld [vmem:[#allocation3 + $0x28] sm:$0xf]  ;;  %v3434_v48 = vmax.f32 %v3410_v25, %v3422_v33  ;;  %v3991_v50 = vrot.slane %v3989_v5, 5  ;;  %v3696_v24 = vld [vmem:[#allocation3 + $0x30] sm:$0xf8] }
 0x406   : > { %4042 = vrot.lane.b32.xlu1 %v3619_v35, %s7188_s23  ;;  %v3482_v30 = vsel %vm6709_vm15, %v3433_v26, 0.0  ;;  %v3997_v15 = vshll.u32 %v3965_v32, 16  ;;  %v6736_v39 = vmax.f32 %v3408_v46, %v3420_v10  ;;  %v3996_v58 = vrot.slane %v3994_v55, 4  ;;  %v6748_v21 = vld [vmem:[#allocation3 + $0x20] sm:$0xf0] }
 0x407   : > { %v3480_v41 = vsel %vm6719_vm9, %v6725_v63, 0.0  ;;  %4084 = vrot.lane.b32.xlu0 %v3954_v45, %s7177_s19  ;;  %v3783_v49 = vrot.slane %v6723_v9, 4  ;;  %v3483_v51 = vsel %vm6709_vm15, %v3434_v48, 0.0  ;;  %v3992_v3 = vor.u32 %v3991_v50, %v3988_v8  ;;  %v6751_v4 = vld [vmem:[#allocation3 + $0x28] sm:$0xf] }
 0x408   : > { %v3999_v59 = vrot.slane %v3997_v15, 5  ;;  %v3784_v16 = vrot.slane %v6729_v19, 4  ;;  %v3489_v28 = vpack.c.bf16 %v3483_v51, %v3482_v30  ;;  %v5452_v7 = vpack.i.bf16 %v6736_v39, %v6725_v63  ;;  %v3794_v32 = vld [vmem:[#allocation3 + $0x38] sm:$0x1f]  ;;  %v3866_v62 = vld [vmem:[#allocation3 + $0x30] sm:$0xf8] }
 0x409   : > { %v3481_v14 = vsel %vm6719_vm9, %v6736_v39, 0.0  ;;  %v3735_v2 = vshrl.u32 %v3696_v24, 16  ;;  %v3738_v42 = vshll.u32 %v3696_v24, 16  ;;  %v3743_v54 = vshrl.u32 %v6681_v1, 16  ;;  %v3864_v15 = vld [vmem:[#allocation3 + $0x20] sm:$0xf8] }
 0x40a   : > { %v3488_v12 = vpack.c.bf16 %v3481_v14, %v3480_v41  ;;  %v4000_v38 = vor.u32 %v3999_v59, %v3996_v58  ;;  %v3785_v60 = vsel %vm7292_vm3, %v3783_v49, %v3784_v16  ;;  %v3501_v0 = vrot.slane %v3489_v28, 4  ;;  %v5463_v51 = vld [vmem:[%s7111_s7] sm:$0xff]  }
 0x40b   : > { %4062 = vrot.lane.b32.xlu1 %v3785_v60, %s7179_s25  ;;  %v3737_v25 = vrot.slane %v3735_v2, 3  ;;  %v3746_v31 = vshll.u32 %v6681_v1, 16  ;;  %v3740_v46 = vrot.slane %v3738_v42, 4  ;;  %v3614_v35 = vrot.slane %v6748_v21, 4  ;;  %5325 = vmatprep.subr.bf16.mxu1 %v5463_v51 }
 0x40c   : > { %v3500_v53 = vrot.slane %v3488_v12, 4  ;;  %v4001_v20 = vsel %vm7293_vm14, %v3992_v3, %v4000_v38  ;;  %3518 = vst.msk [vmem:[#allocation3 + $0x50] sm:$0xf0] %vm520_vm1, %v3501_v0  ;;  %v3745_v26 = vrot.slane %v3743_v54, 3  ;;  %v3615_v33 = vrot.slane %v6751_v4, 4  ;;  %5326 = vmatpush3.bf16.msra.mxu1 %v5463_v51 }
 0x40d   : > { %3519 = vst.msk [vmem:[#allocation3 + $0x58] sm:$0xf] %vm509_vm0, %v3501_v0  ;;  %4094 = vrot.lane.b32.xlu0 %v4001_v20, %s7180_s21  ;;  %v3748_v34 = vrot.slane %v3746_v31, 4  ;;  %v3831_v1 = vshrl.u32 %v6684_v13, 16  ;;  %v3741_v8 = vor.u32 %v3740_v46, %v3737_v25  ;;  %v3834_v5 = vshll.u32 %v6684_v13, 16 }
 0x40e   : > { %3516 = vst.msk [vmem:[#allocation3 + $0x40] sm:$0xf0] %vm520_vm1, %v3500_v53  ;;  %v3839_v10 = vshrl.u32 %v3794_v32, 16  ;;  %v3842_v45 = vshll.u32 %v3794_v32, 16  ;;  %v3616_v30 = vsel %vm7294_vm4, %v3614_v35, %v3615_v33  ;;  %v3890_v50 = vshrl.u32 %v3866_v62, 16  ;;  %vm7296_vm1 = vmmov %vm7293_vm14 }
 0x40f   : > { %3517 = vst.msk [vmem:[#allocation3 + $0x48] sm:$0xf] %vm509_vm0, %v3500_v53  ;;  %v3749_v55 = vor.u32 %v3748_v34, %v3745_v26  ;;  %v3833_v48 = vrot.slane %v3831_v1, 4  ;;  %4040 = vrot.lane.b32.xlu1 %v3616_v30, %s7188_s23  ;;  %v3836_v24 = vrot.slane %v3834_v5, 5  ;;  %v3893_v49 = vshll.u32 %v3866_v62, 16  ;;  %vm7299_vm15 = vmmov %vm7296_vm1 }
 0x410   : > { %v3841_v41 = vrot.slane %v3839_v10, 4  ;;  %v3844_v58 = vrot.slane %v3842_v45, 5  ;;  %vm7295_vm0 = vsmask.f32 4352  ;;  %v3892_v3 = vrot.slane %v3890_v50, 3  ;;  %vm7300_vm7 = vmmov %vm7296_vm1 }
 0x411   : > { %v3750_v13 = vsel %vm7295_vm0, %v3741_v8, %v3749_v55  ;;  %v3898_v59 = vshrl.u32 %v6677_v56, 16  ;;  %v3901_v16 = vshll.u32 %v6677_v56, 16  ;;  %v3837_v28 = vor.u32 %v3836_v24, %v3833_v48  ;;  %v3623_v25 = vld [vmem:[#allocation3 + $0x38] sm:$0x1f]  ;;  %v3964_v1 = vld [vmem:[#allocation3 + $0x28] sm:$0x1f]  ;;  %vm7297_vm5 = vmmov %vm7295_vm0 }
 0x412   : > { %4056 = vrot.lane.b32.xlu0 %v3750_v13, %s7178_s22  ;;  %v3845_v14 = vor.u32 %v3844_v58, %v3841_v41  ;;  %v3895_v2 = vrot.slane %v3893_v49, 4  ;;  %v3873_v12 = vshrl.u32 %v3864_v15, 16  ;;  %v3876_v42 = vshll.u32 %v3864_v15, 16  ;;  %vm7298_vm8 = vmmov %vm7295_vm0 }
 0x413   : > { %v3900_v38 = vrot.slane %v3898_v59, 3  ;;  %v3903_v60 = vrot.slane %v3901_v16, 4  ;;  %v3881_v0 = vshrl.u32 %v6695_v27, 16  ;;  %v3884_v56 = vshll.u32 %v6695_v27, 16  ;;  %v3694_v27 = vld [vmem:[#allocation3 + $0x20] sm:$0xf8]  ;;  %vm7302_vm2 = vmmov %vm7295_vm0 }
 0x414   : > { %v3846_v54 = vsel %vm7296_vm1, %v3837_v28, %v3845_v14  ;;  %v3896_v31 = vor.u32 %v3895_v2, %v3892_v3  ;;  %v3875_v32 = vrot.slane %v3873_v12, 3  ;;  %v3878_v20 = vrot.slane %v3876_v42, 4  ;;  %v3622_v2 = vld [vmem:[#allocation3 + $0x28] sm:$0x1f]  ;;  %vm7303_vm3 = vmmov %vm7296_vm1 }
 0x415   : > { %v3904_v53 = vor.u32 %v3903_v60, %v3900_v38  ;;  %v3883_v46 = vrot.slane %v3881_v0, 3  ;;  %v3676_v35 = vshrl.u32 %v6693_v61, 16  ;;  %v3886_v62 = vrot.slane %v3884_v56, 4  ;;  %vm7304_vm14 = vmmov %vm7294_vm4 }
 0x416   : > { %4072 = vrot.lane.b32.xlu0 %v3846_v54, %s7176_s28  ;;  %v3679_v26 = vshll.u32 %v6693_v61, 16  ;;  %v3684_v34 = vshrl.u32 %v3623_v25, 16  ;;  %v3687_v33 = vshll.u32 %v3623_v25, 16  ;;  %v3879_v5 = vor.u32 %v3878_v20, %v3875_v32  ;;  %v5464_v61 = vld [vmem:[%s7111_s7 + $0x8] sm:$0xff]   ;;  %vm7305_vm0 = vmmov %vm7296_vm1 }
 0x417   : > { %v3905_v8 = vsel %vm7297_vm5, %v3896_v31, %v3904_v53  ;;  %v3678_v10 = vrot.slane %v3676_v35, 4  ;;  %v3969_v45 = vshrl.u32 %v6702_v57, 16  ;;  %v3887_v55 = vor.u32 %v3886_v62, %v3883_v46  ;;  %5327 = vmatprep.subr.bf16.mxu1 %v5464_v61  ;;  %v6798_v31 = vld [vmem:[%s7111_s7 + $0x10] ss:$0 sps:$4 sm:$0x33]   ;;  %vm7306_vm1 = vmmov %vm7294_vm4 }
 0x418   : > { %4078 = vrot.lane.b32.xlu1 %v3905_v8, %s7182_s0  ;;  %v3681_v30 = vrot.slane %v3679_v26, 5  ;;  %v3686_v48 = vrot.slane %v3684_v34, 4  ;;  %v3689_v50 = vrot.slane %v3687_v33, 5  ;;  %v3972_v24 = vshll.u32 %v6702_v57, 16  ;;  %5328 = vmatpush3.bf16.msra.mxu1 %v5464_v61  ;;  %v3793_v46 = vld [vmem:[#allocation3 + $0x28] sm:$0x1f]  ;;  %vm7307_vm5 = vmmov %vm7302_vm2 }
 0x419   : > { %v3971_v15 = vrot.slane %v3969_v45, 4  ;;  %v3977_v41 = vshrl.u32 %v3964_v1, 16  ;;  %v3980_v58 = vshll.u32 %v3964_v1, 16  ;;  %v3888_v49 = vsel %vm7298_vm8, %v3879_v5, %v3887_v55  ;;  %v6802_v34 = vld [vmem:[#allocation3 + $0x58] sm:$0xf]  ;;  %vm7308_vm8 = vmmov %vm7305_vm0 }
 0x41a   : > { %v3682_v51 = vor.u32 %v3681_v30, %v3678_v10  ;;  %v3690_v13 = vor.u32 %v3689_v50, %v3686_v48  ;;  %v3718_v3 = vshrl.u32 %v3694_v27, 16  ;;  %4076 = vrot.lane.b32.xlu0 %v3888_v49, %s7182_s0  ;;  %v3974_v59 = vrot.slane %v3972_v24, 5  ;;  %v6804_v33 = vld [vmem:[#allocation3 + $0x50] sm:$0xf0]  ;;  %v3869_v1 = vld [vmem:[#allocation3 + $0x48] sm:$0xf] }
 0x41b   : > { %v3979_v16 = vrot.slane %v3977_v41, 4  ;;  %v3982_v28 = vrot.slane %v3980_v58, 5  ;;  %v3721_v14 = vshll.u32 %v3694_v27, 16  ;;  %v3726_v57 = vshrl.u32 %v6729_v19, 16  ;;  %v3942_v45 = vld [vmem:[#allocation3 + $0x40] sm:$0xf0] }
 0x41c   : > { %v3691_v12 = vsel %vm7299_vm15, %v3682_v51, %v3690_v13  ;;  %v3720_v38 = vrot.slane %v3718_v3, 3  ;;  %v3729_v60 = vshll.u32 %v6729_v19, 16  ;;  %v3975_v42 = vor.u32 %v3974_v59, %v3971_v15  ;;  %v3868_v50 = vld [vmem:[#allocation3 + $0x40] sm:$0xf8]  ;;  %vm7309_vm15 = vmmov %vm7302_vm2 }
 0x41d   : > { %4050 = vrot.lane.b32.xlu1 %v3691_v12, %s7181_s24  ;;  %v3983_v0 = vor.u32 %v3982_v28, %v3979_v16  ;;  %v3723_v25 = vrot.slane %v3721_v14, 4  ;;  %v3659_v54 = vshrl.u32 %v6748_v21, 16  ;;  %v3728_v32 = vrot.slane %v3726_v57, 3  ;;  %v6815_v28 = vld [vmem:[#allocation3 + $0x40] sm:$0xf0] }
 0x41e   : > { %v3731_v56 = vrot.slane %v3729_v60, 4  ;;  %v3662_v53 = vshll.u32 %v6748_v21, 16  ;;  %v3667_v20 = vshrl.u32 %v3622_v2, 16  ;;  %v3670_v26 = vshll.u32 %v3622_v2, 16  ;;  %v3699_v57 = vld [vmem:[#allocation3 + $0x48] sm:$0xf] }
 0x41f   : > { %v3984_v19 = vsel %vm7300_vm7, %v3975_v42, %v3983_v0  ;;  %v3724_v35 = vor.u32 %v3723_v25, %v3720_v38  ;;  %v3661_v62 = vrot.slane %v3659_v54, 4  ;;  %vm7301_vm9 = vcmask 1041408   ;;  %v3966_v54 = vld [vmem:[#allocation3 + $0x48] sm:$0x1f]  ;;  %vm7310_vm7 = vmmov %vm7302_vm2 }
 0x420   : > { %5351 = vmatprep.subr.msk.bf16.mxu1 %vm7301_vm9, %v6798_v31  ;;  %4092 = vrot.lane.b32.xlu0 %v3984_v19, %s7180_s21  ;;  %v3732_v8 = vor.u32 %v3731_v56, %v3728_v32  ;;  %v3664_v5 = vrot.slane %v3662_v53, 5  ;;  %v3669_v21 = vrot.slane %v3667_v20, 4  ;;  %v3814_v10 = vshrl.u32 %v6723_v9, 16  ;;  %vm7311_vm9 = vmmov %vm7305_vm0 }
 0x421   : > { %v3672_v27 = vrot.slane %v3670_v26, 5  ;;  %v3817_v55 = vshll.u32 %v6723_v9, 16  ;;  %v3822_v30 = vshrl.u32 %v3793_v46, 16  ;;  %v3825_v48 = vshll.u32 %v3793_v46, 16  ;;  %v3870_v46 = vld [vmem:[#allocation3 + $0x50] sm:$0xf8] }
 0x422   : > { %v3733_v61 = vsel %vm7302_vm2, %v3724_v35, %v3732_v8  ;;  %v3665_v15 = vor.u32 %v3664_v5, %v3661_v62  ;;  %v3816_v24 = vrot.slane %v3814_v10, 4  ;;  %v3961_v41 = vrot.slane %v6804_v33, 4 }
 0x423   : > { %4054 = vrot.lane.b32.xlu1 %v3733_v61, %s7178_s22  ;;  %v3673_v58 = vor.u32 %v3672_v27, %v3669_v21  ;;  %v3819_v49 = vrot.slane %v3817_v55, 5  ;;  %v3824_v51 = vrot.slane %v3822_v30, 4  ;;  %v3827_v13 = vrot.slane %v3825_v48, 5  ;;  %v3698_v48 = vld [vmem:[#allocation3 + $0x40] sm:$0xf8] }
 0x424   : > { %v3962_v3 = vrot.slane %v6802_v34, 4  ;;  %v3958_v59 = vrot.slane %v3942_v45, 4  ;;  %v3959_v16 = vrot.slane %v3869_v1, 4  ;;  %v3907_v9 = vshrl.u32 %v3868_v50, 16 }
 0x425   : > { %v3674_v14 = vsel %vm7303_vm3, %v3665_v15, %v3673_v58  ;;  %v3820_v2 = vor.u32 %v3819_v49, %v3816_v24  ;;  %v3828_v12 = vor.u32 %v3827_v13, %v3824_v51  ;;  %v3910_v38 = vshll.u32 %v3868_v50, 16  ;;  %vm7313_vm3 = vmmov %vm7306_vm1 }
 0x426   : > { %4048 = vrot.lane.b32.xlu0 %v3674_v14, %s7181_s24  ;;  %v3963_v60 = vsel %vm7304_vm14, %v3961_v41, %v3962_v3  ;;  %v3960_v42 = vsel %vm7294_vm4, %v3958_v59, %v3959_v16  ;;  %v3909_v0 = vrot.slane %v3907_v9, 3  ;;  %v3915_v25 = vshrl.u32 %v3869_v1, 16  ;;  %vm7314_vm14 = vmmov %vm7306_vm1 }
 0x427   : > { %v3829_v32 = vsel %vm7305_vm0, %v3820_v2, %v3828_v12  ;;  %v3912_v56 = vrot.slane %v3910_v38, 4  ;;  %v3918_v53 = vshll.u32 %v3869_v1, 16  ;;  %v3789_v20 = vrot.slane %v6815_v28, 4  ;;  %v3795_v12 = vld [vmem:[#allocation3 + $0x48] sm:$0x1f]  ;;  %vm7315_vm4 = vmmov %vm7305_vm0 }
 0x428   : > { %4070 = vrot.lane.b32.xlu1 %v3829_v32, %s7176_s28  ;;  %v3917_v19 = vrot.slane %v3915_v25, 3  ;;  %v3790_v35 = vrot.slane %v3699_v57, 4  ;;  %v4003_v62 = vshrl.u32 %v3942_v45, 16  ;;  %v4006_v26 = vshll.u32 %v3942_v45, 16  ;;  %vm7316_vm0 = vmmov %vm7307_vm5 }
 0x429   : > { %v3913_v8 = vor.u32 %v3912_v56, %v3909_v0  ;;  %v3920_v5 = vrot.slane %v3918_v53, 4  ;;  %v4011_v21 = vshrl.u32 %v3966_v54, 16  ;;  %v4014_v10 = vshll.u32 %v3966_v54, 16 }
 0x42a   : > { %4088 = vrot.lane.b32.xlu0 %v3960_v42, %s7177_s19  ;;  %v3791_v27 = vsel %vm7306_vm1, %v3789_v20, %v3790_v35  ;;  %v4005_v55 = vrot.slane %v4003_v62, 4  ;;  %v4008_v30 = vrot.slane %v4006_v26, 5  ;;  %v3924_v1 = vshrl.u32 %v3870_v46, 16 }
 0x42b   : > { %v3921_v50 = vor.u32 %v3920_v5, %v3917_v19  ;;  %v4013_v61 = vrot.slane %v4011_v21, 4  ;;  %v4016_v15 = vrot.slane %v4014_v10, 5  ;;  %v3927_v24 = vshll.u32 %v3870_v46, 16  ;;  %v3967_v19 = vld [vmem:[#allocation3 + $0x58] sm:$0x1f] }
 0x42c   : > { %4090 = vrot.lane.b32.xlu1 %v3963_v60, %s7177_s19  ;;  %v4009_v41 = vor.u32 %v4008_v30, %v4005_v55  ;;  %v3926_v45 = vrot.slane %v3924_v1, 3  ;;  %v3932_v58 = vshrl.u32 %v6802_v34, 16  ;;  %v3935_v49 = vshll.u32 %v6802_v34, 16 }
 0x42d   : > { %v3922_v51 = vsel %vm7307_vm5, %v3913_v8, %v3921_v50  ;;  %v4017_v13 = vor.u32 %v4016_v15, %v4013_v61  ;;  %v3929_v3 = vrot.slane %v3927_v24, 4  ;;  %v3752_v59 = vshrl.u32 %v3698_v48, 16 }
 0x42e   : > { %4080 = vrot.lane.b32.xlu0 %v3922_v51, %s7182_s0  ;;  %v3934_v16 = vrot.slane %v3932_v58, 3  ;;  %v3937_v9 = vrot.slane %v3935_v49, 4  ;;  %v3755_v14 = vshll.u32 %v3698_v48, 16  ;;  %v3760_v2 = vshrl.u32 %v3699_v57, 16 }
 0x42f   : > { %v4018_v38 = vsel %vm7308_vm8, %v4009_v41, %v4017_v13  ;;  %v3930_v60 = vor.u32 %v3929_v3, %v3926_v45  ;;  %v3754_v42 = vrot.slane %v3752_v59, 3  ;;  %v3763_v0 = vshll.u32 %v3699_v57, 16  ;;  %v3520_v59 = vld [vmem:[#allocation3] sm:$0xf8] }
 0x430   : > { %4066 = vrot.lane.b32.xlu1 %v3791_v27, %s7179_s25  ;;  %v3938_v34 = vor.u32 %v3937_v9, %v3934_v16  ;;  %v3757_v25 = vrot.slane %v3755_v14, 4  ;;  %v3762_v54 = vrot.slane %v3760_v2, 3  ;;  %v3848_v32 = vshrl.u32 %v6815_v28, 16 }
 0x431   : > { %v3765_v56 = vrot.slane %v3763_v0, 4  ;;  %v3851_v53 = vshll.u32 %v6815_v28, 16  ;;  %v3856_v20 = vshrl.u32 %v3795_v12, 16  ;;  %v3859_v46 = vshll.u32 %v3795_v12, 16 }
 0x432   : > { %4096 = vrot.lane.b32.xlu0 %v4018_v38, %s7180_s21  ;;  %v3939_v35 = vsel %vm7309_vm15, %v3930_v60, %v3938_v34  ;;  %v3758_v62 = vor.u32 %v3757_v25, %v3754_v42  ;;  %v3850_v26 = vrot.slane %v3848_v32, 4  ;;  %v4020_v57 = vshrl.u32 %v6804_v33, 16 }
 0x433   : > { %v3766_v8 = vor.u32 %v3765_v56, %v3762_v54  ;;  %v3853_v5 = vrot.slane %v3851_v53, 5  ;;  %v3858_v21 = vrot.slane %v3856_v20, 4  ;;  %v3861_v10 = vrot.slane %v3859_v46, 5  ;;  %v3522_v56 = vld [vmem:[#allocation3 + $0x10] sm:$0xf8] }
 0x434   : > { %4082 = vrot.lane.b32.xlu1 %v3939_v35, %s7182_s0  ;;  %v4023_v27 = vshll.u32 %v6804_v33, 16  ;;  %v4028_v28 = vshrl.u32 %v3967_v19, 16  ;;  %v4031_v55 = vshll.u32 %v3967_v19, 16  ;;  %v4022_v48 = vrot.slane %v4020_v57, 4 }
 0x435   : > { %v3767_v30 = vsel %vm7310_vm7, %v3758_v62, %v3766_v8  ;;  %v3854_v1 = vor.u32 %v3853_v5, %v3850_v26  ;;  %v3862_v50 = vor.u32 %v3861_v10, %v3858_v21  ;;  %vm7312_vm2 = vcmask 1041408   ;;  %v3524_v62 = vld [vmem:[#allocation3 + $0x20] sm:$0xf8] }
 0x436   : > { %5438 = vrot.lane.b32.xlu0 %v5437_v11, %s7188_s23  ;;  %v4025_v61 = vrot.slane %v4023_v27, 5  ;;  %v4030_v15 = vrot.slane %v4028_v28, 4  ;;  %v4033_v24 = vrot.slane %v4031_v55, 5  ;;  %v4197_v29 = vsel %vm7312_vm2, %v6798_v31, 0  ;;  %v4354_v11 = vld [vmem:[%s7114_s10] sm:$0xf] }
 0x437   : > { %v3863_v33 = vsel %vm7311_vm9, %v3854_v1, %v3862_v50  ;;  %5330 = vmatpush3.bf16.msra.mxu1 %v4197_v29  ;;  %v4369_v45 = vsel %vm7313_vm3, %v4354_v11, 0  ;;  %5352 = vmatprep.subr.msk.bf16.mxu0 %vm7314_vm14, %v4354_v11  ;;  %v3529_v9 = vshrl.u32 %v3520_v59, 16  ;;  %v3532_v43 = vshll.u32 %v3520_v59, 16  ;;  %vm7324_vm3 = vmmov %vm7316_vm0 }
 0x438   : > { %4058 = vrot.lane.b32.xlu1 %v3767_v30, %s7178_s22  ;;  %v4026_v41 = vor.u32 %v4025_v61, %v4022_v48  ;;  %v4034_v36 = vor.u32 %v4033_v24, %v4030_v15  ;;  %5340 = vmatpush3.bf16.msra.mxu0 %v4369_v45  ;;  %v3539_v2 = vrot.slane %v3537_v40, 3  ;;  %vm7317_vm1 = vcmask 31744   ;;  %s5248_s22 = sshll.u32 %s5555_s17, 3  ;;  %s5580_s17 = smov [#allocation4]  }
 0x439   : > { %v3534_v14 = vrot.slane %v3532_v43, 4  ;;  %v3554_v53 = vshrl.u32 %v6619_v18, 16  ;;  %v3557_v20 = vshll.u32 %v6619_v18, 16  ;;  %v3546_v46 = vshrl.u32 %v3522_v56, 16  ;;  %s5477_s19 = sshll.u32 %s5580_s17, 4  ;;  %s5478_s19 = int_to_ptr.vmem [resolvable:$false] %s5477_s19 }
 0x43a   : > { %5448 = vrot.lane.b32.xlu0 %v5447_v44, %s7188_s23  ;;  %v4035_v37 = vsel %vm7315_vm4, %v4026_v41, %v4034_v36  ;;  %v3549_v19 = vshll.u32 %v3522_v56, 16  ;;  %vm7318_vm5 = vcmask 97280   ;;  %v3571_v57 = vshrl.u32 %v6751_v4, 16  ;;  %vm7326_vm4 = vmmov %vm7317_vm1 }
 0x43b   : > { %v3574_v5 = vshll.u32 %v6751_v4, 16  ;;  %v3563_v21 = vshrl.u32 %v3524_v62, 16  ;;  %v3566_v10 = vshll.u32 %v3524_v62, 16  ;;  %vm7319_vm8 = vcmask 130048  }
 0x43c   : > { %4074 = vrot.lane.b32.xlu1 %v3863_v33, %s7176_s28  ;;  %v3556_v28 = vrot.slane %v3554_v53, 3  ;;  %v3559_v55 = vrot.slane %v3557_v20, 4  ;;  %v3548_v30 = vrot.slane %v3546_v46, 3  ;;  %v3551_v1 = vrot.slane %v3549_v19, 4  ;;  %s5247_s28 = sshll.u32 %s5551_s16, 1 }
 0x43d   : > { %v3573_v48 = vrot.slane %v3571_v57, 3  ;;  %vm7320_vm15 = vcmask 162816   ;;  %v3576_v61 = vrot.slane %v3574_v5, 4  ;;  %v3565_v15 = vrot.slane %v3563_v21, 3 }
 0x43e   : > { %v3568_v24 = vrot.slane %v3566_v10, 4  ;;  %vm7321_vm7 = vcmask 195584   ;;  %v3560_v36 = vor.u32 %v3559_v55, %v3556_v28  ;;  %v3552_v4 = vor.u32 %v3551_v1, %v3548_v30 }
 0x43f   : > { %vm7322_vm9 = vcmask 228352   ;;  %v3577_v45 = vor.u32 %v3576_v61, %v3573_v48  ;;  %vm7323_vm2 = vcmask 261120   ;;  %vm7325_vm14 = vcmask 293888  }
 0x440   : > { %4098 = vrot.lane.b32.xlu1 %v4035_v37, %s7180_s21  ;;  %v3569_v37 = vor.u32 %v3568_v24, %v3565_v15  ;;  %v5207_v24 = vld [vmem:[%s7113_s9] ss:$0 sm:$0xff]  ;;  %s5037_s21 = sadd.s32 %s5248_s22, %s5247_s28 }
 0x442   : > { %v3578_v59 = vsel %vm7316_vm0, %v3569_v37, %v3577_v45 }
 0x444   : > { %5443 = vrot.lane.b32.xlu1 %v5442_v47, %s7188_s23  ;;  %v3540_v47 = vshll.u32 %v6623_v17, 16 }
 0x446   : > { %v3542_v12 = vrot.slane %v3540_v47, 4  ;;  %v3526_v47 = vld [vmem:[#allocation3 + $0x30] sm:$0xf8] }
 0x448   : > { %5453 = vrot.lane.b32.xlu1 %v5452_v7, %s7188_s23  ;;  %v3531_v7 = vrot.slane %v3529_v9, 3  ;;  %v3543_v42 = vor.u32 %v3542_v12, %v3539_v2  ;;  %s5168_s23 = sshll.u32 %s7383_s18, 1 }
 0x449   : > { %s502_s15 = sadd.s32 %s5169_s3, %s5168_s23  ;;  %s5040_s23 = sshll.u32 %s6214_s27, 4  ;;  %s7041_s23 = int_to_ptr.vmem [resolvable:$true] %s5040_s23 }
 0x44a   : > { %v3535_v60 = vor.u32 %v3534_v14, %v3531_v7  ;;  %s5170_s18 = sshll.u32 %s502_s15, 3  ;;  %s5249_s3 = sshll.u32 %s5037_s21, 7 }
 0x44b   : > { %s6970_s25 = scalar_lea.vmem %s7117_s13, %s5170_s18  ;;  %s7363_s15 = sld [smem:[#allocation19_spill]] }
 0x44c   : > { %v3544_v34 = vsel %vm7316_vm0, %v3535_v60, %v3543_v42  ;;  %v3580_v60 = vshrl.u32 %v3526_v47, 16  ;;  %v3583_v42 = vshll.u32 %v3526_v47, 16  ;;  %s7365_s18 = sand.u32 1, %s5543_s30   ;;  %s5473_s16 = scalar_lea.vmem %s7041_s23, 256 }
 0x44d   : > { %s7051_s14 = scalar_lea.sflag [#allocation5], %s7365_s18  ;;  %p5474_p0 = scmp.ne.s32.totalorder %s7041_s23, %s5473_s16 }
 0x44e   : > { %v3585_v20 = vrot.slane %v3583_v42, 4  ;;  %p5480_p4 = scmp.lt.s32.totalorder %s7041_s23, %s5478_s19 }
 0x44f   : > { %p5475_p1 = pnand %p5474_p0, %p5708_p3 }
 0x451   : > { %s7364_s2 = smov %s7363_s15  ;;  %s7046_s0 = scalar_lea.hbm %s7363_s15, %s5249_s3 }
 0x452   : > { %v4061_v52 = vpop.permute.xlu0 %4060  ;;  %p5476_p2 = pneg %p5475_p1 }
 0x453   : > { %v4039_v58 = vpop.permute.xlu1 %4038 }
 0x456   : > { %v4037_v44 = vpop.permute.xlu0 %4036 }
 0x457   : > { %v4102_v25 = vsel %vm7317_vm1, %v3544_v34, %v4037_v44  ;;  %v3561_v44 = vsel %vm7324_vm3, %v3552_v4, %v3560_v36  ;;  %vm7327_vm1 = vmmov %vm7318_vm5 }
 0x458   : > { %v4047_v51 = vpop.permute.xlu1 %4046  ;;  %vm7333_vm3 = vmmov %vm7319_vm8 }
 0x45b   : > { %v4053_v31 = vpop.permute.xlu0 %4052 }
 0x45f   : > { %v4069_v49 = vpop.permute.xlu0 %4068 }
 0x463   : > { %v4045_v13 = vpop.permute.xlu0 %4044 }
 0x464   : > { %v4113_v17 = vsel %vm1819_vm6, %v4102_v25, %v4045_v13 }
 0x465   : > { %v4121_v35 = vsel %vm7318_vm5, %v4113_v17, %v4053_v31  ;;  %v4105_v31 = vsel %vm7326_vm4, %v3561_v44, %v4039_v58  ;;  %vm7328_vm5 = vmmov %vm7326_vm4  ;;  %v3588_v58 = vshrl.u32 %v6687_v23, 16  ;;  %vm7335_vm4 = vcmask 293888  }
 0x466   : > { %v4129_v27 = vsel %vm7319_vm8, %v4121_v35, %v4061_v52  ;;  %v4115_v13 = vsel %vm1819_vm6, %v4105_v31, %v4047_v51  ;;  %v3591_v51 = vshll.u32 %v6687_v23, 16  ;;  %v3582_v23 = vrot.slane %v3580_v60, 3 }
 0x467   : > { %v4137_v50 = vsel %vm7320_vm15, %v4129_v27, %v4069_v49  ;;  %vm7329_vm15 = vmmov %vm7327_vm1  ;;  %v3590_v17 = vrot.slane %v3588_v58, 3 }
 0x468   : > { %v3593_v53 = vrot.slane %v3591_v51, 4  ;;  %v3586_v57 = vor.u32 %v3585_v20, %v3582_v23 }
 0x474   : > { %v6869_v3 = vpop.permute.xlu1 %4086 }
 0x475   : > { %v6871_v16 = vpop.permute.xlu0 %4064 }
 0x478   : > { %v6875_v63 = vpop.permute.xlu1 %4042 }
 0x479   : > { %v4085_v39 = vpop.permute.xlu0 %4084 }
 0x47d   : > { %v4063_v38 = vpop.permute.xlu1 %4062 }
 0x47f   : > { %v6877_v0 = vpop.permute.xlu0 %4094 }
 0x481   : > { %v4041_v54 = vpop.permute.xlu1 %4040 }
 0x482   : > { %v4108_v43 = vsel %vm7328_vm5, %v3578_v59, %v4041_v54 }
 0x484   : > { %v4057_v32 = vpop.permute.xlu0 %4056 }
 0x488   : > { %v4073_v26 = vpop.permute.xlu0 %4072 }
 0x48a   : > { %v4079_v8 = vpop.permute.xlu1 %4078 }
 0x48c   : > { %v4077_v18 = vpop.permute.xlu0 %4076 }
 0x48d   : > { %v4145_v41 = vsel %vm7321_vm7, %v4137_v50, %v4077_v18  ;;  %vm7330_vm7 = vcmask 162816  }
 0x48e   : > { %v4153_v29 = vsel %vm7322_vm9, %v4145_v41, %v4085_v39  ;;  %vm7331_vm9 = vcmask 195584   ;;  %vm7336_vm0 = vmmov %vm7330_vm7 }
 0x48f   : > { %v4051_v33 = vpop.permute.xlu1 %4050 }
 0x492   : > { %v4093_v11 = vpop.permute.xlu0 %4092 }
 0x493   : > { %v4161_v52 = vsel %vm7323_vm2, %v4153_v29, %v4093_v11  ;;  %vm7332_vm2 = vcmask 228352  }
 0x494   : > { %5331 = vmatprep.mubr.msk.bf16.mxu1 %vm7325_vm14, %v4161_v52  ;;  %vm7334_vm14 = vcmask 261120   ;;  %vm7338_vm5 = vmmov %vm7332_vm2 }
 0x495   : > { %v4055_v49 = vpop.permute.xlu1 %4054 }
 0x496   : > { %v4123_v9 = vsel %vm7327_vm1, %v4115_v13, %v4055_v49  ;;  %vm7337_vm1 = vmmov %vm7331_vm9 }
 0x497   : > { %v4131_v7 = vsel %vm7319_vm8, %v4123_v9, %v4063_v38  ;;  %vm7339_vm8 = vmmov %vm7334_vm14 }
 0x498   : > { %v4049_v40 = vpop.permute.xlu0 %4048 }
 0x499   : > { %v4117_v39 = vsel %vm1819_vm6, %v4108_v43, %v4049_v40 }
 0x49a   : > { %v4071_v14 = vpop.permute.xlu1 %4070  ;;  %v4125_v2 = vsel %vm7329_vm15, %v4117_v39, %v4057_v32  ;;  %vm7340_vm15 = vmmov %vm7335_vm4 }
 0x49b   : > { %v4139_v12 = vsel %vm7330_vm7, %v4131_v7, %v4071_v14  ;;  %v4133_v38 = vsel %vm7333_vm3, %v4125_v2, %v6871_v16  ;;  %vm7341_vm7 = vsmask.f32 4352 }
 0x49c   : > { %v4147_v34 = vsel %vm7331_vm9, %v4139_v12, %v4079_v8  ;;  %v4089_v25 = vpop.permute.xlu0 %4088  ;;  %v4141_v46 = vsel %vm7336_vm0, %v4133_v38, %v4073_v26  ;;  %vm7342_vm9 = vcmask 31744  }
 0x49d   : > { %v4155_v54 = vsel %vm7332_vm2, %v4147_v34, %v6869_v3  ;;  %v3594_v3 = vor.u32 %v3593_v53, %v3590_v17  ;;  %vm7343_vm2 = vcmask 97280  }
 0x49e   : > { %v4091_v56 = vpop.permute.xlu1 %4090  ;;  %v4163_v32 = vsel %vm7334_vm14, %v4155_v54, %v6877_v0  ;;  %vm7344_vm14 = vmmov %vm7336_vm0 }
 0x49f   : > { %5332 = vmatmul.mubr.msk.bf16.vlgmr.msra.gmra.mrb[12].mxu1 %vm7335_vm4, %v4163_v32  ;;  %v3595_v21 = vsel %vm7341_vm7, %v3586_v57, %v3594_v3  ;;  %vm7345_vm4 = vmmov %vm7337_vm1 }
 0x4a0   : > { %v4081_v19 = vpop.permute.xlu0 %4080  ;;  %v4111_v10 = vsel %vm7342_vm9, %v3595_v21, %v6875_v63  ;;  %vm7346_vm0 = vmmov %vm7338_vm5  ;;  %v5206_v63 = vld [vmem:[%s7112_s8] ss:$0 sm:$0xff] }
 0x4a1   : > { %v4149_v35 = vsel %vm7337_vm1, %v4141_v46, %v4081_v19  ;;  %v4119_v26 = vsel %vm1819_vm6, %v4111_v10, %v4051_v33  ;;  %vm7347_vm1 = vmmov %vm7339_vm8 }
 0x4a2   : > { %v4067_v62 = vpop.permute.xlu1 %4066  ;;  %v4157_v16 = vsel %vm7338_vm5, %v4149_v35, %v4089_v25  ;;  %vm7348_vm5 = vmmov %vm7340_vm15 }
 0x4a4   : > { %v4097_v8 = vpop.permute.xlu0 %4096 }
 0x4a5   : > { %v4165_v5 = vsel %vm7339_vm8, %v4157_v16, %v4097_v8  ;;  %vm7349_vm8 = vmmov %vm7342_vm9 }
 0x4a6   : > { %v4083_v0 = vpop.permute.xlu1 %4082  ;;  %5335 = vmatprep.mubr.msk.bf16.mxu1 %vm7340_vm15, %v4165_v5  ;;  %vm7350_vm15 = vmmov %vm7349_vm8 }
 0x4a7   : > { %vm7351_vm7 = vmmov %vm7349_vm8 }
 0x4a8   : > { %v5439_v9 = vpop.permute.xlu0 %5438  ;;  %vm7352_vm9 = vmmov %vm7351_vm7 }
 0x4a9   : > { %v5441_v58 = vunpack.i.h.bf16 %v5439_v9  ;;  %v5440_v12 = vunpack.i.l.bf16 %v5439_v9 }
 0x4aa   : > { %v4059_v27 = vpop.permute.xlu1 %4058 }
 0x4ab   : > { %v4127_v28 = vsel %vm7343_vm2, %v4119_v26, %v4059_v27  ;;  %vm7353_vm2 = vmmov %vm7351_vm7 }
 0x4ac   : > { %v4135_v55 = vsel %vm7333_vm3, %v4127_v28, %v4067_v62  ;;  %vm7354_vm3 = vmmov %vm7353_vm2 }
 0x4ae   : > { %v4075_v30 = vpop.permute.xlu1 %4074 }
 0x4af   : > { %v4143_v1 = vsel %vm7344_vm14, %v4135_v55, %v4075_v30  ;;  %vm7355_vm14 = vmmov %vm7353_vm2 }
 0x4b0   : > { %v4151_v18 = vsel %vm7345_vm4, %v4143_v1, %v4083_v0  ;;  %v5449_v0 = vpop.permute.xlu0 %5448  ;;  %vm7356_vm4 = vmmov %vm7353_vm2 }
 0x4b1   : > { %v4159_v48 = vsel %vm7346_vm0, %v4151_v18, %v4091_v56  ;;  %v5451_v1 = vunpack.i.h.bf16 %v5449_v0  ;;  %v5450_v18 = vunpack.i.l.bf16 %v5449_v0  ;;  %vm7357_vm0 = vcmask 1045509  }
 0x4b2   : > { %v4099_v50 = vpop.permute.xlu1 %4098 }
 0x4b3   : > { %v4167_v61 = vsel %vm7347_vm1, %v4159_v48, %v4099_v50  ;;  %vm7358_vm1 = vcmask 1046534  }
 0x4b4   : > { %5336 = vmatmul.mubr.msk.bf16.gmra.mrb[16].mxu1 %vm7348_vm5, %v4167_v61  ;;  %vm7359_vm5 = vcmask 1047559  }
 0x4b6   : > { %v5444_v49 = vpop.permute.xlu1 %5443 }
 0x4b7   : > { %v5446_v7 = vunpack.i.h.bf16 %v5444_v49  ;;  %v5445_v14 = vunpack.i.l.bf16 %v5444_v49 }
 0x4ba   : > { %v5454_v16 = vpop.permute.xlu1 %5453 }
 0x4bb   : > { %v5456_v28 = vunpack.i.h.bf16 %v5454_v16  ;;  %v5455_v55 = vunpack.i.l.bf16 %v5454_v16 }
 0x572   : > { %v5333_v15 = vpop.f32.mrb[12].mxu1 }
 0x573   : > { %v4273_v33 = vmul.f32 %v5333_v15, %v5206_v63  ;;  %v4233_v41 = vpop.f32.mrb[13].mxu1 }
 0x574   : > { %v4271_v36 = vmul.f32 %v5206_v63, %v4233_v41  ;;  %v5334_v4 = vpop.f32.mrb[14].mxu1  ;;  %v6953_v41 = vld [vmem:[%s7115_s11] ss:$0 sm:$0xff] }
 0x575   : > { %v4288_v29 = vadd.f32 %v5207_v24, %v4273_v33  ;;  %v4274_v11 = vmul.f32 %v5334_v4, %v5206_v63  ;;  %v4236_v45 = vpop.f32.mrb[15].mxu1  ;;  %v6958_v4 = vld [vmem:[%s7116_s12] ss:$0 sm:$0xff] }
 0x576   : > { %v4286_v37 = vadd.f32 %v5207_v24, %v4271_v36  ;;  %v4272_v52 = vmul.f32 %v5206_v63, %v4236_v45 }
 0x577   : > { %v4296_v44 = vmul.f32 0.1, %v4288_v29  ;;  %v4289_v31 = vadd.f32 %v5207_v24, %v4274_v11 }
 0x578   : > { %v4294_v13 = vmul.f32 0.1, %v4286_v37  ;;  %v4287_v59 = vadd.f32 %v5207_v24, %v4272_v52 }
 0x579   : > { %v4304_v43 = vmax.f32 %v4288_v29, %v4296_v44  ;;  %v4297_v40 = vmul.f32 0.1, %v4289_v31 }
 0x57a   : > { %v4302_v47 = vmax.f32 %v4286_v37, %v4294_v13  ;;  %v4295_v39 = vmul.f32 0.1, %v4287_v59 }
 0x57b   : > { %v4305_v2 = vmax.f32 %v4289_v31, %v4297_v40  ;;  %v4344_v60 = vsel %vm7349_vm8, %v4304_v43, %v5445_v14  ;;  %vm7362_vm8 = vmmov %vm7359_vm5 }
 0x57c   : > { %v4303_v51 = vmax.f32 %v4287_v59, %v4295_v39  ;;  %v4342_v25 = vsel %vm7351_vm7, %v4302_v47, %v5440_v12 }
 0x57d   : > { %v4345_v42 = vsel %vm7350_vm15, %v4305_v2, %v5446_v7 }
 0x57e   : > { %v4351_v34 = vpack.c.bf16 %v4345_v42, %v4344_v60  ;;  %v4343_v54 = vsel %vm7352_vm9, %v4303_v51, %v5441_v58 }
 0x57f   : > { %v4350_v38 = vpack.c.bf16 %v4343_v54, %v4342_v25 }
 0x581   : > { %5341 = vmatprep.mubr.msk.bf16.mxu0 %vm1819_vm6, %v4350_v38 }
 0x582   : > { %5342 = vmatmul.mubr.msk.bf16.vlgmr.msra.gmra.mrb[16].mxu0 %vm1819_vm6, %v4351_v34 }
 0x587   : > { %v5337_v56 = vpop.f32.mrb[16].mxu1 }
 0x588   : > { %v4277_v32 = vmul.f32 %v5337_v56, %v5206_v63  ;;  %v4249_v17 = vpop.f32.mrb[17].mxu1 }
 0x589   : > { %v4275_v53 = vmul.f32 %v5206_v63, %v4249_v17  ;;  %v5338_v23 = vpop.f32.mrb[18].mxu1 }
 0x58a   : > { %v4292_v20 = vadd.f32 %v5207_v24, %v4277_v32  ;;  %v4278_v46 = vmul.f32 %v5338_v23, %v5206_v63  ;;  %v4252_v19 = vpop.f32.mrb[19].mxu1 }
 0x58b   : > { %v4290_v35 = vadd.f32 %v5207_v24, %v4275_v53  ;;  %v4276_v62 = vmul.f32 %v5206_v63, %v4252_v19 }
 0x58c   : > { %v4300_v3 = vmul.f32 0.1, %v4292_v20  ;;  %v4293_v57 = vadd.f32 %v5207_v24, %v4278_v46 }
 0x58d   : > { %v4298_v8 = vmul.f32 0.1, %v4290_v35  ;;  %v4291_v5 = vadd.f32 %v5207_v24, %v4276_v62 }
 0x58e   : > { %v4308_v21 = vmax.f32 %v4292_v20, %v4300_v3  ;;  %v4301_v10 = vmul.f32 0.1, %v4293_v57 }
 0x58f   : > { %v4306_v26 = vmax.f32 %v4290_v35, %v4298_v8  ;;  %v4299_v27 = vmul.f32 0.1, %v4291_v5 }
 0x590   : > { %v4309_v30 = vmax.f32 %v4293_v57, %v4301_v10  ;;  %v4348_v50 = vsel %vm7353_vm2, %v4308_v21, %v5455_v55 }
 0x591   : > { %v4307_v48 = vmax.f32 %v4291_v5, %v4299_v27  ;;  %v4346_v63 = vsel %vm7355_vm14, %v4306_v26, %v5450_v18 }
 0x592   : > { %v4349_v61 = vsel %vm7354_vm3, %v4309_v30, %v5456_v28 }
 0x593   : > { %v4347_v15 = vsel %vm7356_vm4, %v4307_v48, %v5451_v1  ;;  %v4353_v24 = vpack.c.bf16 %v4349_v61, %v4348_v50 }
 0x594   : > { %v4352_v33 = vpack.c.bf16 %v4347_v15, %v4346_v63 }
 0x596   : > { %5345 = vmatprep.mubr.msk.bf16.mxu0 %vm1819_vm6, %v4352_v33 }
 0x597   : > { %5346 = vmatmul.mubr.msk.bf16.gmra.mrb[20].mxu0 %vm1819_vm6, %v4353_v24 }
 0x655   : > { %v5343_v36 = vpop.f32.mrb[16].mxu0 }
 0x656   : > { %v4445_v29 = vmul.f32 %v5343_v36, %v6953_v41  ;;  %v4405_v11 = vpop.f32.mrb[17].mxu0 }
 0x657   : > { %v4443_v45 = vmul.f32 %v6953_v41, %v4405_v11  ;;  %v5344_v37 = vpop.f32.mrb[18].mxu0 }
 0x658   : > { %v4460_v52 = vadd.f32 %v6958_v4, %v4445_v29  ;;  %v4446_v44 = vmul.f32 %v5344_v37, %v6953_v41  ;;  %v4408_v31 = vpop.f32.mrb[19].mxu0 }
 0x659   : > { %v4458_v49 = vadd.f32 %v6958_v4, %v4443_v45  ;;  %v4444_v13 = vmul.f32 %v6953_v41, %v4408_v31 }
 0x65a   : > { %v4468_v59 = vmul.f32 0.1, %v4460_v52  ;;  %v4461_v9 = vadd.f32 %v6958_v4, %v4446_v44 }
 0x65b   : > { %v4466_v43 = vmul.f32 0.1, %v4458_v49  ;;  %v4459_v40 = vadd.f32 %v6958_v4, %v4444_v13 }
 0x65c   : > { %v4476_v47 = vmax.f32 %v4460_v52, %v4468_v59  ;;  %v4469_v39 = vmul.f32 0.1, %v4461_v9 }
 0x65d   : > { %v4474_v7 = vmax.f32 %v4458_v49, %v4466_v43  ;;  %v4467_v14 = vmul.f32 0.1, %v4459_v40 }
 0x65e   : > { %4484 = vst.msk [vmem:[%s6970_s25 + $0x10] sm:$0xff] %vm1819_vm6, %v4476_v47  ;;  %v4477_v2 = vmax.f32 %v4461_v9, %v4469_v39 }
 0x65f   : > { %4482 = vst.msk [vmem:[%s6970_s25] sm:$0xff] %vm1819_vm6, %v4474_v7  ;;  %v4751_v58 = vmax.f32 %v4474_v7, %v4476_v47  ;;  %v4475_v12 = vmax.f32 %v4459_v40, %v4467_v14 }
 0x660   : > { %4485 = vst.msk [vmem:[%s6970_s25 + $0x18] sm:$0xff] %vm1819_vm6, %v4477_v2 }
 0x661   : > { %v4759_v51 = vcombine.high %v4751_v58, %v4751_v58  ;;  %v4766_v60 = vrot.slane %v4751_v58, %v6178_v6  ;;  %4483 = vst.msk [vmem:[%s6970_s25 + $0x8] sm:$0xff] %vm1819_vm6, %v4475_v12  ;;  %v4752_v42 = vmax.f32 %v4475_v12, %v4477_v2 }
 0x663   : > { %v4773_v34 = vrot.slane %v4759_v51, %v6178_v6  ;;  %v4774_v25 = vcombine.high %v4766_v60, %v4766_v60  ;;  %v5230_v54 = vrot.slane %v4766_v60, 9  ;;  %v4776_v38 = vcombine.high %v4752_v42, %v4752_v42 }
 0x664   : > { %v4783_v56 = vrot.slane %v4752_v42, %v6178_v6 }
 0x665   : > { %v4775_v32 = vcombine.high %v4773_v34, %v4773_v34  ;;  %v5231_v17 = vrot.slane %v4774_v25, 9  ;;  %v5232_v53 = vrot.slane %v4773_v34, 9  ;;  %v4891_v23 = vmax.f32 %v4766_v60, %v5230_v54 }
 0x666   : > { %v4790_v20 = vrot.slane %v4776_v38, %v6178_v6  ;;  %v4791_v46 = vcombine.high %v4783_v56, %v4783_v56  ;;  %v5234_v19 = vrot.slane %v4783_v56, 9 }
 0x667   : > { %v5233_v35 = vrot.slane %v4775_v32, 9  ;;  %v4892_v62 = vmax.f32 %v4774_v25, %v5231_v17  ;;  %v4893_v3 = vmax.f32 %v4773_v34, %v5232_v53  ;;  %v4926_v57 = vrot.slane %v4891_v23, %v6185_v22 }
 0x668   : > { %v5235_v16 = vrot.slane %v4791_v46, 9  ;;  %v4792_v8 = vcombine.high %v4790_v20, %v4790_v20  ;;  %v5236_v5 = vrot.slane %v4790_v20, 9  ;;  %v4895_v26 = vmax.f32 %v4783_v56, %v5234_v19 }
 0x669   : > { %v4894_v0 = vmax.f32 %v4775_v32, %v5233_v35  ;;  %v4930_v21 = vrot.slane %v4892_v62, %v6185_v22  ;;  %v4934_v10 = vrot.slane %v4893_v3, %v6185_v22 }
 0x66a   : > { %v5347_v27 = vpop.f32.mrb[20].mxu0  ;;  %v5237_v28 = vrot.slane %v4792_v8, 9  ;;  %v4896_v55 = vmax.f32 %v4791_v46, %v5235_v16  ;;  %v4897_v18 = vmax.f32 %v4790_v20, %v5236_v5  ;;  %v4942_v29 = vrot.slane %v4895_v26, %v6185_v22 }
 0x66b   : > { %v4449_v30 = vmul.f32 %v5347_v27, %v6953_v41  ;;  %v4421_v1 = vpop.f32.mrb[21].mxu0  ;;  %v4938_v48 = vrot.slane %v4894_v0, %v6185_v22  ;;  %v4987_v50 = vsel %vm4726_vm10, %v4930_v21, %v4926_v57 }
 0x66c   : > { %v4447_v61 = vmul.f32 %v6953_v41, %v4421_v1  ;;  %v5348_v63 = vpop.f32.mrb[22].mxu0  ;;  %v4898_v15 = vmax.f32 %v4792_v8, %v5237_v28  ;;  %v4988_v11 = vsel %vm4728_vm11, %v4934_v10, %v4987_v50  ;;  %v4946_v52 = vrot.slane %v4896_v55, %v6185_v22 }
 0x66d   : > { %v4464_v24 = vadd.f32 %v6958_v4, %v4449_v30  ;;  %v4450_v33 = vmul.f32 %v5348_v63, %v6953_v41  ;;  %v4424_v36 = vpop.f32.mrb[23].mxu0  ;;  %v4989_v44 = vsel %vm4730_vm12, %v4938_v48, %v4988_v11  ;;  %v4950_v13 = vrot.slane %v4897_v18, %v6185_v22 }
 0x66e   : > { %v4462_v45 = vadd.f32 %v6958_v4, %v4447_v61  ;;  %v4448_v37 = vmul.f32 %v6953_v41, %v4424_v36  ;;  %v4990_v59 = vsel %vm4732_vm13, %v4942_v29, %v4989_v44  ;;  %v4954_v40 = vrot.slane %v4898_v15, %v6185_v22 }
 0x66f   : > { %v4472_v31 = vmul.f32 0.1, %v4464_v24  ;;  %v4465_v49 = vadd.f32 %v6958_v4, %v4450_v33  ;;  %v4991_v41 = vsel %vm7357_vm0, %v4946_v52, %v4990_v59 }
 0x670   : > { %v4470_v9 = vmul.f32 0.1, %v4462_v45  ;;  %v4463_v43 = vadd.f32 %v6958_v4, %v4448_v37  ;;  %v4992_v7 = vsel %vm7358_vm1, %v4950_v13, %v4991_v41 }
 0x671   : > { %v4480_v47 = vmax.f32 %v4464_v24, %v4472_v31  ;;  %v4473_v39 = vmul.f32 0.1, %v4465_v49  ;;  %v4993_v58 = vsel %vm7359_vm5, %v4954_v40, %v4992_v7 }
 0x672   : > { %v4478_v14 = vmax.f32 %v4462_v45, %v4470_v9  ;;  %v4471_v2 = vmul.f32 0.1, %v4463_v43  ;;  %5001 = vrot.lane.b32.xlu0 %v4993_v58, %s7181_s24 }
 0x673   : > { %4488 = vst.msk [vmem:[%s6970_s25 + $0x30] sm:$0xff] %vm1819_vm6, %v4480_v47  ;;  %v4481_v12 = vmax.f32 %v4465_v49, %v4473_v39 }
 0x674   : > { %4486 = vst.msk [vmem:[%s6970_s25 + $0x20] sm:$0xff] %vm1819_vm6, %v4478_v14  ;;  %v4753_v4 = vmax.f32 %v4478_v14, %v4480_v47  ;;  %v4479_v51 = vmax.f32 %v4463_v43, %v4471_v2 }
 0x675   : > { %4489 = vst.msk [vmem:[%s6970_s25 + $0x38] sm:$0xff] %vm1819_vm6, %v4481_v12 }
 0x676   : > { %v4793_v60 = vcombine.high %v4753_v4, %v4753_v4  ;;  %v4800_v42 = vrot.slane %v4753_v4, %v6178_v6  ;;  %4487 = vst.msk [vmem:[%s6970_s25 + $0x28] sm:$0xff] %vm1819_vm6, %v4479_v51  ;;  %v4754_v34 = vmax.f32 %v4479_v51, %v4481_v12  ;;  %vm7360_vm6 = vmmov %vm7357_vm0  ;;  %s5479_s25 = scalar_lea.vmem %s5478_s19, 512 }
 0x677   : > { %p5481_p5 = scmp.lt.s32.totalorder %s5479_s25, %s5473_s16 }
 0x678   : > { %v4807_v25 = vrot.slane %v4793_v60, %v6178_v6  ;;  %v4808_v54 = vcombine.high %v4800_v42, %v4800_v42  ;;  %v5238_v38 = vrot.slane %v4800_v42, 9  ;;  %v4810_v56 = vcombine.high %v4754_v34, %v4754_v34 }
 0x679   : > { %v4817_v32 = vrot.slane %v4754_v34, %v6178_v6  ;;  %p5482_p6 = por %p5481_p5, %p5480_p4 }
 0x67a   : > { %v4809_v17 = vcombine.high %v4807_v25, %v4807_v25  ;;  %v5239_v53 = vrot.slane %v4808_v54, 9  ;;  %v5240_v23 = vrot.slane %v4807_v25, 9  ;;  %v4899_v20 = vmax.f32 %v4800_v42, %v5238_v38 }
 0x67b   : > { %v4824_v46 = vrot.slane %v4810_v56, %v6178_v6  ;;  %v4825_v19 = vcombine.high %v4817_v32, %v4817_v32  ;;  %v5242_v35 = vrot.slane %v4817_v32, 9  ;;  %p5483_p7 = pnand %p5482_p6, %p5476_p2 }
 0x67c   : > { %v5241_v62 = vrot.slane %v4809_v17, 9  ;;  %v4900_v3 = vmax.f32 %v4808_v54, %v5239_v53  ;;  %v4901_v57 = vmax.f32 %v4807_v25, %v5240_v23  ;;  %v4958_v10 = vrot.slane %v4899_v20, %v6185_v22 }
 0x67d   : > { %v5243_v16 = vrot.slane %v4825_v19, 9  ;;  %v4903_v8 = vmax.f32 %v4817_v32, %v5242_v35  ;;  %v4826_v5 = vcombine.high %v4824_v46, %v4824_v46  ;;  %v5244_v0 = vrot.slane %v4824_v46, 9 }
 0x67e   : > { %v4902_v21 = vmax.f32 %v4809_v17, %v5241_v62  ;;  %v4962_v26 = vrot.slane %v4900_v3, %v6185_v22  ;;  %v4966_v27 = vrot.slane %v4901_v57, %v6185_v22 }
 0x67f   : > { %v5245_v28 = vrot.slane %v4826_v5, 9  ;;  %v4904_v55 = vmax.f32 %v4825_v19, %v5243_v16  ;;  %v4905_v30 = vmax.f32 %v4824_v46, %v5244_v0  ;;  %v4974_v48 = vrot.slane %v4903_v8, %v6185_v22 }
 0x680   : > { %v4970_v6 = vrot.slane %v4902_v21, %v6185_v22  ;;  %v4994_v1 = vsel %vm4726_vm10, %v4962_v26, %v4958_v10  ;;  %vm7361_vm10 = vmmov %vm7358_vm1 }
 0x681   : > { %v4906_v18 = vmax.f32 %v4826_v5, %v5245_v28  ;;  %v4995_v50 = vsel %vm4728_vm11, %v4966_v27, %v4994_v1  ;;  %v4978_v61 = vrot.slane %v4904_v55, %v6185_v22  ;;  %v4982_v15 = vrot.slane %v4905_v30, %v6185_v22 }
 0x682   : > { %v4996_v63 = vsel %vm4730_vm12, %v4970_v6, %v4995_v50  ;;  %vm5007_vm11 = vcmask 130112  }
 0x683   : > { %v4997_v24 = vsel %vm4732_vm13, %v4974_v48, %v4996_v63  ;;  %v4986_v33 = vrot.slane %v4906_v18, %v6185_v22 }
 0x684   : > { %v4998_v36 = vsel %vm7360_vm6, %v4978_v61, %v4997_v24 }
 0x685   : > { %v4999_v29 = vsel %vm7361_vm10, %v4982_v15, %v4998_v36 }
 0x686   : > { %v5000_v11 = vsel %vm7362_vm8, %v4986_v33, %v4999_v29 }
 0x687   : > { %5003 = vrot.lane.b32.xlu1 %v5000_v11, %s7181_s24 }
 0x6e4   : > { %v5002_v45 = vpop.permute.xlu0 %5001 }
 0x6e5   : > { %5008 = vst.msk [vmem:[%s6214_s27] sm:$0xff] %vm5007_vm11, %v5002_v45 }
 0x6f9   : > { %v5004_v22 = vpop.permute.xlu1 %5003 }
 0x6fa   : > { %5009 = vst.msk [vmem:[%s6214_s27 + $0x8] sm:$0xff] %vm5007_vm11, %v5004_v22 }
 0x6fb   : > { %5486 = shalt.err (!%p5483_p7)
}
 0x6fc   : > { %s5487_s27 = scalar_lea.hbm %s7046_s0, 256  ;;  %s5491_s21 = scalar_lea.hbm %s7364_s2, 2048 }
 0x6fd   : > { %p5488_p9 = scmp.ne.s32.totalorder %s7046_s0, %s5487_s27  ;;  %p5492_p12 = scmp.lt.u32.totalorder %s7046_s0, %s7364_s2 }
 0x6fe   : > { %p5493_p13 = scmp.lt.u32.totalorder %s5491_s21, %s5487_s27  ;;  %p5495_p1 = scmp.lt.u32.totalorder %s5487_s27, %s7046_s0 }
 0x6ff   : > { %p5489_p10 = pnand %p5488_p9, %p5708_p3 }
 0x700   : > { %p5494_p0 = por %p5493_p13, %p5492_p12 }
 0x701   : > { %p5490_p11 = pneg %p5489_p10 }
 0x702   : > { %p5496_p2 = por %p5495_p1, %p5494_p0 }
 0x704   : > { %p5497_p4 = pnand %p5496_p2, %p5490_p11 }
 0x706   : > { %5500 = shalt.err (!%p5497_p4)
}
 0x707   : > { %s5581_s1 = smov 128  }
 0x708   : > { %5354 = dma.vmem_to_hbm [thread:$0]  (%p5708_p3), %s7041_s23, 256, %s7046_s0, %s7051_s14, %s5581_s1, %s5581_s1, %s7181_s24  }
 0x709 PF: > { %s7366_s15 = sld [smem:[#allocation7_spill]]  ;;  %p5360_p5 = scmp.ge.s32.totalorder %s5567_s20, 2 }
 0x70b   : > { %p5357_p6 = pnand %p5360_p5, %p5717_p8 }
 0x70f   : > { %s5068_s16 = sand.u32 1, %s7366_s15  }
 0x710   : > { %s5069_s17 = scalar_lea.sflag [#allocation5], %s5068_s16 }
 0x711   : > { %5534 = dma.done.wait (!%p5357_p6), %s5069_s17, 256  }
 0x712   : > { %5536 = vsyncadd (!%p5357_p6), %s5069_s17, 4294967040  ;;  %s28_s20 = sadd.s32 1, %s5567_s20   ;;  %s7368_s26 = sld [smem:[#allocation8_spill]] }
 0x713   : > { %p25_p7 = scmp.ge.s32.totalorder %s28_s20, 10   ;;  %s7369_s15 = sld [smem:[#allocation14_spill]] }
 0x714   : > { %s7370_s16 = sld [smem:[#allocation9_spill]]  ;;  %s7371_s17 = sld [smem:[#allocation10_spill]] }
 0x715   : > { %s7372_s18 = sld [smem:[#allocation11_spill]]  ;;  %s7373_s19 = sld [smem:[#allocation12_spill]] }
 0x716   : > { %s7374_s29 = smov %s5543_s30  ;;  %27 = sbr.rel (!%p25_p7) target bundleno = 11 (0xb), region = 124 }
 0x718   : > { %s7375_s30 = smov %s7368_s26 }
 0x71d   :  { %5074 = vsyncpa [#allocation5], 1 }
 0x71e   :  { %5076 = vsyncpa [#allocation5 + $0x1], 1 }

</bundles_post_ra>
